<compile_context>
chip_gen: v5e
topology: v5e:2x2
jax: 0.10.0
libtpu: 0.0.40
codegen_flags: <defaults>
</compile_context>

<pallas_src>
import math

import jax
import jax.numpy as jnp
from jax.experimental import pallas as pl
from jax.experimental.pallas import tpu as pltpu


# ---------------------------------------------------------------------------
# Small helpers
# ---------------------------------------------------------------------------
def _round_up(x, m):
    return (x + m - 1) // m * m


def _choose_tk(kp):
    """Largest K tile (multiple of 128, <= 1024) that divides the padded K."""
    if kp <= 1024:
        return kp
    best = 128
    t = 128
    while t <= 1024:
        if kp % t == 0:
            best = t
        t += 128
    return best


def _pick_row_tile(rows, row_bytes, budget=2 * 1024 * 1024):
    """Largest row tile that divides `rows`, is 16-aligned (or full) and fits."""
    if rows * row_bytes <= budget:
        return rows
    for d in range(rows, 0, -1):
        if rows % d == 0 and d % 16 == 0 and d * row_bytes <= budget:
            return d
    return rows


# ---------------------------------------------------------------------------
# Pallas kernels
# ---------------------------------------------------------------------------
def _make_matmul_affine_kernel(relu):
    """Tiled (M,K)x(K,C) matmul with f32 accumulator + affine (+ReLU) epilogue."""

    def kernel(x_ref, w_ref, scale_ref, bias_ref, o_ref, acc_ref):
        @pl.when(pl.program_id(2) == 0)
        def _init():
            acc_ref[...] = jnp.zeros_like(acc_ref)

        acc_ref[...] += jnp.dot(x_ref[0], w_ref[...],
                                preferred_element_type=jnp.float32)

        @pl.when(pl.program_id(2) == pl.num_programs(2) - 1)
        def _epilogue():
            y = acc_ref[...] * scale_ref[...] + bias_ref[...]
            if relu:
                y = jnp.maximum(y, 0.0)
            o_ref[0] = y.astype(o_ref.dtype)

    return kernel


def _max4_kernel(a_ref, b_ref, c_ref, d_ref, o_ref):
    # 2x2 max-pool reduction over the four window corners (max math in f32).
    a = a_ref[...].astype(jnp.float32)
    b = b_ref[...].astype(jnp.float32)
    c = c_ref[...].astype(jnp.float32)
    d = d_ref[...].astype(jnp.float32)
    o_ref[...] = jnp.maximum(jnp.maximum(a, b),
                             jnp.maximum(c, d)).astype(o_ref.dtype)


# ---------------------------------------------------------------------------
# pallas_call wrappers
# ---------------------------------------------------------------------------
def _matmul_affine(x, w, scale, bias, *, relu, out_dtype):
    """y[n] = act(x[n] @ w) * scale + bias.   x: (N, M, K) float, w: (K, C)."""
    N, M, K = (int(s) for s in x.shape)
    C = int(w.shape[1])

    Kp = _round_up(K, 128)           # lane-aligned contracting dim
    Cp = _round_up(C, 128)           # lane-dense output columns
    TM = _round_up(M, 16) if M <= 1024 else 512
    Mp = _round_up(M, TM)
    TK = _choose_tk(Kp)

    xb = x.astype(jnp.bfloat16)
    if (Mp, Kp) != (M, K):
        xb = jnp.pad(xb, ((0, 0), (0, Mp - M), (0, Kp - K)))
    wb = w.astype(jnp.bfloat16)
    if (Kp, Cp) != (K, C):
        wb = jnp.pad(wb, ((0, Kp - K), (0, Cp - C)))
    sb = jnp.pad(scale.astype(jnp.float32), (0, Cp - C)).reshape(1, Cp)
    bb = jnp.pad(bias.astype(jnp.float32), (0, Cp - C)).reshape(1, Cp)

    grid = (N, Mp // TM, Kp // TK)
    out = pl.pallas_call(
        _make_matmul_affine_kernel(relu),
        out_shape=jax.ShapeDtypeStruct((N, Mp, Cp), out_dtype),
        grid=grid,
        in_specs=[
            pl.BlockSpec((1, TM, TK), lambda n, m, k: (n, m, k)),
            pl.BlockSpec((TK, Cp), lambda n, m, k: (k, 0)),
            pl.BlockSpec((1, Cp), lambda n, m, k: (0, 0)),
            pl.BlockSpec((1, Cp), lambda n, m, k: (0, 0)),
        ],
        out_specs=pl.BlockSpec((1, TM, Cp), lambda n, m, k: (n, m, 0)),
        scratch_shapes=[pltpu.VMEM((TM, Cp), jnp.float32)],
        compiler_params=pltpu.CompilerParams(
            dimension_semantics=("parallel", "parallel", "arbitrary"),
            vmem_limit_bytes=40 * 1024 * 1024),
        cost_estimate=pl.CostEstimate(
            flops=2 * N * Mp * Kp * Cp,
            transcendentals=0,
            bytes_accessed=2 * (N * Mp * Kp + Kp * Cp + N * Mp * Cp)),
    )(xb, wb, sb, bb)

    if (Mp, Cp) != (M, C):
        out = out[:, :M, :C]
    return out


def conv3x3_bn_relu(xs, w, gamma, beta, mean, var, eps=1e-5):
    """3x3 conv (pad=1, no bias) + BatchNorm(eval) + ReLU over the channel-wise
    concatenation of the NHWC tensors in `xs` (concat fused into im2col)."""
    if not isinstance(xs, (list, tuple)):
        xs = [xs]
    N, H, W, _ = (int(s) for s in xs[0].shape)
    cin = sum(int(x.shape[-1]) for x in xs)
    cout = int(w.shape[-1])

    inv = gamma / jnp.sqrt(var + eps)
    scale = inv
    bias = beta - mean * inv

    # im2col in bf16 (halved HBM bytes vs f32).
    # TODO(synk): fold the 9-tap accumulation into the Pallas kernel with halo
    # row tiles so the 9x-wide xcol is never materialised in HBM.
    xps = [jnp.pad(x.astype(jnp.bfloat16), ((0, 0), (1, 1), (1, 1), (0, 0)))
           for x in xs]
    cols = [xp[:, dy:dy + H, dx:dx + W, :]
            for dy in range(3) for dx in range(3) for xp in xps]
    xcol = jnp.concatenate(cols, axis=-1).reshape(N, H * W, 9 * cin)
    wmat = w.reshape(9 * cin, cout)

    out = _matmul_affine(xcol, wmat, scale, bias, relu=True,
                         out_dtype=jnp.bfloat16)
    return out.reshape(N, H, W, cout)


def conv1x1_bias(x, w, b):
    """1x1 conv with bias (OutConv).  x: NHWC, w: (Cin, Cout), b: (Cout,)."""
    N, H, W, cin = (int(s) for s in x.shape)
    cout = int(w.shape[-1])
    out = _matmul_affine(x.reshape(N, H * W, cin), w,
                         jnp.ones((cout,), jnp.float32), b,
                         relu=False, out_dtype=jnp.float32)
    return out.reshape(N, H, W, cout)


def maxpool2x2(x):
    """nn.MaxPool2d(kernel_size=2, stride=2).  x: NHWC with even H, W."""
    N, H, W, C = (int(s) for s in x.shape)
    Hh, Wh = H // 2, W // 2
    L = Wh * C  # lane-flattened trailing dim -> lane-dense loads/stores

    # Four window corners (XLA strided slices), lane-flattened.
    # TODO(synk): fuse the 2x2 max into the preceding conv epilogue to drop
    # these strided-slice materialisations entirely.
    corners = [x[:, dy::2, dx::2, :].reshape(N, Hh, L)
               for dy in range(2) for dx in range(2)]

    row_bytes = L * x.dtype.itemsize
    TP = _pick_row_tile(Hh, row_bytes)
    spec = pl.BlockSpec((1, TP, L), lambda n, t: (n, t, 0))
    out = pl.pallas_call(
        _max4_kernel,
        out_shape=jax.ShapeDtypeStruct((N, Hh, L), x.dtype),
        grid=(N, Hh // TP),
        in_specs=[spec, spec, spec, spec],
        out_specs=spec,
        compiler_params=pltpu.CompilerParams(
            dimension_semantics=("parallel", "parallel"),
            vmem_limit_bytes=40 * 1024 * 1024),
    )(*corners)
    return out.reshape(N, Hh, Wh, C)


def upsample2x_bilinear_align_corners(x):
    """nn.Upsample(scale_factor=2, mode='bilinear', align_corners=True). NHWC glue.
    TODO(synk): move the fixed-weight 2x lerp into the conv kernel instead of
    XLA gathers."""
    N, H, W, C = (int(s) for s in x.shape)

    def axis_coords(n_in, n_out):
        if n_in == 1:
            idx0 = jnp.zeros((n_out,), jnp.int32)
            return idx0, idx0, jnp.zeros((n_out,), jnp.float32)
        src = jnp.arange(n_out, dtype=jnp.float32) * ((n_in - 1) / (n_out - 1))
        i0 = jnp.clip(jnp.floor(src).astype(jnp.int32), 0, n_in - 2)
        frac = src - i0.astype(jnp.float32)
        return i0, i0 + 1, frac

    y0, y1, fy = axis_coords(H, 2 * H)
    x0, x1, fx = axis_coords(W, 2 * W)
    top = x[:, y0, :, :]
    bot = x[:, y1, :, :]
    rows = top * (1.0 - fy)[None, :, None, None] + bot * fy[None, :, None, None]
    left = rows[:, :, x0, :]
    right = rows[:, :, x1, :]
    out = left * (1.0 - fx)[None, None, :, None] + right * fx[None, None, :, None]
    return out.astype(jnp.bfloat16)


# ---------------------------------------------------------------------------
# Model blocks / parameters
# ---------------------------------------------------------------------------
def _uniform(key, shape, bound):
    return jax.random.uniform(key, shape, jnp.float32, -bound, bound)


def init_double_conv(key, cin, cout, cmid=None):
    cmid = cout if cmid is None else cmid
    k1, k2 = jax.random.split(key)
    return {
        "w1": _uniform(k1, (3, 3, cin, cmid), 1.0 / math.sqrt(9 * cin)),
        "g1": jnp.ones((cmid,), jnp.float32), "b1": jnp.zeros((cmid,), jnp.float32),
        "m1": jnp.zeros((cmid,), jnp.float32), "v1": jnp.ones((cmid,), jnp.float32),
        "w2": _uniform(k2, (3, 3, cmid, cout), 1.0 / math.sqrt(9 * cmid)),
        "g2": jnp.ones((cout,), jnp.float32), "b2": jnp.zeros((cout,), jnp.float32),
        "m2": jnp.zeros((cout,), jnp.float32), "v2": jnp.ones((cout,), jnp.float32),
    }


def double_conv(p, xs):
    x = conv3x3_bn_relu(xs, p["w1"], p["g1"], p["b1"], p["m1"], p["v1"])
    x = conv3x3_bn_relu(x, p["w2"], p["g2"], p["b2"], p["m2"], p["v2"])
    return x


def amsfn(x):
    # TODO(synk): AMSFN definition was not provided with the reference module;
    # it is channel/shape preserving, so treated as identity rather than faked.
    return x


def up_block(p, x1, x2):
    x1u = upsample2x_bilinear_align_corners(x1)
    # Spatial sizes are exact powers of two here, so the F.pad of standard Up
    # is a no-op.  The concat([x2, x1u]) is fused into the conv's im2col build
    # (never materialised in HBM as its own tensor).
    return double_conv(p, [x2, x1u])


def init_a_unet(key, in_channels, n_classes, base_channels):
    bc = base_channels
    keys = jax.random.split(key, 11)
    return {
        "inconv": init_double_conv(keys[0], in_channels, bc),
        "down1": init_double_conv(keys[1], bc, bc * 2),
        "down2": init_double_conv(keys[2], bc * 2, bc * 4),
        "down3": init_double_conv(keys[3], bc * 4, bc * 8),
        "center": init_double_conv(keys[4], bc * 8, bc * 8, cmid=bc * 16),
        "up1": init_double_conv(keys[5], bc * 16, bc * 4),
        "up2": init_double_conv(keys[6], bc * 8, bc * 2),
        "up3": init_double_conv(keys[7], bc * 4, bc),
        "up4": init_double_conv(keys[8], bc * 2, bc),
        "out_w": _uniform(keys[9], (bc, n_classes), 1.0 / math.sqrt(bc)),
        "out_b": _uniform(keys[10], (n_classes,), 1.0 / math.sqrt(bc)),
    }


def a_unet_forward(params, x_nchw):
    # Dropout2d layers are identity in eval/inference mode.
    x = jnp.transpose(x_nchw, (0, 2, 3, 1)).astype(jnp.float32)  # NCHW -> NHWC
    e1 = double_conv(params["inconv"], x)
    x1 = amsfn(e1)
    e2 = double_conv(params["down1"], maxpool2x2(x1))
    x2 = amsfn(e2)
    e3 = double_conv(params["down2"], maxpool2x2(x2))
    x3 = amsfn(e3)
    e4 = double_conv(params["down3"], maxpool2x2(x3))
    x4 = amsfn(e4)
    x5 = maxpool2x2(x4)
    c5 = double_conv(params["center"], x5)
    d4 = amsfn(up_block(params["up1"], c5, x4))
    d3 = amsfn(up_block(params["up2"], d4, x3))
    d2 = amsfn(up_block(params["up3"], d3, x2))
    d1 = amsfn(up_block(params["up4"], d2, x1))
    logits = conv1x1_bias(d1, params["out_w"], params["out_b"])
    return jnp.transpose(logits, (0, 3, 1, 2))  # NHWC -> NCHW


# ---------------------------------------------------------------------------
if __name__ == "__main__":
    key = jax.random.PRNGKey(0)
    pkey, xkey = jax.random.split(key)

    in_channels, n_classes, base_channels = 4, 3, 8
    N, H, W = 2, 16, 16

    params = init_a_unet(pkey, in_channels, n_classes, base_channels)
    x = jax.random.normal(xkey, (N, in_channels, H, W), jnp.float32)

    fwd = jax.jit(a_unet_forward)
    out = jax.block_until_ready(fwd(params, x))
    assert out.shape == (N, n_classes, H, W), out.shape
    assert bool(jnp.all(jnp.isfinite(out)))
    print("KERNEL_OK")
</pallas_src>

<mosaic_0001>
module attributes {stable_mosaic.version = 11 : i64} {
  func.func @kernel(%arg0: i32, %arg1: i32, %arg2: i32, %arg3: memref<1x256x128xbf16, #tpu.memory_space<vmem>>, %arg4: memref<128x128xbf16, #tpu.memory_space<vmem>>, %arg5: memref<1x128xf32, #tpu.memory_space<vmem>>, %arg6: memref<1x128xf32, #tpu.memory_space<vmem>>, %arg7: memref<1x256x128xbf16, #tpu.memory_space<vmem>>, %arg8: memref<256x128xf32, #tpu.memory_space<vmem>>) attributes {dimension_semantics = [#tpu.dimension_semantics<parallel>, #tpu.dimension_semantics<parallel>, #tpu.dimension_semantics<arbitrary>], iteration_bounds = array<i64: 2, 1, 1>, scalar_prefetch = 0 : i64, scratch_operands = 1 : i64, tpu.core_type = #tpu.core_type<tc>, window_params = [{transform_indices = @transform_0, window_bounds = array<i64: 1, 256, 128>}, {transform_indices = @transform_1, window_bounds = array<i64: 128, 128>}, {pipeline_mode = #tpu.pipeline_mode<synchronous>, transform_indices = @transform_2, window_bounds = array<i64: 1, 128>}, {pipeline_mode = #tpu.pipeline_mode<synchronous>, transform_indices = @transform_3, window_bounds = array<i64: 1, 128>}, {transform_indices = @transform_4, window_bounds = array<i64: 1, 256, 128>}]} {
    %c0_i32 = arith.constant 0 : i32
    %0 = arith.cmpi eq, %arg2, %c0_i32 : i32
    %1 = arith.extui %0 : i1 to i32
    %c0_i32_0 = arith.constant 0 : i32
    %2 = arith.cmpi ne, %1, %c0_i32_0 : i32
    scf.if %2 {
      %cst_11 = arith.constant 0.000000e+00 : f32
      %13 = vector.broadcast %cst_11 : f32 to vector<256x128xf32>
      %c0_12 = arith.constant 0 : index
      %c0_13 = arith.constant 0 : index
      %14 = vector.load %arg8[%c0_12, %c0_13] : memref<256x128xf32, #tpu.memory_space<vmem>>, vector<256x128xf32>
      tpu.vector_store %arg8[%c0_12, %c0_13], %13 {strides = array<i32>} : memref<256x128xf32, #tpu.memory_space<vmem>>, vector<256x128xf32>,
    } else {
    }
    %c0 = arith.constant 0 : index
    %c0_1 = arith.constant 0 : index
    %3 = vector.load %arg8[%c0, %c0_1] : memref<256x128xf32, #tpu.memory_space<vmem>>, vector<256x128xf32>
    %c0_2 = arith.constant 0 : index
    %c0_3 = arith.constant 0 : index
    %c0_4 = arith.constant 0 : index
    %4 = vector.load %arg3[%c0_2, %c0_3, %c0_4] : memref<1x256x128xbf16, #tpu.memory_space<vmem>>, vector<1x256x128xbf16>
    %5 = vector.shape_cast %4 : vector<1x256x128xbf16> to vector<256x128xbf16>
    %c0_5 = arith.constant 0 : index
    %c0_6 = arith.constant 0 : index
    %6 = vector.load %arg4[%c0_5, %c0_6] : memref<128x128xbf16, #tpu.memory_space<vmem>>, vector<128x128xbf16>
    %cst = arith.constant dense<0.000000e+00> : vector<256x128xf32>
    %7 = tpu.matmul %5, %6, %cst {dimension_numbers = #tpu.dot_dimension_numbers<[1], [0], [0], [1], [0, 0, 1, 1], [], []>} : vector<256x128xbf16>, vector<128x128xbf16>, vector<256x128xf32> -> vector<256x128xf32>
    %8 = arith.addf %3, %7 : vector<256x128xf32>
    %c0_7 = arith.constant 0 : index
    %c0_8 = arith.constant 0 : index
    %9 = vector.load %arg8[%c0_7, %c0_8] : memref<256x128xf32, #tpu.memory_space<vmem>>, vector<256x128xf32>
    tpu.vector_store %arg8[%c0_7, %c0_8], %8 {strides = array<i32>} : memref<256x128xf32, #tpu.memory_space<vmem>>, vector<256x128xf32>,
    %c0_i32_9 = arith.constant 0 : i32
    %10 = arith.cmpi eq, %arg2, %c0_i32_9 : i32
    %11 = arith.extui %10 : i1 to i32
    %c0_i32_10 = arith.constant 0 : i32
    %12 = arith.cmpi ne, %11, %c0_i32_10 : i32
    scf.if %12 {
      %c0_11 = arith.constant 0 : index
      %c0_12 = arith.constant 0 : index
      %13 = vector.load %arg8[%c0_11, %c0_12] : memref<256x128xf32, #tpu.memory_space<vmem>>, vector<256x128xf32>
      %c0_13 = arith.constant 0 : index
      %c0_14 = arith.constant 0 : index
      %14 = vector.load %arg5[%c0_13, %c0_14] : memref<1x128xf32, #tpu.memory_space<vmem>>, vector<1x128xf32>
      %15 = vector.broadcast %14 : vector<1x128xf32> to vector<256x128xf32>
      %16 = arith.mulf %13, %15 : vector<256x128xf32>
      %c0_15 = arith.constant 0 : index
      %c0_16 = arith.constant 0 : index
      %17 = vector.load %arg6[%c0_15, %c0_16] : memref<1x128xf32, #tpu.memory_space<vmem>>, vector<1x128xf32>
      %18 = vector.broadcast %17 : vector<1x128xf32> to vector<256x128xf32>
      %19 = arith.addf %16, %18 : vector<256x128xf32>
      %cst_17 = arith.constant 0.000000e+00 : f32
      %20 = vector.broadcast %cst_17 : f32 to vector<256x128xf32>
      %21 = arith.maximumf %19, %20 : vector<256x128xf32>
      %22 = arith.truncf %21 : vector<256x128xf32> to vector<256x128xbf16>
      %c0_18 = arith.constant 0 : index
      %c0_19 = arith.constant 0 : index
      %c0_20 = arith.constant 0 : index
      %23 = vector.load %arg7[%c0_18, %c0_19, %c0_20] : memref<1x256x128xbf16, #tpu.memory_space<vmem>>, vector<1x256x128xbf16>
      %24 = vector.shape_cast %23 : vector<1x256x128xbf16> to vector<256x128xbf16>
      %25 = vector.shape_cast %22 : vector<256x128xbf16> to vector<1x256x128xbf16>
      tpu.vector_store %arg7[%c0_18, %c0_19, %c0_20], %25 {strides = array<i32>} : memref<1x256x128xbf16, #tpu.memory_space<vmem>>, vector<1x256x128xbf16>,
    } else {
    }
    return
  }
  func.func @transform_0(%arg0: i32, %arg1: i32, %arg2: i32) -> (i32, i32, i32) {
    %c0_i32 = arith.constant 0 : i32
    return %arg0, %arg1, %arg2 : i32, i32, i32
  }
  func.func @transform_1(%arg0: i32, %arg1: i32, %arg2: i32) -> (i32, i32) {
    %c0_i32 = arith.constant 0 : i32
    %c0_i32_0 = arith.constant 0 : i32
    return %arg2, %c0_i32 : i32, i32
  }
  func.func @transform_2(%arg0: i32, %arg1: i32, %arg2: i32) -> (i32, i32) {
    %c0_i32 = arith.constant 0 : i32
    %c0_i32_0 = arith.constant 0 : i32
    %c0_i32_1 = arith.constant 0 : i32
    return %c0_i32, %c0_i32_0 : i32, i32
  }
  func.func @transform_3(%arg0: i32, %arg1: i32, %arg2: i32) -> (i32, i32) {
    %c0_i32 = arith.constant 0 : i32
    %c0_i32_0 = arith.constant 0 : i32
    %c0_i32_1 = arith.constant 0 : i32
    return %c0_i32, %c0_i32_0 : i32, i32
  }
  func.func @transform_4(%arg0: i32, %arg1: i32, %arg2: i32) -> (i32, i32, i32) {
    %c0_i32 = arith.constant 0 : i32
    %c0_i32_0 = arith.constant 0 : i32
    return %arg0, %arg1, %c0_i32 : i32, i32, i32
  }
}

module attributes {stable_mosaic.version = 11 : i64} {
  func.func @_max4_kernel(%arg0: i32, %arg1: i32, %arg2: memref<1x8x64xbf16, #tpu.memory_space<vmem>>, %arg3: memref<1x8x64xbf16, #tpu.memory_space<vmem>>, %arg4: memref<1x8x64xbf16, #tpu.memory_space<vmem>>, %arg5: memref<1x8x64xbf16, #tpu.memory_space<vmem>>, %arg6: memref<1x8x64xbf16, #tpu.memory_space<vmem>>) attributes {dimension_semantics = [#tpu.dimension_semantics<parallel>, #tpu.dimension_semantics<parallel>], iteration_bounds = array<i64: 2, 1>, scalar_prefetch = 0 : i64, scratch_operands = 0 : i64, tpu.core_type = #tpu.core_type<tc>, window_params = [{transform_indices = @transform_0, window_bounds = array<i64: 1, 8, 64>}, {transform_indices = @transform_1, window_bounds = array<i64: 1, 8, 64>}, {transform_indices = @transform_2, window_bounds = array<i64: 1, 8, 64>}, {transform_indices = @transform_3, window_bounds = array<i64: 1, 8, 64>}, {transform_indices = @transform_4, window_bounds = array<i64: 1, 8, 64>}]} {
    %c0 = arith.constant 0 : index
    %c0_0 = arith.constant 0 : index
    %c0_1 = arith.constant 0 : index
    %0 = vector.load %arg2[%c0, %c0_0, %c0_1] : memref<1x8x64xbf16, #tpu.memory_space<vmem>>, vector<1x8x64xbf16>
    %1 = arith.extf %0 : vector<1x8x64xbf16> to vector<1x8x64xf32>
    %c0_2 = arith.constant 0 : index
    %c0_3 = arith.constant 0 : index
    %c0_4 = arith.constant 0 : index
    %2 = vector.load %arg3[%c0_2, %c0_3, %c0_4] : memref<1x8x64xbf16, #tpu.memory_space<vmem>>, vector<1x8x64xbf16>
    %3 = arith.extf %2 : vector<1x8x64xbf16> to vector<1x8x64xf32>
    %c0_5 = arith.constant 0 : index
    %c0_6 = arith.constant 0 : index
    %c0_7 = arith.constant 0 : index
    %4 = vector.load %arg4[%c0_5, %c0_6, %c0_7] : memref<1x8x64xbf16, #tpu.memory_space<vmem>>, vector<1x8x64xbf16>
    %5 = arith.extf %4 : vector<1x8x64xbf16> to vector<1x8x64xf32>
    %c0_8 = arith.constant 0 : index
    %c0_9 = arith.constant 0 : index
    %c0_10 = arith.constant 0 : index
    %6 = vector.load %arg5[%c0_8, %c0_9, %c0_10] : memref<1x8x64xbf16, #tpu.memory_space<vmem>>, vector<1x8x64xbf16>
    %7 = arith.extf %6 : vector<1x8x64xbf16> to vector<1x8x64xf32>
    %8 = arith.maximumf %1, %3 : vector<1x8x64xf32>
    %9 = arith.maximumf %5, %7 : vector<1x8x64xf32>
    %10 = arith.maximumf %8, %9 : vector<1x8x64xf32>
    %11 = arith.truncf %10 : vector<1x8x64xf32> to vector<1x8x64xbf16>
    %c0_11 = arith.constant 0 : index
    %c0_12 = arith.constant 0 : index
    %c0_13 = arith.constant 0 : index
    %12 = vector.load %arg6[%c0_11, %c0_12, %c0_13] : memref<1x8x64xbf16, #tpu.memory_space<vmem>>, vector<1x8x64xbf16>
    tpu.vector_store %arg6[%c0_11, %c0_12, %c0_13], %11 {strides = array<i32>} : memref<1x8x64xbf16, #tpu.memory_space<vmem>>, vector<1x8x64xbf16>,
    return
  }
  func.func @transform_0(%arg0: i32, %arg1: i32) -> (i32, i32, i32) {
    %c0_i32 = arith.constant 0 : i32
    %c0_i32_0 = arith.constant 0 : i32
    return %arg0, %arg1, %c0_i32 : i32, i32, i32
  }
  func.func @transform_1(%arg0: i32, %arg1: i32) -> (i32, i32, i32) {
    %c0_i32 = arith.constant 0 : i32
    %c0_i32_0 = arith.constant 0 : i32
    return %arg0, %arg1, %c0_i32 : i32, i32, i32
  }
  func.func @transform_2(%arg0: i32, %arg1: i32) -> (i32, i32, i32) {
    %c0_i32 = arith.constant 0 : i32
    %c0_i32_0 = arith.constant 0 : i32
    return %arg0, %arg1, %c0_i32 : i32, i32, i32
  }
  func.func @transform_3(%arg0: i32, %arg1: i32) -> (i32, i32, i32) {
    %c0_i32 = arith.constant 0 : i32
    %c0_i32_0 = arith.constant 0 : i32
    return %arg0, %arg1, %c0_i32 : i32, i32, i32
  }
  func.func @transform_4(%arg0: i32, %arg1: i32) -> (i32, i32, i32) {
    %c0_i32 = arith.constant 0 : i32
    %c0_i32_0 = arith.constant 0 : i32
    return %arg0, %arg1, %c0_i32 : i32, i32, i32
  }
}

module attributes {stable_mosaic.version = 11 : i64} {
  func.func @kernel(%arg0: i32, %arg1: i32, %arg2: i32, %arg3: memref<1x64x128xbf16, #tpu.memory_space<vmem>>, %arg4: memref<128x128xbf16, #tpu.memory_space<vmem>>, %arg5: memref<1x128xf32, #tpu.memory_space<vmem>>, %arg6: memref<1x128xf32, #tpu.memory_space<vmem>>, %arg7: memref<1x64x128xbf16, #tpu.memory_space<vmem>>, %arg8: memref<64x128xf32, #tpu.memory_space<vmem>>) attributes {dimension_semantics = [#tpu.dimension_semantics<parallel>, #tpu.dimension_semantics<parallel>, #tpu.dimension_semantics<arbitrary>], iteration_bounds = array<i64: 2, 1, 1>, scalar_prefetch = 0 : i64, scratch_operands = 1 : i64, tpu.core_type = #tpu.core_type<tc>, window_params = [{transform_indices = @transform_0, window_bounds = array<i64: 1, 64, 128>}, {transform_indices = @transform_1, window_bounds = array<i64: 128, 128>}, {pipeline_mode = #tpu.pipeline_mode<synchronous>, transform_indices = @transform_2, window_bounds = array<i64: 1, 128>}, {pipeline_mode = #tpu.pipeline_mode<synchronous>, transform_indices = @transform_3, window_bounds = array<i64: 1, 128>}, {transform_indices = @transform_4, window_bounds = array<i64: 1, 64, 128>}]} {
    %c0_i32 = arith.constant 0 : i32
    %0 = arith.cmpi eq, %arg2, %c0_i32 : i32
    %1 = arith.extui %0 : i1 to i32
    %c0_i32_0 = arith.constant 0 : i32
    %2 = arith.cmpi ne, %1, %c0_i32_0 : i32
    scf.if %2 {
      %cst_11 = arith.constant 0.000000e+00 : f32
      %13 = vector.broadcast %cst_11 : f32 to vector<64x128xf32>
      %c0_12 = arith.constant 0 : index
      %c0_13 = arith.constant 0 : index
      %14 = vector.load %arg8[%c0_12, %c0_13] : memref<64x128xf32, #tpu.memory_space<vmem>>, vector<64x128xf32>
      tpu.vector_store %arg8[%c0_12, %c0_13], %13 {strides = array<i32>} : memref<64x128xf32, #tpu.memory_space<vmem>>, vector<64x128xf32>,
    } else {
    }
    %c0 = arith.constant 0 : index
    %c0_1 = arith.constant 0 : index
    %3 = vector.load %arg8[%c0, %c0_1] : memref<64x128xf32, #tpu.memory_space<vmem>>, vector<64x128xf32>
    %c0_2 = arith.constant 0 : index
    %c0_3 = arith.constant 0 : index
    %c0_4 = arith.constant 0 : index
    %4 = vector.load %arg3[%c0_2, %c0_3, %c0_4] : memref<1x64x128xbf16, #tpu.memory_space<vmem>>, vector<1x64x128xbf16>
    %5 = vector.shape_cast %4 : vector<1x64x128xbf16> to vector<64x128xbf16>
    %c0_5 = arith.constant 0 : index
    %c0_6 = arith.constant 0 : index
    %6 = vector.load %arg4[%c0_5, %c0_6] : memref<128x128xbf16, #tpu.memory_space<vmem>>, vector<128x128xbf16>
    %cst = arith.constant dense<0.000000e+00> : vector<64x128xf32>
    %7 = tpu.matmul %5, %6, %cst {dimension_numbers = #tpu.dot_dimension_numbers<[1], [0], [0], [1], [0, 0, 1, 1], [], []>} : vector<64x128xbf16>, vector<128x128xbf16>, vector<64x128xf32> -> vector<64x128xf32>
    %8 = arith.addf %3, %7 : vector<64x128xf32>
    %c0_7 = arith.constant 0 : index
    %c0_8 = arith.constant 0 : index
    %9 = vector.load %arg8[%c0_7, %c0_8] : memref<64x128xf32, #tpu.memory_space<vmem>>, vector<64x128xf32>
    tpu.vector_store %arg8[%c0_7, %c0_8], %8 {strides = array<i32>} : memref<64x128xf32, #tpu.memory_space<vmem>>, vector<64x128xf32>,
    %c0_i32_9 = arith.constant 0 : i32
    %10 = arith.cmpi eq, %arg2, %c0_i32_9 : i32
    %11 = arith.extui %10 : i1 to i32
    %c0_i32_10 = arith.constant 0 : i32
    %12 = arith.cmpi ne, %11, %c0_i32_10 : i32
    scf.if %12 {
      %c0_11 = arith.constant 0 : index
      %c0_12 = arith.constant 0 : index
      %13 = vector.load %arg8[%c0_11, %c0_12] : memref<64x128xf32, #tpu.memory_space<vmem>>, vector<64x128xf32>
      %c0_13 = arith.constant 0 : index
      %c0_14 = arith.constant 0 : index
      %14 = vector.load %arg5[%c0_13, %c0_14] : memref<1x128xf32, #tpu.memory_space<vmem>>, vector<1x128xf32>
      %15 = vector.broadcast %14 : vector<1x128xf32> to vector<64x128xf32>
      %16 = arith.mulf %13, %15 : vector<64x128xf32>
      %c0_15 = arith.constant 0 : index
      %c0_16 = arith.constant 0 : index
      %17 = vector.load %arg6[%c0_15, %c0_16] : memref<1x128xf32, #tpu.memory_space<vmem>>, vector<1x128xf32>
      %18 = vector.broadcast %17 : vector<1x128xf32> to vector<64x128xf32>
      %19 = arith.addf %16, %18 : vector<64x128xf32>
      %cst_17 = arith.constant 0.000000e+00 : f32
      %20 = vector.broadcast %cst_17 : f32 to vector<64x128xf32>
      %21 = arith.maximumf %19, %20 : vector<64x128xf32>
      %22 = arith.truncf %21 : vector<64x128xf32> to vector<64x128xbf16>
      %c0_18 = arith.constant 0 : index
      %c0_19 = arith.constant 0 : index
      %c0_20 = arith.constant 0 : index
      %23 = vector.load %arg7[%c0_18, %c0_19, %c0_20] : memref<1x64x128xbf16, #tpu.memory_space<vmem>>, vector<1x64x128xbf16>
      %24 = vector.shape_cast %23 : vector<1x64x128xbf16> to vector<64x128xbf16>
      %25 = vector.shape_cast %22 : vector<64x128xbf16> to vector<1x64x128xbf16>
      tpu.vector_store %arg7[%c0_18, %c0_19, %c0_20], %25 {strides = array<i32>} : memref<1x64x128xbf16, #tpu.memory_space<vmem>>, vector<1x64x128xbf16>,
    } else {
    }
    return
  }
  func.func @transform_0(%arg0: i32, %arg1: i32, %arg2: i32) -> (i32, i32, i32) {
    %c0_i32 = arith.constant 0 : i32
    return %arg0, %arg1, %arg2 : i32, i32, i32
  }
  func.func @transform_1(%arg0: i32, %arg1: i32, %arg2: i32) -> (i32, i32) {
    %c0_i32 = arith.constant 0 : i32
    %c0_i32_0 = arith.constant 0 : i32
    return %arg2, %c0_i32 : i32, i32
  }
  func.func @transform_2(%arg0: i32, %arg1: i32, %arg2: i32) -> (i32, i32) {
    %c0_i32 = arith.constant 0 : i32
    %c0_i32_0 = arith.constant 0 : i32
    %c0_i32_1 = arith.constant 0 : i32
    return %c0_i32, %c0_i32_0 : i32, i32
  }
  func.func @transform_3(%arg0: i32, %arg1: i32, %arg2: i32) -> (i32, i32) {
    %c0_i32 = arith.constant 0 : i32
    %c0_i32_0 = arith.constant 0 : i32
    %c0_i32_1 = arith.constant 0 : i32
    return %c0_i32, %c0_i32_0 : i32, i32
  }
  func.func @transform_4(%arg0: i32, %arg1: i32, %arg2: i32) -> (i32, i32, i32) {
    %c0_i32 = arith.constant 0 : i32
    %c0_i32_0 = arith.constant 0 : i32
    return %arg0, %arg1, %c0_i32 : i32, i32, i32
  }
}

module attributes {stable_mosaic.version = 11 : i64} {
  func.func @kernel(%arg0: i32, %arg1: i32, %arg2: i32, %arg3: memref<1x64x256xbf16, #tpu.memory_space<vmem>>, %arg4: memref<256x128xbf16, #tpu.memory_space<vmem>>, %arg5: memref<1x128xf32, #tpu.memory_space<vmem>>, %arg6: memref<1x128xf32, #tpu.memory_space<vmem>>, %arg7: memref<1x64x128xbf16, #tpu.memory_space<vmem>>, %arg8: memref<64x128xf32, #tpu.memory_space<vmem>>) attributes {dimension_semantics = [#tpu.dimension_semantics<parallel>, #tpu.dimension_semantics<parallel>, #tpu.dimension_semantics<arbitrary>], iteration_bounds = array<i64: 2, 1, 1>, scalar_prefetch = 0 : i64, scratch_operands = 1 : i64, tpu.core_type = #tpu.core_type<tc>, window_params = [{transform_indices = @transform_0, window_bounds = array<i64: 1, 64, 256>}, {transform_indices = @transform_1, window_bounds = array<i64: 256, 128>}, {pipeline_mode = #tpu.pipeline_mode<synchronous>, transform_indices = @transform_2, window_bounds = array<i64: 1, 128>}, {pipeline_mode = #tpu.pipeline_mode<synchronous>, transform_indices = @transform_3, window_bounds = array<i64: 1, 128>}, {transform_indices = @transform_4, window_bounds = array<i64: 1, 64, 128>}]} {
    %c0_i32 = arith.constant 0 : i32
    %0 = arith.cmpi eq, %arg2, %c0_i32 : i32
    %1 = arith.extui %0 : i1 to i32
    %c0_i32_0 = arith.constant 0 : i32
    %2 = arith.cmpi ne, %1, %c0_i32_0 : i32
    scf.if %2 {
      %cst_11 = arith.constant 0.000000e+00 : f32
      %13 = vector.broadcast %cst_11 : f32 to vector<64x128xf32>
      %c0_12 = arith.constant 0 : index
      %c0_13 = arith.constant 0 : index
      %14 = vector.load %arg8[%c0_12, %c0_13] : memref<64x128xf32, #tpu.memory_space<vmem>>, vector<64x128xf32>
      tpu.vector_store %arg8[%c0_12, %c0_13], %13 {strides = array<i32>} : memref<64x128xf32, #tpu.memory_space<vmem>>, vector<64x128xf32>,
    } else {
    }
    %c0 = arith.constant 0 : index
    %c0_1 = arith.constant 0 : index
    %3 = vector.load %arg8[%c0, %c0_1] : memref<64x128xf32, #tpu.memory_space<vmem>>, vector<64x128xf32>
    %c0_2 = arith.constant 0 : index
    %c0_3 = arith.constant 0 : index
    %c0_4 = arith.constant 0 : index
    %4 = vector.load %arg3[%c0_2, %c0_3, %c0_4] : memref<1x64x256xbf16, #tpu.memory_space<vmem>>, vector<1x64x256xbf16>
    %5 = vector.shape_cast %4 : vector<1x64x256xbf16> to vector<64x256xbf16>
    %c0_5 = arith.constant 0 : index
    %c0_6 = arith.constant 0 : index
    %6 = vector.load %arg4[%c0_5, %c0_6] : memref<256x128xbf16, #tpu.memory_space<vmem>>, vector<256x128xbf16>
    %cst = arith.constant dense<0.000000e+00> : vector<64x128xf32>
    %7 = tpu.matmul %5, %6, %cst {dimension_numbers = #tpu.dot_dimension_numbers<[1], [0], [0], [1], [0, 0, 1, 1], [], []>} : vector<64x256xbf16>, vector<256x128xbf16>, vector<64x128xf32> -> vector<64x128xf32>
    %8 = arith.addf %3, %7 : vector<64x128xf32>
    %c0_7 = arith.constant 0 : index
    %c0_8 = arith.constant 0 : index
    %9 = vector.load %arg8[%c0_7, %c0_8] : memref<64x128xf32, #tpu.memory_space<vmem>>, vector<64x128xf32>
    tpu.vector_store %arg8[%c0_7, %c0_8], %8 {strides = array<i32>} : memref<64x128xf32, #tpu.memory_space<vmem>>, vector<64x128xf32>,
    %c0_i32_9 = arith.constant 0 : i32
    %10 = arith.cmpi eq, %arg2, %c0_i32_9 : i32
    %11 = arith.extui %10 : i1 to i32
    %c0_i32_10 = arith.constant 0 : i32
    %12 = arith.cmpi ne, %11, %c0_i32_10 : i32
    scf.if %12 {
      %c0_11 = arith.constant 0 : index
      %c0_12 = arith.constant 0 : index
      %13 = vector.load %arg8[%c0_11, %c0_12] : memref<64x128xf32, #tpu.memory_space<vmem>>, vector<64x128xf32>
      %c0_13 = arith.constant 0 : index
      %c0_14 = arith.constant 0 : index
      %14 = vector.load %arg5[%c0_13, %c0_14] : memref<1x128xf32, #tpu.memory_space<vmem>>, vector<1x128xf32>
      %15 = vector.broadcast %14 : vector<1x128xf32> to vector<64x128xf32>
      %16 = arith.mulf %13, %15 : vector<64x128xf32>
      %c0_15 = arith.constant 0 : index
      %c0_16 = arith.constant 0 : index
      %17 = vector.load %arg6[%c0_15, %c0_16] : memref<1x128xf32, #tpu.memory_space<vmem>>, vector<1x128xf32>
      %18 = vector.broadcast %17 : vector<1x128xf32> to vector<64x128xf32>
      %19 = arith.addf %16, %18 : vector<64x128xf32>
      %cst_17 = arith.constant 0.000000e+00 : f32
      %20 = vector.broadcast %cst_17 : f32 to vector<64x128xf32>
      %21 = arith.maximumf %19, %20 : vector<64x128xf32>
      %22 = arith.truncf %21 : vector<64x128xf32> to vector<64x128xbf16>
      %c0_18 = arith.constant 0 : index
      %c0_19 = arith.constant 0 : index
      %c0_20 = arith.constant 0 : index
      %23 = vector.load %arg7[%c0_18, %c0_19, %c0_20] : memref<1x64x128xbf16, #tpu.memory_space<vmem>>, vector<1x64x128xbf16>
      %24 = vector.shape_cast %23 : vector<1x64x128xbf16> to vector<64x128xbf16>
      %25 = vector.shape_cast %22 : vector<64x128xbf16> to vector<1x64x128xbf16>
      tpu.vector_store %arg7[%c0_18, %c0_19, %c0_20], %25 {strides = array<i32>} : memref<1x64x128xbf16, #tpu.memory_space<vmem>>, vector<1x64x128xbf16>,
    } else {
    }
    return
  }
  func.func @transform_0(%arg0: i32, %arg1: i32, %arg2: i32) -> (i32, i32, i32) {
    %c0_i32 = arith.constant 0 : i32
    return %arg0, %arg1, %arg2 : i32, i32, i32
  }
  func.func @transform_1(%arg0: i32, %arg1: i32, %arg2: i32) -> (i32, i32) {
    %c0_i32 = arith.constant 0 : i32
    %c0_i32_0 = arith.constant 0 : i32
    return %arg2, %c0_i32 : i32, i32
  }
  func.func @transform_2(%arg0: i32, %arg1: i32, %arg2: i32) -> (i32, i32) {
    %c0_i32 = arith.constant 0 : i32
    %c0_i32_0 = arith.constant 0 : i32
    %c0_i32_1 = arith.constant 0 : i32
    return %c0_i32, %c0_i32_0 : i32, i32
  }
  func.func @transform_3(%arg0: i32, %arg1: i32, %arg2: i32) -> (i32, i32) {
    %c0_i32 = arith.constant 0 : i32
    %c0_i32_0 = arith.constant 0 : i32
    %c0_i32_1 = arith.constant 0 : i32
    return %c0_i32, %c0_i32_0 : i32, i32
  }
  func.func @transform_4(%arg0: i32, %arg1: i32, %arg2: i32) -> (i32, i32, i32) {
    %c0_i32 = arith.constant 0 : i32
    %c0_i32_0 = arith.constant 0 : i32
    return %arg0, %arg1, %c0_i32 : i32, i32, i32
  }
}

module attributes {stable_mosaic.version = 11 : i64} {
  func.func @_max4_kernel(%arg0: i32, %arg1: i32, %arg2: memref<1x4x64xbf16, #tpu.memory_space<vmem>>, %arg3: memref<1x4x64xbf16, #tpu.memory_space<vmem>>, %arg4: memref<1x4x64xbf16, #tpu.memory_space<vmem>>, %arg5: memref<1x4x64xbf16, #tpu.memory_space<vmem>>, %arg6: memref<1x4x64xbf16, #tpu.memory_space<vmem>>) attributes {dimension_semantics = [#tpu.dimension_semantics<parallel>, #tpu.dimension_semantics<parallel>], iteration_bounds = array<i64: 2, 1>, scalar_prefetch = 0 : i64, scratch_operands = 0 : i64, tpu.core_type = #tpu.core_type<tc>, window_params = [{transform_indices = @transform_0, window_bounds = array<i64: 1, 4, 64>}, {transform_indices = @transform_1, window_bounds = array<i64: 1, 4, 64>}, {transform_indices = @transform_2, window_bounds = array<i64: 1, 4, 64>}, {transform_indices = @transform_3, window_bounds = array<i64: 1, 4, 64>}, {transform_indices = @transform_4, window_bounds = array<i64: 1, 4, 64>}]} {
    %c0 = arith.constant 0 : index
    %c0_0 = arith.constant 0 : index
    %c0_1 = arith.constant 0 : index
    %0 = vector.load %arg2[%c0, %c0_0, %c0_1] : memref<1x4x64xbf16, #tpu.memory_space<vmem>>, vector<1x4x64xbf16>
    %1 = arith.extf %0 : vector<1x4x64xbf16> to vector<1x4x64xf32>
    %c0_2 = arith.constant 0 : index
    %c0_3 = arith.constant 0 : index
    %c0_4 = arith.constant 0 : index
    %2 = vector.load %arg3[%c0_2, %c0_3, %c0_4] : memref<1x4x64xbf16, #tpu.memory_space<vmem>>, vector<1x4x64xbf16>
    %3 = arith.extf %2 : vector<1x4x64xbf16> to vector<1x4x64xf32>
    %c0_5 = arith.constant 0 : index
    %c0_6 = arith.constant 0 : index
    %c0_7 = arith.constant 0 : index
    %4 = vector.load %arg4[%c0_5, %c0_6, %c0_7] : memref<1x4x64xbf16, #tpu.memory_space<vmem>>, vector<1x4x64xbf16>
    %5 = arith.extf %4 : vector<1x4x64xbf16> to vector<1x4x64xf32>
    %c0_8 = arith.constant 0 : index
    %c0_9 = arith.constant 0 : index
    %c0_10 = arith.constant 0 : index
    %6 = vector.load %arg5[%c0_8, %c0_9, %c0_10] : memref<1x4x64xbf16, #tpu.memory_space<vmem>>, vector<1x4x64xbf16>
    %7 = arith.extf %6 : vector<1x4x64xbf16> to vector<1x4x64xf32>
    %8 = arith.maximumf %1, %3 : vector<1x4x64xf32>
    %9 = arith.maximumf %5, %7 : vector<1x4x64xf32>
    %10 = arith.maximumf %8, %9 : vector<1x4x64xf32>
    %11 = arith.truncf %10 : vector<1x4x64xf32> to vector<1x4x64xbf16>
    %c0_11 = arith.constant 0 : index
    %c0_12 = arith.constant 0 : index
    %c0_13 = arith.constant 0 : index
    %12 = vector.load %arg6[%c0_11, %c0_12, %c0_13] : memref<1x4x64xbf16, #tpu.memory_space<vmem>>, vector<1x4x64xbf16>
    tpu.vector_store %arg6[%c0_11, %c0_12, %c0_13], %11 {strides = array<i32>} : memref<1x4x64xbf16, #tpu.memory_space<vmem>>, vector<1x4x64xbf16>,
    return
  }
  func.func @transform_0(%arg0: i32, %arg1: i32) -> (i32, i32, i32) {
    %c0_i32 = arith.constant 0 : i32
    %c0_i32_0 = arith.constant 0 : i32
    return %arg0, %arg1, %c0_i32 : i32, i32, i32
  }
  func.func @transform_1(%arg0: i32, %arg1: i32) -> (i32, i32, i32) {
    %c0_i32 = arith.constant 0 : i32
    %c0_i32_0 = arith.constant 0 : i32
    return %arg0, %arg1, %c0_i32 : i32, i32, i32
  }
  func.func @transform_2(%arg0: i32, %arg1: i32) -> (i32, i32, i32) {
    %c0_i32 = arith.constant 0 : i32
    %c0_i32_0 = arith.constant 0 : i32
    return %arg0, %arg1, %c0_i32 : i32, i32, i32
  }
  func.func @transform_3(%arg0: i32, %arg1: i32) -> (i32, i32, i32) {
    %c0_i32 = arith.constant 0 : i32
    %c0_i32_0 = arith.constant 0 : i32
    return %arg0, %arg1, %c0_i32 : i32, i32, i32
  }
  func.func @transform_4(%arg0: i32, %arg1: i32) -> (i32, i32, i32) {
    %c0_i32 = arith.constant 0 : i32
    %c0_i32_0 = arith.constant 0 : i32
    return %arg0, %arg1, %c0_i32 : i32, i32, i32
  }
}

module attributes {stable_mosaic.version = 11 : i64} {
  func.func @kernel(%arg0: i32, %arg1: i32, %arg2: i32, %arg3: memref<1x16x256xbf16, #tpu.memory_space<vmem>>, %arg4: memref<256x128xbf16, #tpu.memory_space<vmem>>, %arg5: memref<1x128xf32, #tpu.memory_space<vmem>>, %arg6: memref<1x128xf32, #tpu.memory_space<vmem>>, %arg7: memref<1x16x128xbf16, #tpu.memory_space<vmem>>, %arg8: memref<16x128xf32, #tpu.memory_space<vmem>>) attributes {dimension_semantics = [#tpu.dimension_semantics<parallel>, #tpu.dimension_semantics<parallel>, #tpu.dimension_semantics<arbitrary>], iteration_bounds = array<i64: 2, 1, 1>, scalar_prefetch = 0 : i64, scratch_operands = 1 : i64, tpu.core_type = #tpu.core_type<tc>, window_params = [{transform_indices = @transform_0, window_bounds = array<i64: 1, 16, 256>}, {transform_indices = @transform_1, window_bounds = array<i64: 256, 128>}, {pipeline_mode = #tpu.pipeline_mode<synchronous>, transform_indices = @transform_2, window_bounds = array<i64: 1, 128>}, {pipeline_mode = #tpu.pipeline_mode<synchronous>, transform_indices = @transform_3, window_bounds = array<i64: 1, 128>}, {transform_indices = @transform_4, window_bounds = array<i64: 1, 16, 128>}]} {
    %c0_i32 = arith.constant 0 : i32
    %0 = arith.cmpi eq, %arg2, %c0_i32 : i32
    %1 = arith.extui %0 : i1 to i32
    %c0_i32_0 = arith.constant 0 : i32
    %2 = arith.cmpi ne, %1, %c0_i32_0 : i32
    scf.if %2 {
      %cst_11 = arith.constant 0.000000e+00 : f32
      %13 = vector.broadcast %cst_11 : f32 to vector<16x128xf32>
      %c0_12 = arith.constant 0 : index
      %c0_13 = arith.constant 0 : index
      %14 = vector.load %arg8[%c0_12, %c0_13] : memref<16x128xf32, #tpu.memory_space<vmem>>, vector<16x128xf32>
      tpu.vector_store %arg8[%c0_12, %c0_13], %13 {strides = array<i32>} : memref<16x128xf32, #tpu.memory_space<vmem>>, vector<16x128xf32>,
    } else {
    }
    %c0 = arith.constant 0 : index
    %c0_1 = arith.constant 0 : index
    %3 = vector.load %arg8[%c0, %c0_1] : memref<16x128xf32, #tpu.memory_space<vmem>>, vector<16x128xf32>
    %c0_2 = arith.constant 0 : index
    %c0_3 = arith.constant 0 : index
    %c0_4 = arith.constant 0 : index
    %4 = vector.load %arg3[%c0_2, %c0_3, %c0_4] : memref<1x16x256xbf16, #tpu.memory_space<vmem>>, vector<1x16x256xbf16>
    %5 = vector.shape_cast %4 : vector<1x16x256xbf16> to vector<16x256xbf16>
    %c0_5 = arith.constant 0 : index
    %c0_6 = arith.constant 0 : index
    %6 = vector.load %arg4[%c0_5, %c0_6] : memref<256x128xbf16, #tpu.memory_space<vmem>>, vector<256x128xbf16>
    %cst = arith.constant dense<0.000000e+00> : vector<16x128xf32>
    %7 = tpu.matmul %5, %6, %cst {dimension_numbers = #tpu.dot_dimension_numbers<[1], [0], [0], [1], [0, 0, 1, 1], [], []>} : vector<16x256xbf16>, vector<256x128xbf16>, vector<16x128xf32> -> vector<16x128xf32>
    %8 = arith.addf %3, %7 : vector<16x128xf32>
    %c0_7 = arith.constant 0 : index
    %c0_8 = arith.constant 0 : index
    %9 = vector.load %arg8[%c0_7, %c0_8] : memref<16x128xf32, #tpu.memory_space<vmem>>, vector<16x128xf32>
    tpu.vector_store %arg8[%c0_7, %c0_8], %8 {strides = array<i32>} : memref<16x128xf32, #tpu.memory_space<vmem>>, vector<16x128xf32>,
    %c0_i32_9 = arith.constant 0 : i32
    %10 = arith.cmpi eq, %arg2, %c0_i32_9 : i32
    %11 = arith.extui %10 : i1 to i32
    %c0_i32_10 = arith.constant 0 : i32
    %12 = arith.cmpi ne, %11, %c0_i32_10 : i32
    scf.if %12 {
      %c0_11 = arith.constant 0 : index
      %c0_12 = arith.constant 0 : index
      %13 = vector.load %arg8[%c0_11, %c0_12] : memref<16x128xf32, #tpu.memory_space<vmem>>, vector<16x128xf32>
      %c0_13 = arith.constant 0 : index
      %c0_14 = arith.constant 0 : index
      %14 = vector.load %arg5[%c0_13, %c0_14] : memref<1x128xf32, #tpu.memory_space<vmem>>, vector<1x128xf32>
      %15 = vector.broadcast %14 : vector<1x128xf32> to vector<16x128xf32>
      %16 = arith.mulf %13, %15 : vector<16x128xf32>
      %c0_15 = arith.constant 0 : index
      %c0_16 = arith.constant 0 : index
      %17 = vector.load %arg6[%c0_15, %c0_16] : memref<1x128xf32, #tpu.memory_space<vmem>>, vector<1x128xf32>
      %18 = vector.broadcast %17 : vector<1x128xf32> to vector<16x128xf32>
      %19 = arith.addf %16, %18 : vector<16x128xf32>
      %cst_17 = arith.constant 0.000000e+00 : f32
      %20 = vector.broadcast %cst_17 : f32 to vector<16x128xf32>
      %21 = arith.maximumf %19, %20 : vector<16x128xf32>
      %22 = arith.truncf %21 : vector<16x128xf32> to vector<16x128xbf16>
      %c0_18 = arith.constant 0 : index
      %c0_19 = arith.constant 0 : index
      %c0_20 = arith.constant 0 : index
      %23 = vector.load %arg7[%c0_18, %c0_19, %c0_20] : memref<1x16x128xbf16, #tpu.memory_space<vmem>>, vector<1x16x128xbf16>
      %24 = vector.shape_cast %23 : vector<1x16x128xbf16> to vector<16x128xbf16>
      %25 = vector.shape_cast %22 : vector<16x128xbf16> to vector<1x16x128xbf16>
      tpu.vector_store %arg7[%c0_18, %c0_19, %c0_20], %25 {strides = array<i32>} : memref<1x16x128xbf16, #tpu.memory_space<vmem>>, vector<1x16x128xbf16>,
    } else {
    }
    return
  }
  func.func @transform_0(%arg0: i32, %arg1: i32, %arg2: i32) -> (i32, i32, i32) {
    %c0_i32 = arith.constant 0 : i32
    return %arg0, %arg1, %arg2 : i32, i32, i32
  }
  func.func @transform_1(%arg0: i32, %arg1: i32, %arg2: i32) -> (i32, i32) {
    %c0_i32 = arith.constant 0 : i32
    %c0_i32_0 = arith.constant 0 : i32
    return %arg2, %c0_i32 : i32, i32
  }
  func.func @transform_2(%arg0: i32, %arg1: i32, %arg2: i32) -> (i32, i32) {
    %c0_i32 = arith.constant 0 : i32
    %c0_i32_0 = arith.constant 0 : i32
    %c0_i32_1 = arith.constant 0 : i32
    return %c0_i32, %c0_i32_0 : i32, i32
  }
  func.func @transform_3(%arg0: i32, %arg1: i32, %arg2: i32) -> (i32, i32) {
    %c0_i32 = arith.constant 0 : i32
    %c0_i32_0 = arith.constant 0 : i32
    %c0_i32_1 = arith.constant 0 : i32
    return %c0_i32, %c0_i32_0 : i32, i32
  }
  func.func @transform_4(%arg0: i32, %arg1: i32, %arg2: i32) -> (i32, i32, i32) {
    %c0_i32 = arith.constant 0 : i32
    %c0_i32_0 = arith.constant 0 : i32
    return %arg0, %arg1, %c0_i32 : i32, i32, i32
  }
}

module attributes {stable_mosaic.version = 11 : i64} {
  func.func @kernel(%arg0: i32, %arg1: i32, %arg2: i32, %arg3: memref<1x16x384xbf16, #tpu.memory_space<vmem>>, %arg4: memref<384x128xbf16, #tpu.memory_space<vmem>>, %arg5: memref<1x128xf32, #tpu.memory_space<vmem>>, %arg6: memref<1x128xf32, #tpu.memory_space<vmem>>, %arg7: memref<1x16x128xbf16, #tpu.memory_space<vmem>>, %arg8: memref<16x128xf32, #tpu.memory_space<vmem>>) attributes {dimension_semantics = [#tpu.dimension_semantics<parallel>, #tpu.dimension_semantics<parallel>, #tpu.dimension_semantics<arbitrary>], iteration_bounds = array<i64: 2, 1, 1>, scalar_prefetch = 0 : i64, scratch_operands = 1 : i64, tpu.core_type = #tpu.core_type<tc>, window_params = [{transform_indices = @transform_0, window_bounds = array<i64: 1, 16, 384>}, {transform_indices = @transform_1, window_bounds = array<i64: 384, 128>}, {pipeline_mode = #tpu.pipeline_mode<synchronous>, transform_indices = @transform_2, window_bounds = array<i64: 1, 128>}, {pipeline_mode = #tpu.pipeline_mode<synchronous>, transform_indices = @transform_3, window_bounds = array<i64: 1, 128>}, {transform_indices = @transform_4, window_bounds = array<i64: 1, 16, 128>}]} {
    %c0_i32 = arith.constant 0 : i32
    %0 = arith.cmpi eq, %arg2, %c0_i32 : i32
    %1 = arith.extui %0 : i1 to i32
    %c0_i32_0 = arith.constant 0 : i32
    %2 = arith.cmpi ne, %1, %c0_i32_0 : i32
    scf.if %2 {
      %cst_11 = arith.constant 0.000000e+00 : f32
      %13 = vector.broadcast %cst_11 : f32 to vector<16x128xf32>
      %c0_12 = arith.constant 0 : index
      %c0_13 = arith.constant 0 : index
      %14 = vector.load %arg8[%c0_12, %c0_13] : memref<16x128xf32, #tpu.memory_space<vmem>>, vector<16x128xf32>
      tpu.vector_store %arg8[%c0_12, %c0_13], %13 {strides = array<i32>} : memref<16x128xf32, #tpu.memory_space<vmem>>, vector<16x128xf32>,
    } else {
    }
    %c0 = arith.constant 0 : index
    %c0_1 = arith.constant 0 : index
    %3 = vector.load %arg8[%c0, %c0_1] : memref<16x128xf32, #tpu.memory_space<vmem>>, vector<16x128xf32>
    %c0_2 = arith.constant 0 : index
    %c0_3 = arith.constant 0 : index
    %c0_4 = arith.constant 0 : index
    %4 = vector.load %arg3[%c0_2, %c0_3, %c0_4] : memref<1x16x384xbf16, #tpu.memory_space<vmem>>, vector<1x16x384xbf16>
    %5 = vector.shape_cast %4 : vector<1x16x384xbf16> to vector<16x384xbf16>
    %c0_5 = arith.constant 0 : index
    %c0_6 = arith.constant 0 : index
    %6 = vector.load %arg4[%c0_5, %c0_6] : memref<384x128xbf16, #tpu.memory_space<vmem>>, vector<384x128xbf16>
    %cst = arith.constant dense<0.000000e+00> : vector<16x128xf32>
    %7 = tpu.matmul %5, %6, %cst {dimension_numbers = #tpu.dot_dimension_numbers<[1], [0], [0], [1], [0, 0, 1, 1], [], []>} : vector<16x384xbf16>, vector<384x128xbf16>, vector<16x128xf32> -> vector<16x128xf32>
    %8 = arith.addf %3, %7 : vector<16x128xf32>
    %c0_7 = arith.constant 0 : index
    %c0_8 = arith.constant 0 : index
    %9 = vector.load %arg8[%c0_7, %c0_8] : memref<16x128xf32, #tpu.memory_space<vmem>>, vector<16x128xf32>
    tpu.vector_store %arg8[%c0_7, %c0_8], %8 {strides = array<i32>} : memref<16x128xf32, #tpu.memory_space<vmem>>, vector<16x128xf32>,
    %c0_i32_9 = arith.constant 0 : i32
    %10 = arith.cmpi eq, %arg2, %c0_i32_9 : i32
    %11 = arith.extui %10 : i1 to i32
    %c0_i32_10 = arith.constant 0 : i32
    %12 = arith.cmpi ne, %11, %c0_i32_10 : i32
    scf.if %12 {
      %c0_11 = arith.constant 0 : index
      %c0_12 = arith.constant 0 : index
      %13 = vector.load %arg8[%c0_11, %c0_12] : memref<16x128xf32, #tpu.memory_space<vmem>>, vector<16x128xf32>
      %c0_13 = arith.constant 0 : index
      %c0_14 = arith.constant 0 : index
      %14 = vector.load %arg5[%c0_13, %c0_14] : memref<1x128xf32, #tpu.memory_space<vmem>>, vector<1x128xf32>
      %15 = vector.broadcast %14 : vector<1x128xf32> to vector<16x128xf32>
      %16 = arith.mulf %13, %15 : vector<16x128xf32>
      %c0_15 = arith.constant 0 : index
      %c0_16 = arith.constant 0 : index
      %17 = vector.load %arg6[%c0_15, %c0_16] : memref<1x128xf32, #tpu.memory_space<vmem>>, vector<1x128xf32>
      %18 = vector.broadcast %17 : vector<1x128xf32> to vector<16x128xf32>
      %19 = arith.addf %16, %18 : vector<16x128xf32>
      %cst_17 = arith.constant 0.000000e+00 : f32
      %20 = vector.broadcast %cst_17 : f32 to vector<16x128xf32>
      %21 = arith.maximumf %19, %20 : vector<16x128xf32>
      %22 = arith.truncf %21 : vector<16x128xf32> to vector<16x128xbf16>
      %c0_18 = arith.constant 0 : index
      %c0_19 = arith.constant 0 : index
      %c0_20 = arith.constant 0 : index
      %23 = vector.load %arg7[%c0_18, %c0_19, %c0_20] : memref<1x16x128xbf16, #tpu.memory_space<vmem>>, vector<1x16x128xbf16>
      %24 = vector.shape_cast %23 : vector<1x16x128xbf16> to vector<16x128xbf16>
      %25 = vector.shape_cast %22 : vector<16x128xbf16> to vector<1x16x128xbf16>
      tpu.vector_store %arg7[%c0_18, %c0_19, %c0_20], %25 {strides = array<i32>} : memref<1x16x128xbf16, #tpu.memory_space<vmem>>, vector<1x16x128xbf16>,
    } else {
    }
    return
  }
  func.func @transform_0(%arg0: i32, %arg1: i32, %arg2: i32) -> (i32, i32, i32) {
    %c0_i32 = arith.constant 0 : i32
    return %arg0, %arg1, %arg2 : i32, i32, i32
  }
  func.func @transform_1(%arg0: i32, %arg1: i32, %arg2: i32) -> (i32, i32) {
    %c0_i32 = arith.constant 0 : i32
    %c0_i32_0 = arith.constant 0 : i32
    return %arg2, %c0_i32 : i32, i32
  }
  func.func @transform_2(%arg0: i32, %arg1: i32, %arg2: i32) -> (i32, i32) {
    %c0_i32 = arith.constant 0 : i32
    %c0_i32_0 = arith.constant 0 : i32
    %c0_i32_1 = arith.constant 0 : i32
    return %c0_i32, %c0_i32_0 : i32, i32
  }
  func.func @transform_3(%arg0: i32, %arg1: i32, %arg2: i32) -> (i32, i32) {
    %c0_i32 = arith.constant 0 : i32
    %c0_i32_0 = arith.constant 0 : i32
    %c0_i32_1 = arith.constant 0 : i32
    return %c0_i32, %c0_i32_0 : i32, i32
  }
  func.func @transform_4(%arg0: i32, %arg1: i32, %arg2: i32) -> (i32, i32, i32) {
    %c0_i32 = arith.constant 0 : i32
    %c0_i32_0 = arith.constant 0 : i32
    return %arg0, %arg1, %c0_i32 : i32, i32, i32
  }
}

module attributes {stable_mosaic.version = 11 : i64} {
  func.func @_max4_kernel(%arg0: i32, %arg1: i32, %arg2: memref<1x2x64xbf16, #tpu.memory_space<vmem>>, %arg3: memref<1x2x64xbf16, #tpu.memory_space<vmem>>, %arg4: memref<1x2x64xbf16, #tpu.memory_space<vmem>>, %arg5: memref<1x2x64xbf16, #tpu.memory_space<vmem>>, %arg6: memref<1x2x64xbf16, #tpu.memory_space<vmem>>) attributes {dimension_semantics = [#tpu.dimension_semantics<parallel>, #tpu.dimension_semantics<parallel>], iteration_bounds = array<i64: 2, 1>, scalar_prefetch = 0 : i64, scratch_operands = 0 : i64, tpu.core_type = #tpu.core_type<tc>, window_params = [{transform_indices = @transform_0, window_bounds = array<i64: 1, 2, 64>}, {transform_indices = @transform_1, window_bounds = array<i64: 1, 2, 64>}, {transform_indices = @transform_2, window_bounds = array<i64: 1, 2, 64>}, {transform_indices = @transform_3, window_bounds = array<i64: 1, 2, 64>}, {transform_indices = @transform_4, window_bounds = array<i64: 1, 2, 64>}]} {
    %c0 = arith.constant 0 : index
    %c0_0 = arith.constant 0 : index
    %c0_1 = arith.constant 0 : index
    %0 = vector.load %arg2[%c0, %c0_0, %c0_1] : memref<1x2x64xbf16, #tpu.memory_space<vmem>>, vector<1x2x64xbf16>
    %1 = arith.extf %0 : vector<1x2x64xbf16> to vector<1x2x64xf32>
    %c0_2 = arith.constant 0 : index
    %c0_3 = arith.constant 0 : index
    %c0_4 = arith.constant 0 : index
    %2 = vector.load %arg3[%c0_2, %c0_3, %c0_4] : memref<1x2x64xbf16, #tpu.memory_space<vmem>>, vector<1x2x64xbf16>
    %3 = arith.extf %2 : vector<1x2x64xbf16> to vector<1x2x64xf32>
    %c0_5 = arith.constant 0 : index
    %c0_6 = arith.constant 0 : index
    %c0_7 = arith.constant 0 : index
    %4 = vector.load %arg4[%c0_5, %c0_6, %c0_7] : memref<1x2x64xbf16, #tpu.memory_space<vmem>>, vector<1x2x64xbf16>
    %5 = arith.extf %4 : vector<1x2x64xbf16> to vector<1x2x64xf32>
    %c0_8 = arith.constant 0 : index
    %c0_9 = arith.constant 0 : index
    %c0_10 = arith.constant 0 : index
    %6 = vector.load %arg5[%c0_8, %c0_9, %c0_10] : memref<1x2x64xbf16, #tpu.memory_space<vmem>>, vector<1x2x64xbf16>
    %7 = arith.extf %6 : vector<1x2x64xbf16> to vector<1x2x64xf32>
    %8 = arith.maximumf %1, %3 : vector<1x2x64xf32>
    %9 = arith.maximumf %5, %7 : vector<1x2x64xf32>
    %10 = arith.maximumf %8, %9 : vector<1x2x64xf32>
    %11 = arith.truncf %10 : vector<1x2x64xf32> to vector<1x2x64xbf16>
    %c0_11 = arith.constant 0 : index
    %c0_12 = arith.constant 0 : index
    %c0_13 = arith.constant 0 : index
    %12 = vector.load %arg6[%c0_11, %c0_12, %c0_13] : memref<1x2x64xbf16, #tpu.memory_space<vmem>>, vector<1x2x64xbf16>
    tpu.vector_store %arg6[%c0_11, %c0_12, %c0_13], %11 {strides = array<i32>} : memref<1x2x64xbf16, #tpu.memory_space<vmem>>, vector<1x2x64xbf16>,
    return
  }
  func.func @transform_0(%arg0: i32, %arg1: i32) -> (i32, i32, i32) {
    %c0_i32 = arith.constant 0 : i32
    %c0_i32_0 = arith.constant 0 : i32
    return %arg0, %arg1, %c0_i32 : i32, i32, i32
  }
  func.func @transform_1(%arg0: i32, %arg1: i32) -> (i32, i32, i32) {
    %c0_i32 = arith.constant 0 : i32
    %c0_i32_0 = arith.constant 0 : i32
    return %arg0, %arg1, %c0_i32 : i32, i32, i32
  }
  func.func @transform_2(%arg0: i32, %arg1: i32) -> (i32, i32, i32) {
    %c0_i32 = arith.constant 0 : i32
    %c0_i32_0 = arith.constant 0 : i32
    return %arg0, %arg1, %c0_i32 : i32, i32, i32
  }
  func.func @transform_3(%arg0: i32, %arg1: i32) -> (i32, i32, i32) {
    %c0_i32 = arith.constant 0 : i32
    %c0_i32_0 = arith.constant 0 : i32
    return %arg0, %arg1, %c0_i32 : i32, i32, i32
  }
  func.func @transform_4(%arg0: i32, %arg1: i32) -> (i32, i32, i32) {
    %c0_i32 = arith.constant 0 : i32
    %c0_i32_0 = arith.constant 0 : i32
    return %arg0, %arg1, %c0_i32 : i32, i32, i32
  }
}

module attributes {stable_mosaic.version = 11 : i64} {
  func.func @kernel(%arg0: i32, %arg1: i32, %arg2: i32, %arg3: memref<1x16x640xbf16, #tpu.memory_space<vmem>>, %arg4: memref<640x128xbf16, #tpu.memory_space<vmem>>, %arg5: memref<1x128xf32, #tpu.memory_space<vmem>>, %arg6: memref<1x128xf32, #tpu.memory_space<vmem>>, %arg7: memref<1x16x128xbf16, #tpu.memory_space<vmem>>, %arg8: memref<16x128xf32, #tpu.memory_space<vmem>>) attributes {dimension_semantics = [#tpu.dimension_semantics<parallel>, #tpu.dimension_semantics<parallel>, #tpu.dimension_semantics<arbitrary>], iteration_bounds = array<i64: 2, 1, 1>, scalar_prefetch = 0 : i64, scratch_operands = 1 : i64, tpu.core_type = #tpu.core_type<tc>, window_params = [{transform_indices = @transform_0, window_bounds = array<i64: 1, 16, 640>}, {transform_indices = @transform_1, window_bounds = array<i64: 640, 128>}, {pipeline_mode = #tpu.pipeline_mode<synchronous>, transform_indices = @transform_2, window_bounds = array<i64: 1, 128>}, {pipeline_mode = #tpu.pipeline_mode<synchronous>, transform_indices = @transform_3, window_bounds = array<i64: 1, 128>}, {transform_indices = @transform_4, window_bounds = array<i64: 1, 16, 128>}]} {
    %c0_i32 = arith.constant 0 : i32
    %0 = arith.cmpi eq, %arg2, %c0_i32 : i32
    %1 = arith.extui %0 : i1 to i32
    %c0_i32_0 = arith.constant 0 : i32
    %2 = arith.cmpi ne, %1, %c0_i32_0 : i32
    scf.if %2 {
      %cst_11 = arith.constant 0.000000e+00 : f32
      %13 = vector.broadcast %cst_11 : f32 to vector<16x128xf32>
      %c0_12 = arith.constant 0 : index
      %c0_13 = arith.constant 0 : index
      %14 = vector.load %arg8[%c0_12, %c0_13] : memref<16x128xf32, #tpu.memory_space<vmem>>, vector<16x128xf32>
      tpu.vector_store %arg8[%c0_12, %c0_13], %13 {strides = array<i32>} : memref<16x128xf32, #tpu.memory_space<vmem>>, vector<16x128xf32>,
    } else {
    }
    %c0 = arith.constant 0 : index
    %c0_1 = arith.constant 0 : index
    %3 = vector.load %arg8[%c0, %c0_1] : memref<16x128xf32, #tpu.memory_space<vmem>>, vector<16x128xf32>
    %c0_2 = arith.constant 0 : index
    %c0_3 = arith.constant 0 : index
    %c0_4 = arith.constant 0 : index
    %4 = vector.load %arg3[%c0_2, %c0_3, %c0_4] : memref<1x16x640xbf16, #tpu.memory_space<vmem>>, vector<1x16x640xbf16>
    %5 = vector.shape_cast %4 : vector<1x16x640xbf16> to vector<16x640xbf16>
    %c0_5 = arith.constant 0 : index
    %c0_6 = arith.constant 0 : index
    %6 = vector.load %arg4[%c0_5, %c0_6] : memref<640x128xbf16, #tpu.memory_space<vmem>>, vector<640x128xbf16>
    %cst = arith.constant dense<0.000000e+00> : vector<16x128xf32>
    %7 = tpu.matmul %5, %6, %cst {dimension_numbers = #tpu.dot_dimension_numbers<[1], [0], [0], [1], [0, 0, 1, 1], [], []>} : vector<16x640xbf16>, vector<640x128xbf16>, vector<16x128xf32> -> vector<16x128xf32>
    %8 = arith.addf %3, %7 : vector<16x128xf32>
    %c0_7 = arith.constant 0 : index
    %c0_8 = arith.constant 0 : index
    %9 = vector.load %arg8[%c0_7, %c0_8] : memref<16x128xf32, #tpu.memory_space<vmem>>, vector<16x128xf32>
    tpu.vector_store %arg8[%c0_7, %c0_8], %8 {strides = array<i32>} : memref<16x128xf32, #tpu.memory_space<vmem>>, vector<16x128xf32>,
    %c0_i32_9 = arith.constant 0 : i32
    %10 = arith.cmpi eq, %arg2, %c0_i32_9 : i32
    %11 = arith.extui %10 : i1 to i32
    %c0_i32_10 = arith.constant 0 : i32
    %12 = arith.cmpi ne, %11, %c0_i32_10 : i32
    scf.if %12 {
      %c0_11 = arith.constant 0 : index
      %c0_12 = arith.constant 0 : index
      %13 = vector.load %arg8[%c0_11, %c0_12] : memref<16x128xf32, #tpu.memory_space<vmem>>, vector<16x128xf32>
      %c0_13 = arith.constant 0 : index
      %c0_14 = arith.constant 0 : index
      %14 = vector.load %arg5[%c0_13, %c0_14] : memref<1x128xf32, #tpu.memory_space<vmem>>, vector<1x128xf32>
      %15 = vector.broadcast %14 : vector<1x128xf32> to vector<16x128xf32>
      %16 = arith.mulf %13, %15 : vector<16x128xf32>
      %c0_15 = arith.constant 0 : index
      %c0_16 = arith.constant 0 : index
      %17 = vector.load %arg6[%c0_15, %c0_16] : memref<1x128xf32, #tpu.memory_space<vmem>>, vector<1x128xf32>
      %18 = vector.broadcast %17 : vector<1x128xf32> to vector<16x128xf32>
      %19 = arith.addf %16, %18 : vector<16x128xf32>
      %cst_17 = arith.constant 0.000000e+00 : f32
      %20 = vector.broadcast %cst_17 : f32 to vector<16x128xf32>
      %21 = arith.maximumf %19, %20 : vector<16x128xf32>
      %22 = arith.truncf %21 : vector<16x128xf32> to vector<16x128xbf16>
      %c0_18 = arith.constant 0 : index
      %c0_19 = arith.constant 0 : index
      %c0_20 = arith.constant 0 : index
      %23 = vector.load %arg7[%c0_18, %c0_19, %c0_20] : memref<1x16x128xbf16, #tpu.memory_space<vmem>>, vector<1x16x128xbf16>
      %24 = vector.shape_cast %23 : vector<1x16x128xbf16> to vector<16x128xbf16>
      %25 = vector.shape_cast %22 : vector<16x128xbf16> to vector<1x16x128xbf16>
      tpu.vector_store %arg7[%c0_18, %c0_19, %c0_20], %25 {strides = array<i32>} : memref<1x16x128xbf16, #tpu.memory_space<vmem>>, vector<1x16x128xbf16>,
    } else {
    }
    return
  }
  func.func @transform_0(%arg0: i32, %arg1: i32, %arg2: i32) -> (i32, i32, i32) {
    %c0_i32 = arith.constant 0 : i32
    return %arg0, %arg1, %arg2 : i32, i32, i32
  }
  func.func @transform_1(%arg0: i32, %arg1: i32, %arg2: i32) -> (i32, i32) {
    %c0_i32 = arith.constant 0 : i32
    %c0_i32_0 = arith.constant 0 : i32
    return %arg2, %c0_i32 : i32, i32
  }
  func.func @transform_2(%arg0: i32, %arg1: i32, %arg2: i32) -> (i32, i32) {
    %c0_i32 = arith.constant 0 : i32
    %c0_i32_0 = arith.constant 0 : i32
    %c0_i32_1 = arith.constant 0 : i32
    return %c0_i32, %c0_i32_0 : i32, i32
  }
  func.func @transform_3(%arg0: i32, %arg1: i32, %arg2: i32) -> (i32, i32) {
    %c0_i32 = arith.constant 0 : i32
    %c0_i32_0 = arith.constant 0 : i32
    %c0_i32_1 = arith.constant 0 : i32
    return %c0_i32, %c0_i32_0 : i32, i32
  }
  func.func @transform_4(%arg0: i32, %arg1: i32, %arg2: i32) -> (i32, i32, i32) {
    %c0_i32 = arith.constant 0 : i32
    %c0_i32_0 = arith.constant 0 : i32
    return %arg0, %arg1, %c0_i32 : i32, i32, i32
  }
}

module attributes {stable_mosaic.version = 11 : i64} {
  func.func @_max4_kernel(%arg0: i32, %arg1: i32, %arg2: memref<1x1x64xbf16, #tpu.memory_space<vmem>>, %arg3: memref<1x1x64xbf16, #tpu.memory_space<vmem>>, %arg4: memref<1x1x64xbf16, #tpu.memory_space<vmem>>, %arg5: memref<1x1x64xbf16, #tpu.memory_space<vmem>>, %arg6: memref<1x1x64xbf16, #tpu.memory_space<vmem>>) attributes {dimension_semantics = [#tpu.dimension_semantics<parallel>, #tpu.dimension_semantics<parallel>], iteration_bounds = array<i64: 2, 1>, scalar_prefetch = 0 : i64, scratch_operands = 0 : i64, tpu.core_type = #tpu.core_type<tc>, window_params = [{transform_indices = @transform_0, window_bounds = array<i64: 1, 1, 64>}, {transform_indices = @transform_1, window_bounds = array<i64: 1, 1, 64>}, {transform_indices = @transform_2, window_bounds = array<i64: 1, 1, 64>}, {transform_indices = @transform_3, window_bounds = array<i64: 1, 1, 64>}, {transform_indices = @transform_4, window_bounds = array<i64: 1, 1, 64>}]} {
    %c0 = arith.constant 0 : index
    %c0_0 = arith.constant 0 : index
    %c0_1 = arith.constant 0 : index
    %0 = vector.load %arg2[%c0, %c0_0, %c0_1] : memref<1x1x64xbf16, #tpu.memory_space<vmem>>, vector<1x1x64xbf16>
    %1 = arith.extf %0 : vector<1x1x64xbf16> to vector<1x1x64xf32>
    %c0_2 = arith.constant 0 : index
    %c0_3 = arith.constant 0 : index
    %c0_4 = arith.constant 0 : index
    %2 = vector.load %arg3[%c0_2, %c0_3, %c0_4] : memref<1x1x64xbf16, #tpu.memory_space<vmem>>, vector<1x1x64xbf16>
    %3 = arith.extf %2 : vector<1x1x64xbf16> to vector<1x1x64xf32>
    %c0_5 = arith.constant 0 : index
    %c0_6 = arith.constant 0 : index
    %c0_7 = arith.constant 0 : index
    %4 = vector.load %arg4[%c0_5, %c0_6, %c0_7] : memref<1x1x64xbf16, #tpu.memory_space<vmem>>, vector<1x1x64xbf16>
    %5 = arith.extf %4 : vector<1x1x64xbf16> to vector<1x1x64xf32>
    %c0_8 = arith.constant 0 : index
    %c0_9 = arith.constant 0 : index
    %c0_10 = arith.constant 0 : index
    %6 = vector.load %arg5[%c0_8, %c0_9, %c0_10] : memref<1x1x64xbf16, #tpu.memory_space<vmem>>, vector<1x1x64xbf16>
    %7 = arith.extf %6 : vector<1x1x64xbf16> to vector<1x1x64xf32>
    %8 = arith.maximumf %1, %3 : vector<1x1x64xf32>
    %9 = arith.maximumf %5, %7 : vector<1x1x64xf32>
    %10 = arith.maximumf %8, %9 : vector<1x1x64xf32>
    %11 = arith.truncf %10 : vector<1x1x64xf32> to vector<1x1x64xbf16>
    %c0_11 = arith.constant 0 : index
    %c0_12 = arith.constant 0 : index
    %c0_13 = arith.constant 0 : index
    %12 = vector.load %arg6[%c0_11, %c0_12, %c0_13] : memref<1x1x64xbf16, #tpu.memory_space<vmem>>, vector<1x1x64xbf16>
    tpu.vector_store %arg6[%c0_11, %c0_12, %c0_13], %11 {strides = array<i32>} : memref<1x1x64xbf16, #tpu.memory_space<vmem>>, vector<1x1x64xbf16>,
    return
  }
  func.func @transform_0(%arg0: i32, %arg1: i32) -> (i32, i32, i32) {
    %c0_i32 = arith.constant 0 : i32
    %c0_i32_0 = arith.constant 0 : i32
    return %arg0, %arg1, %c0_i32 : i32, i32, i32
  }
  func.func @transform_1(%arg0: i32, %arg1: i32) -> (i32, i32, i32) {
    %c0_i32 = arith.constant 0 : i32
    %c0_i32_0 = arith.constant 0 : i32
    return %arg0, %arg1, %c0_i32 : i32, i32, i32
  }
  func.func @transform_2(%arg0: i32, %arg1: i32) -> (i32, i32, i32) {
    %c0_i32 = arith.constant 0 : i32
    %c0_i32_0 = arith.constant 0 : i32
    return %arg0, %arg1, %c0_i32 : i32, i32, i32
  }
  func.func @transform_3(%arg0: i32, %arg1: i32) -> (i32, i32, i32) {
    %c0_i32 = arith.constant 0 : i32
    %c0_i32_0 = arith.constant 0 : i32
    return %arg0, %arg1, %c0_i32 : i32, i32, i32
  }
  func.func @transform_4(%arg0: i32, %arg1: i32) -> (i32, i32, i32) {
    %c0_i32 = arith.constant 0 : i32
    %c0_i32_0 = arith.constant 0 : i32
    return %arg0, %arg1, %c0_i32 : i32, i32, i32
  }
}

module attributes {stable_mosaic.version = 11 : i64} {
  func.func @kernel(%arg0: i32, %arg1: i32, %arg2: i32, %arg3: memref<1x16x384xbf16, #tpu.memory_space<vmem>>, %arg4: memref<384x128xbf16, #tpu.memory_space<vmem>>, %arg5: memref<1x128xf32, #tpu.memory_space<vmem>>, %arg6: memref<1x128xf32, #tpu.memory_space<vmem>>, %arg7: memref<1x16x128xbf16, #tpu.memory_space<vmem>>, %arg8: memref<16x128xf32, #tpu.memory_space<vmem>>) attributes {dimension_semantics = [#tpu.dimension_semantics<parallel>, #tpu.dimension_semantics<parallel>, #tpu.dimension_semantics<arbitrary>], iteration_bounds = array<i64: 2, 1, 3>, scalar_prefetch = 0 : i64, scratch_operands = 1 : i64, tpu.core_type = #tpu.core_type<tc>, window_params = [{transform_indices = @transform_0, window_bounds = array<i64: 1, 16, 384>}, {transform_indices = @transform_1, window_bounds = array<i64: 384, 128>}, {pipeline_mode = #tpu.pipeline_mode<synchronous>, transform_indices = @transform_2, window_bounds = array<i64: 1, 128>}, {pipeline_mode = #tpu.pipeline_mode<synchronous>, transform_indices = @transform_3, window_bounds = array<i64: 1, 128>}, {transform_indices = @transform_4, window_bounds = array<i64: 1, 16, 128>}]} {
    %c0_i32 = arith.constant 0 : i32
    %0 = arith.cmpi eq, %arg2, %c0_i32 : i32
    %1 = arith.extui %0 : i1 to i32
    %c0_i32_0 = arith.constant 0 : i32
    %2 = arith.cmpi ne, %1, %c0_i32_0 : i32
    scf.if %2 {
      %cst_10 = arith.constant 0.000000e+00 : f32
      %13 = vector.broadcast %cst_10 : f32 to vector<16x128xf32>
      %c0_11 = arith.constant 0 : index
      %c0_12 = arith.constant 0 : index
      %14 = vector.load %arg8[%c0_11, %c0_12] : memref<16x128xf32, #tpu.memory_space<vmem>>, vector<16x128xf32>
      tpu.vector_store %arg8[%c0_11, %c0_12], %13 {strides = array<i32>} : memref<16x128xf32, #tpu.memory_space<vmem>>, vector<16x128xf32>,
    } else {
    }
    %c0 = arith.constant 0 : index
    %c0_1 = arith.constant 0 : index
    %3 = vector.load %arg8[%c0, %c0_1] : memref<16x128xf32, #tpu.memory_space<vmem>>, vector<16x128xf32>
    %c0_2 = arith.constant 0 : index
    %c0_3 = arith.constant 0 : index
    %c0_4 = arith.constant 0 : index
    %4 = vector.load %arg3[%c0_2, %c0_3, %c0_4] : memref<1x16x384xbf16, #tpu.memory_space<vmem>>, vector<1x16x384xbf16>
    %5 = vector.shape_cast %4 : vector<1x16x384xbf16> to vector<16x384xbf16>
    %c0_5 = arith.constant 0 : index
    %c0_6 = arith.constant 0 : index
    %6 = vector.load %arg4[%c0_5, %c0_6] : memref<384x128xbf16, #tpu.memory_space<vmem>>, vector<384x128xbf16>
    %cst = arith.constant dense<0.000000e+00> : vector<16x128xf32>
    %7 = tpu.matmul %5, %6, %cst {dimension_numbers = #tpu.dot_dimension_numbers<[1], [0], [0], [1], [0, 0, 1, 1], [], []>} : vector<16x384xbf16>, vector<384x128xbf16>, vector<16x128xf32> -> vector<16x128xf32>
    %8 = arith.addf %3, %7 : vector<16x128xf32>
    %c0_7 = arith.constant 0 : index
    %c0_8 = arith.constant 0 : index
    %9 = vector.load %arg8[%c0_7, %c0_8] : memref<16x128xf32, #tpu.memory_space<vmem>>, vector<16x128xf32>
    tpu.vector_store %arg8[%c0_7, %c0_8], %8 {strides = array<i32>} : memref<16x128xf32, #tpu.memory_space<vmem>>, vector<16x128xf32>,
    %c2_i32 = arith.constant 2 : i32
    %10 = arith.cmpi eq, %arg2, %c2_i32 : i32
    %11 = arith.extui %10 : i1 to i32
    %c0_i32_9 = arith.constant 0 : i32
    %12 = arith.cmpi ne, %11, %c0_i32_9 : i32
    scf.if %12 {
      %c0_10 = arith.constant 0 : index
      %c0_11 = arith.constant 0 : index
      %13 = vector.load %arg8[%c0_10, %c0_11] : memref<16x128xf32, #tpu.memory_space<vmem>>, vector<16x128xf32>
      %c0_12 = arith.constant 0 : index
      %c0_13 = arith.constant 0 : index
      %14 = vector.load %arg5[%c0_12, %c0_13] : memref<1x128xf32, #tpu.memory_space<vmem>>, vector<1x128xf32>
      %15 = vector.broadcast %14 : vector<1x128xf32> to vector<16x128xf32>
      %16 = arith.mulf %13, %15 : vector<16x128xf32>
      %c0_14 = arith.constant 0 : index
      %c0_15 = arith.constant 0 : index
      %17 = vector.load %arg6[%c0_14, %c0_15] : memref<1x128xf32, #tpu.memory_space<vmem>>, vector<1x128xf32>
      %18 = vector.broadcast %17 : vector<1x128xf32> to vector<16x128xf32>
      %19 = arith.addf %16, %18 : vector<16x128xf32>
      %cst_16 = arith.constant 0.000000e+00 : f32
      %20 = vector.broadcast %cst_16 : f32 to vector<16x128xf32>
      %21 = arith.maximumf %19, %20 : vector<16x128xf32>
      %22 = arith.truncf %21 : vector<16x128xf32> to vector<16x128xbf16>
      %c0_17 = arith.constant 0 : index
      %c0_18 = arith.constant 0 : index
      %c0_19 = arith.constant 0 : index
      %23 = vector.load %arg7[%c0_17, %c0_18, %c0_19] : memref<1x16x128xbf16, #tpu.memory_space<vmem>>, vector<1x16x128xbf16>
      %24 = vector.shape_cast %23 : vector<1x16x128xbf16> to vector<16x128xbf16>
      %25 = vector.shape_cast %22 : vector<16x128xbf16> to vector<1x16x128xbf16>
      tpu.vector_store %arg7[%c0_17, %c0_18, %c0_19], %25 {strides = array<i32>} : memref<1x16x128xbf16, #tpu.memory_space<vmem>>, vector<1x16x128xbf16>,
    } else {
    }
    return
  }
  func.func @transform_0(%arg0: i32, %arg1: i32, %arg2: i32) -> (i32, i32, i32) {
    %c0_i32 = arith.constant 0 : i32
    return %arg0, %arg1, %arg2 : i32, i32, i32
  }
  func.func @transform_1(%arg0: i32, %arg1: i32, %arg2: i32) -> (i32, i32) {
    %c0_i32 = arith.constant 0 : i32
    %c0_i32_0 = arith.constant 0 : i32
    return %arg2, %c0_i32 : i32, i32
  }
  func.func @transform_2(%arg0: i32, %arg1: i32, %arg2: i32) -> (i32, i32) {
    %c0_i32 = arith.constant 0 : i32
    %c0_i32_0 = arith.constant 0 : i32
    %c0_i32_1 = arith.constant 0 : i32
    return %c0_i32, %c0_i32_0 : i32, i32
  }
  func.func @transform_3(%arg0: i32, %arg1: i32, %arg2: i32) -> (i32, i32) {
    %c0_i32 = arith.constant 0 : i32
    %c0_i32_0 = arith.constant 0 : i32
    %c0_i32_1 = arith.constant 0 : i32
    return %c0_i32, %c0_i32_0 : i32, i32
  }
  func.func @transform_4(%arg0: i32, %arg1: i32, %arg2: i32) -> (i32, i32, i32) {
    %c0_i32 = arith.constant 0 : i32
    %c0_i32_0 = arith.constant 0 : i32
    return %arg0, %arg1, %c0_i32 : i32, i32, i32
  }
}

module attributes {stable_mosaic.version = 11 : i64} {
  func.func @kernel(%arg0: i32, %arg1: i32, %arg2: i32, %arg3: memref<1x64x384xbf16, #tpu.memory_space<vmem>>, %arg4: memref<384x128xbf16, #tpu.memory_space<vmem>>, %arg5: memref<1x128xf32, #tpu.memory_space<vmem>>, %arg6: memref<1x128xf32, #tpu.memory_space<vmem>>, %arg7: memref<1x64x128xbf16, #tpu.memory_space<vmem>>, %arg8: memref<64x128xf32, #tpu.memory_space<vmem>>) attributes {dimension_semantics = [#tpu.dimension_semantics<parallel>, #tpu.dimension_semantics<parallel>, #tpu.dimension_semantics<arbitrary>], iteration_bounds = array<i64: 2, 1, 1>, scalar_prefetch = 0 : i64, scratch_operands = 1 : i64, tpu.core_type = #tpu.core_type<tc>, window_params = [{transform_indices = @transform_0, window_bounds = array<i64: 1, 64, 384>}, {transform_indices = @transform_1, window_bounds = array<i64: 384, 128>}, {pipeline_mode = #tpu.pipeline_mode<synchronous>, transform_indices = @transform_2, window_bounds = array<i64: 1, 128>}, {pipeline_mode = #tpu.pipeline_mode<synchronous>, transform_indices = @transform_3, window_bounds = array<i64: 1, 128>}, {transform_indices = @transform_4, window_bounds = array<i64: 1, 64, 128>}]} {
    %c0_i32 = arith.constant 0 : i32
    %0 = arith.cmpi eq, %arg2, %c0_i32 : i32
    %1 = arith.extui %0 : i1 to i32
    %c0_i32_0 = arith.constant 0 : i32
    %2 = arith.cmpi ne, %1, %c0_i32_0 : i32
    scf.if %2 {
      %cst_11 = arith.constant 0.000000e+00 : f32
      %13 = vector.broadcast %cst_11 : f32 to vector<64x128xf32>
      %c0_12 = arith.constant 0 : index
      %c0_13 = arith.constant 0 : index
      %14 = vector.load %arg8[%c0_12, %c0_13] : memref<64x128xf32, #tpu.memory_space<vmem>>, vector<64x128xf32>
      tpu.vector_store %arg8[%c0_12, %c0_13], %13 {strides = array<i32>} : memref<64x128xf32, #tpu.memory_space<vmem>>, vector<64x128xf32>,
    } else {
    }
    %c0 = arith.constant 0 : index
    %c0_1 = arith.constant 0 : index
    %3 = vector.load %arg8[%c0, %c0_1] : memref<64x128xf32, #tpu.memory_space<vmem>>, vector<64x128xf32>
    %c0_2 = arith.constant 0 : index
    %c0_3 = arith.constant 0 : index
    %c0_4 = arith.constant 0 : index
    %4 = vector.load %arg3[%c0_2, %c0_3, %c0_4] : memref<1x64x384xbf16, #tpu.memory_space<vmem>>, vector<1x64x384xbf16>
    %5 = vector.shape_cast %4 : vector<1x64x384xbf16> to vector<64x384xbf16>
    %c0_5 = arith.constant 0 : index
    %c0_6 = arith.constant 0 : index
    %6 = vector.load %arg4[%c0_5, %c0_6] : memref<384x128xbf16, #tpu.memory_space<vmem>>, vector<384x128xbf16>
    %cst = arith.constant dense<0.000000e+00> : vector<64x128xf32>
    %7 = tpu.matmul %5, %6, %cst {dimension_numbers = #tpu.dot_dimension_numbers<[1], [0], [0], [1], [0, 0, 1, 1], [], []>} : vector<64x384xbf16>, vector<384x128xbf16>, vector<64x128xf32> -> vector<64x128xf32>
    %8 = arith.addf %3, %7 : vector<64x128xf32>
    %c0_7 = arith.constant 0 : index
    %c0_8 = arith.constant 0 : index
    %9 = vector.load %arg8[%c0_7, %c0_8] : memref<64x128xf32, #tpu.memory_space<vmem>>, vector<64x128xf32>
    tpu.vector_store %arg8[%c0_7, %c0_8], %8 {strides = array<i32>} : memref<64x128xf32, #tpu.memory_space<vmem>>, vector<64x128xf32>,
    %c0_i32_9 = arith.constant 0 : i32
    %10 = arith.cmpi eq, %arg2, %c0_i32_9 : i32
    %11 = arith.extui %10 : i1 to i32
    %c0_i32_10 = arith.constant 0 : i32
    %12 = arith.cmpi ne, %11, %c0_i32_10 : i32
    scf.if %12 {
      %c0_11 = arith.constant 0 : index
      %c0_12 = arith.constant 0 : index
      %13 = vector.load %arg8[%c0_11, %c0_12] : memref<64x128xf32, #tpu.memory_space<vmem>>, vector<64x128xf32>
      %c0_13 = arith.constant 0 : index
      %c0_14 = arith.constant 0 : index
      %14 = vector.load %arg5[%c0_13, %c0_14] : memref<1x128xf32, #tpu.memory_space<vmem>>, vector<1x128xf32>
      %15 = vector.broadcast %14 : vector<1x128xf32> to vector<64x128xf32>
      %16 = arith.mulf %13, %15 : vector<64x128xf32>
      %c0_15 = arith.constant 0 : index
      %c0_16 = arith.constant 0 : index
      %17 = vector.load %arg6[%c0_15, %c0_16] : memref<1x128xf32, #tpu.memory_space<vmem>>, vector<1x128xf32>
      %18 = vector.broadcast %17 : vector<1x128xf32> to vector<64x128xf32>
      %19 = arith.addf %16, %18 : vector<64x128xf32>
      %cst_17 = arith.constant 0.000000e+00 : f32
      %20 = vector.broadcast %cst_17 : f32 to vector<64x128xf32>
      %21 = arith.maximumf %19, %20 : vector<64x128xf32>
      %22 = arith.truncf %21 : vector<64x128xf32> to vector<64x128xbf16>
      %c0_18 = arith.constant 0 : index
      %c0_19 = arith.constant 0 : index
      %c0_20 = arith.constant 0 : index
      %23 = vector.load %arg7[%c0_18, %c0_19, %c0_20] : memref<1x64x128xbf16, #tpu.memory_space<vmem>>, vector<1x64x128xbf16>
      %24 = vector.shape_cast %23 : vector<1x64x128xbf16> to vector<64x128xbf16>
      %25 = vector.shape_cast %22 : vector<64x128xbf16> to vector<1x64x128xbf16>
      tpu.vector_store %arg7[%c0_18, %c0_19, %c0_20], %25 {strides = array<i32>} : memref<1x64x128xbf16, #tpu.memory_space<vmem>>, vector<1x64x128xbf16>,
    } else {
    }
    return
  }
  func.func @transform_0(%arg0: i32, %arg1: i32, %arg2: i32) -> (i32, i32, i32) {
    %c0_i32 = arith.constant 0 : i32
    return %arg0, %arg1, %arg2 : i32, i32, i32
  }
  func.func @transform_1(%arg0: i32, %arg1: i32, %arg2: i32) -> (i32, i32) {
    %c0_i32 = arith.constant 0 : i32
    %c0_i32_0 = arith.constant 0 : i32
    return %arg2, %c0_i32 : i32, i32
  }
  func.func @transform_2(%arg0: i32, %arg1: i32, %arg2: i32) -> (i32, i32) {
    %c0_i32 = arith.constant 0 : i32
    %c0_i32_0 = arith.constant 0 : i32
    %c0_i32_1 = arith.constant 0 : i32
    return %c0_i32, %c0_i32_0 : i32, i32
  }
  func.func @transform_3(%arg0: i32, %arg1: i32, %arg2: i32) -> (i32, i32) {
    %c0_i32 = arith.constant 0 : i32
    %c0_i32_0 = arith.constant 0 : i32
    %c0_i32_1 = arith.constant 0 : i32
    return %c0_i32, %c0_i32_0 : i32, i32
  }
  func.func @transform_4(%arg0: i32, %arg1: i32, %arg2: i32) -> (i32, i32, i32) {
    %c0_i32 = arith.constant 0 : i32
    %c0_i32_0 = arith.constant 0 : i32
    return %arg0, %arg1, %c0_i32 : i32, i32, i32
  }
}

module attributes {stable_mosaic.version = 11 : i64} {
  func.func @kernel(%arg0: i32, %arg1: i32, %arg2: i32, %arg3: memref<1x256x256xbf16, #tpu.memory_space<vmem>>, %arg4: memref<256x128xbf16, #tpu.memory_space<vmem>>, %arg5: memref<1x128xf32, #tpu.memory_space<vmem>>, %arg6: memref<1x128xf32, #tpu.memory_space<vmem>>, %arg7: memref<1x256x128xbf16, #tpu.memory_space<vmem>>, %arg8: memref<256x128xf32, #tpu.memory_space<vmem>>) attributes {dimension_semantics = [#tpu.dimension_semantics<parallel>, #tpu.dimension_semantics<parallel>, #tpu.dimension_semantics<arbitrary>], iteration_bounds = array<i64: 2, 1, 1>, scalar_prefetch = 0 : i64, scratch_operands = 1 : i64, tpu.core_type = #tpu.core_type<tc>, window_params = [{transform_indices = @transform_0, window_bounds = array<i64: 1, 256, 256>}, {transform_indices = @transform_1, window_bounds = array<i64: 256, 128>}, {pipeline_mode = #tpu.pipeline_mode<synchronous>, transform_indices = @transform_2, window_bounds = array<i64: 1, 128>}, {pipeline_mode = #tpu.pipeline_mode<synchronous>, transform_indices = @transform_3, window_bounds = array<i64: 1, 128>}, {transform_indices = @transform_4, window_bounds = array<i64: 1, 256, 128>}]} {
    %c0_i32 = arith.constant 0 : i32
    %0 = arith.cmpi eq, %arg2, %c0_i32 : i32
    %1 = arith.extui %0 : i1 to i32
    %c0_i32_0 = arith.constant 0 : i32
    %2 = arith.cmpi ne, %1, %c0_i32_0 : i32
    scf.if %2 {
      %cst_11 = arith.constant 0.000000e+00 : f32
      %13 = vector.broadcast %cst_11 : f32 to vector<256x128xf32>
      %c0_12 = arith.constant 0 : index
      %c0_13 = arith.constant 0 : index
      %14 = vector.load %arg8[%c0_12, %c0_13] : memref<256x128xf32, #tpu.memory_space<vmem>>, vector<256x128xf32>
      tpu.vector_store %arg8[%c0_12, %c0_13], %13 {strides = array<i32>} : memref<256x128xf32, #tpu.memory_space<vmem>>, vector<256x128xf32>,
    } else {
    }
    %c0 = arith.constant 0 : index
    %c0_1 = arith.constant 0 : index
    %3 = vector.load %arg8[%c0, %c0_1] : memref<256x128xf32, #tpu.memory_space<vmem>>, vector<256x128xf32>
    %c0_2 = arith.constant 0 : index
    %c0_3 = arith.constant 0 : index
    %c0_4 = arith.constant 0 : index
    %4 = vector.load %arg3[%c0_2, %c0_3, %c0_4] : memref<1x256x256xbf16, #tpu.memory_space<vmem>>, vector<1x256x256xbf16>
    %5 = vector.shape_cast %4 : vector<1x256x256xbf16> to vector<256x256xbf16>
    %c0_5 = arith.constant 0 : index
    %c0_6 = arith.constant 0 : index
    %6 = vector.load %arg4[%c0_5, %c0_6] : memref<256x128xbf16, #tpu.memory_space<vmem>>, vector<256x128xbf16>
    %cst = arith.constant dense<0.000000e+00> : vector<256x128xf32>
    %7 = tpu.matmul %5, %6, %cst {dimension_numbers = #tpu.dot_dimension_numbers<[1], [0], [0], [1], [0, 0, 1, 1], [], []>} : vector<256x256xbf16>, vector<256x128xbf16>, vector<256x128xf32> -> vector<256x128xf32>
    %8 = arith.addf %3, %7 : vector<256x128xf32>
    %c0_7 = arith.constant 0 : index
    %c0_8 = arith.constant 0 : index
    %9 = vector.load %arg8[%c0_7, %c0_8] : memref<256x128xf32, #tpu.memory_space<vmem>>, vector<256x128xf32>
    tpu.vector_store %arg8[%c0_7, %c0_8], %8 {strides = array<i32>} : memref<256x128xf32, #tpu.memory_space<vmem>>, vector<256x128xf32>,
    %c0_i32_9 = arith.constant 0 : i32
    %10 = arith.cmpi eq, %arg2, %c0_i32_9 : i32
    %11 = arith.extui %10 : i1 to i32
    %c0_i32_10 = arith.constant 0 : i32
    %12 = arith.cmpi ne, %11, %c0_i32_10 : i32
    scf.if %12 {
      %c0_11 = arith.constant 0 : index
      %c0_12 = arith.constant 0 : index
      %13 = vector.load %arg8[%c0_11, %c0_12] : memref<256x128xf32, #tpu.memory_space<vmem>>, vector<256x128xf32>
      %c0_13 = arith.constant 0 : index
      %c0_14 = arith.constant 0 : index
      %14 = vector.load %arg5[%c0_13, %c0_14] : memref<1x128xf32, #tpu.memory_space<vmem>>, vector<1x128xf32>
      %15 = vector.broadcast %14 : vector<1x128xf32> to vector<256x128xf32>
      %16 = arith.mulf %13, %15 : vector<256x128xf32>
      %c0_15 = arith.constant 0 : index
      %c0_16 = arith.constant 0 : index
      %17 = vector.load %arg6[%c0_15, %c0_16] : memref<1x128xf32, #tpu.memory_space<vmem>>, vector<1x128xf32>
      %18 = vector.broadcast %17 : vector<1x128xf32> to vector<256x128xf32>
      %19 = arith.addf %16, %18 : vector<256x128xf32>
      %cst_17 = arith.constant 0.000000e+00 : f32
      %20 = vector.broadcast %cst_17 : f32 to vector<256x128xf32>
      %21 = arith.maximumf %19, %20 : vector<256x128xf32>
      %22 = arith.truncf %21 : vector<256x128xf32> to vector<256x128xbf16>
      %c0_18 = arith.constant 0 : index
      %c0_19 = arith.constant 0 : index
      %c0_20 = arith.constant 0 : index
      %23 = vector.load %arg7[%c0_18, %c0_19, %c0_20] : memref<1x256x128xbf16, #tpu.memory_space<vmem>>, vector<1x256x128xbf16>
      %24 = vector.shape_cast %23 : vector<1x256x128xbf16> to vector<256x128xbf16>
      %25 = vector.shape_cast %22 : vector<256x128xbf16> to vector<1x256x128xbf16>
      tpu.vector_store %arg7[%c0_18, %c0_19, %c0_20], %25 {strides = array<i32>} : memref<1x256x128xbf16, #tpu.memory_space<vmem>>, vector<1x256x128xbf16>,
    } else {
    }
    return
  }
  func.func @transform_0(%arg0: i32, %arg1: i32, %arg2: i32) -> (i32, i32, i32) {
    %c0_i32 = arith.constant 0 : i32
    return %arg0, %arg1, %arg2 : i32, i32, i32
  }
  func.func @transform_1(%arg0: i32, %arg1: i32, %arg2: i32) -> (i32, i32) {
    %c0_i32 = arith.constant 0 : i32
    %c0_i32_0 = arith.constant 0 : i32
    return %arg2, %c0_i32 : i32, i32
  }
  func.func @transform_2(%arg0: i32, %arg1: i32, %arg2: i32) -> (i32, i32) {
    %c0_i32 = arith.constant 0 : i32
    %c0_i32_0 = arith.constant 0 : i32
    %c0_i32_1 = arith.constant 0 : i32
    return %c0_i32, %c0_i32_0 : i32, i32
  }
  func.func @transform_3(%arg0: i32, %arg1: i32, %arg2: i32) -> (i32, i32) {
    %c0_i32 = arith.constant 0 : i32
    %c0_i32_0 = arith.constant 0 : i32
    %c0_i32_1 = arith.constant 0 : i32
    return %c0_i32, %c0_i32_0 : i32, i32
  }
  func.func @transform_4(%arg0: i32, %arg1: i32, %arg2: i32) -> (i32, i32, i32) {
    %c0_i32 = arith.constant 0 : i32
    %c0_i32_0 = arith.constant 0 : i32
    return %arg0, %arg1, %c0_i32 : i32, i32, i32
  }
}

module attributes {stable_mosaic.version = 11 : i64} {
  func.func @kernel(%arg0: i32, %arg1: i32, %arg2: i32, %arg3: memref<1x256x128xbf16, #tpu.memory_space<vmem>>, %arg4: memref<128x128xbf16, #tpu.memory_space<vmem>>, %arg5: memref<1x128xf32, #tpu.memory_space<vmem>>, %arg6: memref<1x128xf32, #tpu.memory_space<vmem>>, %arg7: memref<1x256x128xf32, #tpu.memory_space<vmem>>, %arg8: memref<256x128xf32, #tpu.memory_space<vmem>>) attributes {dimension_semantics = [#tpu.dimension_semantics<parallel>, #tpu.dimension_semantics<parallel>, #tpu.dimension_semantics<arbitrary>], iteration_bounds = array<i64: 2, 1, 1>, scalar_prefetch = 0 : i64, scratch_operands = 1 : i64, tpu.core_type = #tpu.core_type<tc>, window_params = [{transform_indices = @transform_0, window_bounds = array<i64: 1, 256, 128>}, {transform_indices = @transform_1, window_bounds = array<i64: 128, 128>}, {pipeline_mode = #tpu.pipeline_mode<synchronous>, transform_indices = @transform_2, window_bounds = array<i64: 1, 128>}, {pipeline_mode = #tpu.pipeline_mode<synchronous>, transform_indices = @transform_3, window_bounds = array<i64: 1, 128>}, {transform_indices = @transform_4, window_bounds = array<i64: 1, 256, 128>}]} {
    %c0_i32 = arith.constant 0 : i32
    %0 = arith.cmpi eq, %arg2, %c0_i32 : i32
    %1 = arith.extui %0 : i1 to i32
    %c0_i32_0 = arith.constant 0 : i32
    %2 = arith.cmpi ne, %1, %c0_i32_0 : i32
    scf.if %2 {
      %cst_11 = arith.constant 0.000000e+00 : f32
      %13 = vector.broadcast %cst_11 : f32 to vector<256x128xf32>
      %c0_12 = arith.constant 0 : index
      %c0_13 = arith.constant 0 : index
      %14 = vector.load %arg8[%c0_12, %c0_13] : memref<256x128xf32, #tpu.memory_space<vmem>>, vector<256x128xf32>
      tpu.vector_store %arg8[%c0_12, %c0_13], %13 {strides = array<i32>} : memref<256x128xf32, #tpu.memory_space<vmem>>, vector<256x128xf32>,
    } else {
    }
    %c0 = arith.constant 0 : index
    %c0_1 = arith.constant 0 : index
    %3 = vector.load %arg8[%c0, %c0_1] : memref<256x128xf32, #tpu.memory_space<vmem>>, vector<256x128xf32>
    %c0_2 = arith.constant 0 : index
    %c0_3 = arith.constant 0 : index
    %c0_4 = arith.constant 0 : index
    %4 = vector.load %arg3[%c0_2, %c0_3, %c0_4] : memref<1x256x128xbf16, #tpu.memory_space<vmem>>, vector<1x256x128xbf16>
    %5 = vector.shape_cast %4 : vector<1x256x128xbf16> to vector<256x128xbf16>
    %c0_5 = arith.constant 0 : index
    %c0_6 = arith.constant 0 : index
    %6 = vector.load %arg4[%c0_5, %c0_6] : memref<128x128xbf16, #tpu.memory_space<vmem>>, vector<128x128xbf16>
    %cst = arith.constant dense<0.000000e+00> : vector<256x128xf32>
    %7 = tpu.matmul %5, %6, %cst {dimension_numbers = #tpu.dot_dimension_numbers<[1], [0], [0], [1], [0, 0, 1, 1], [], []>} : vector<256x128xbf16>, vector<128x128xbf16>, vector<256x128xf32> -> vector<256x128xf32>
    %8 = arith.addf %3, %7 : vector<256x128xf32>
    %c0_7 = arith.constant 0 : index
    %c0_8 = arith.constant 0 : index
    %9 = vector.load %arg8[%c0_7, %c0_8] : memref<256x128xf32, #tpu.memory_space<vmem>>, vector<256x128xf32>
    tpu.vector_store %arg8[%c0_7, %c0_8], %8 {strides = array<i32>} : memref<256x128xf32, #tpu.memory_space<vmem>>, vector<256x128xf32>,
    %c0_i32_9 = arith.constant 0 : i32
    %10 = arith.cmpi eq, %arg2, %c0_i32_9 : i32
    %11 = arith.extui %10 : i1 to i32
    %c0_i32_10 = arith.constant 0 : i32
    %12 = arith.cmpi ne, %11, %c0_i32_10 : i32
    scf.if %12 {
      %c0_11 = arith.constant 0 : index
      %c0_12 = arith.constant 0 : index
      %13 = vector.load %arg8[%c0_11, %c0_12] : memref<256x128xf32, #tpu.memory_space<vmem>>, vector<256x128xf32>
      %c0_13 = arith.constant 0 : index
      %c0_14 = arith.constant 0 : index
      %14 = vector.load %arg5[%c0_13, %c0_14] : memref<1x128xf32, #tpu.memory_space<vmem>>, vector<1x128xf32>
      %15 = vector.broadcast %14 : vector<1x128xf32> to vector<256x128xf32>
      %16 = arith.mulf %13, %15 : vector<256x128xf32>
      %c0_15 = arith.constant 0 : index
      %c0_16 = arith.constant 0 : index
      %17 = vector.load %arg6[%c0_15, %c0_16] : memref<1x128xf32, #tpu.memory_space<vmem>>, vector<1x128xf32>
      %18 = vector.broadcast %17 : vector<1x128xf32> to vector<256x128xf32>
      %19 = arith.addf %16, %18 : vector<256x128xf32>
      %c0_17 = arith.constant 0 : index
      %c0_18 = arith.constant 0 : index
      %c0_19 = arith.constant 0 : index
      %20 = vector.load %arg7[%c0_17, %c0_18, %c0_19] : memref<1x256x128xf32, #tpu.memory_space<vmem>>, vector<1x256x128xf32>
      %21 = vector.shape_cast %20 : vector<1x256x128xf32> to vector<256x128xf32>
      %22 = vector.shape_cast %19 : vector<256x128xf32> to vector<1x256x128xf32>
      tpu.vector_store %arg7[%c0_17, %c0_18, %c0_19], %22 {strides = array<i32>} : memref<1x256x128xf32, #tpu.memory_space<vmem>>, vector<1x256x128xf32>,
    } else {
    }
    return
  }
  func.func @transform_0(%arg0: i32, %arg1: i32, %arg2: i32) -> (i32, i32, i32) {
    %c0_i32 = arith.constant 0 : i32
    return %arg0, %arg1, %arg2 : i32, i32, i32
  }
  func.func @transform_1(%arg0: i32, %arg1: i32, %arg2: i32) -> (i32, i32) {
    %c0_i32 = arith.constant 0 : i32
    %c0_i32_0 = arith.constant 0 : i32
    return %arg2, %c0_i32 : i32, i32
  }
  func.func @transform_2(%arg0: i32, %arg1: i32, %arg2: i32) -> (i32, i32) {
    %c0_i32 = arith.constant 0 : i32
    %c0_i32_0 = arith.constant 0 : i32
    %c0_i32_1 = arith.constant 0 : i32
    return %c0_i32, %c0_i32_0 : i32, i32
  }
  func.func @transform_3(%arg0: i32, %arg1: i32, %arg2: i32) -> (i32, i32) {
    %c0_i32 = arith.constant 0 : i32
    %c0_i32_0 = arith.constant 0 : i32
    %c0_i32_1 = arith.constant 0 : i32
    return %c0_i32, %c0_i32_0 : i32, i32
  }
  func.func @transform_4(%arg0: i32, %arg1: i32, %arg2: i32) -> (i32, i32, i32) {
    %c0_i32 = arith.constant 0 : i32
    %c0_i32_0 = arith.constant 0 : i32
    return %arg0, %arg1, %c0_i32 : i32, i32, i32
  }
}

</mosaic_0001>

<bundles_post_ra>
// kernel: a_unet_forward.23
= control target key start
LH: loop header
LB: loop body
LE: loop exit
PB: predicated region body
PF: predicated region fallthrough
CT: control target
= control target key end

     0   :  { %s1329_s15 = smov 0   ;;  %s1331_s16 = smov 0   ;;  %s1507_s0 = inlined_call_operand.vmem [shape: bf16[2,256,128], index: 0, kind: input, shape index: {}]   ;;  %s1508_s1 = inlined_call_operand.vmem [shape: bf16[128,128], index: 1, kind: input, shape index: {}]   ;;  %s1509_s2 = inlined_call_operand.vmem [shape: f32[1,128], index: 2, kind: input, shape index: {}]   ;;  %s1510_s3 = inlined_call_operand.vmem [shape: f32[1,128], index: 3, kind: input, shape index: {}]   ;;  %s1511_s4 = inlined_call_operand.vmem [shape: bf16[2,256,128], index: 4, kind: output, shape index: {}]  }
   0x1   :  { %s1333_s17 = smov 0  }
   0x2 LB: > { %s33_s18 = sadd.s32 1, %s1298_s16  ;;  %p1006_p0 = scmp.ge.s32.totalorder %s1302_s17, 1  ;;  %s1302_s17 = sphi %s1333_s17, %s14_s17   ;;  %s1298_s16 = sphi %s1331_s16, %s1513_s16   ;;  %s1294_s15 = sphi %s1329_s15, %s1512_s15  }
   0x3   : > { %p35_p1 = scmp.ge.s32.totalorder %s33_s18, 2  ;;  %p206_p2 = scmp.lt.s32.totalorder %s1302_s17, 3 }
   0x5   : > { %s1515_s18 = smov (%p35_p1, %s33_s18), 0  ;;  %p207_p3 = pnand %p1006_p0, %p206_p2 }
   0x6   : > { %p249_p4 = scmp.lt.s32.totalorder (!%p207_p3), %s1294_s15, 1 }
   0x7   : > { %210 = sbr.rel (%p207_p3) target bundleno = 243 (0xf3), region = 36 }
   0xc   : > { %v1134_v0 = vld [vmem:[%s1508_s1 + $0x38] sm:$0xff]  ;;  %v1133_v1 = vld [vmem:[%s1508_s1 + $0x30] sm:$0xff]  ;;  %v1132_v2 = vld [vmem:[%s1508_s1 + $0x28] sm:$0xff]  ;;  %s1517_s15 = smov (!%p249_p4, %s1294_s15), 1 }
   0xd   : > { %537 = vmatpush.bf16.msra.mxu0 %v1134_v0  ;;  %1230 = vmatpush.bf16.msra.mxu1 %v1134_v0  ;;  %v1131_v3 = vld [vmem:[%s1508_s1 + $0x20] sm:$0xff]  ;;  %v1130_v4 = vld [vmem:[%s1508_s1 + $0x18] sm:$0xff]  ;;  %v1129_v5 = vld [vmem:[%s1508_s1 + $0x10] sm:$0xff]  ;;  %s1109_s7 = sshll.u32 %s1517_s15, 7 }
   0xe   : > { %1231 = vmatpush.bf16.msra.mxu2 %v1134_v0  ;;  %1232 = vmatpush.bf16.msra.mxu3 %v1134_v0  ;;  %v1128_v6 = vld [vmem:[%s1508_s1 + $0x8] sm:$0xff]  ;;  %v1127_v7 = vld [vmem:[%s1508_s1] sm:$0xff]  ;;  %s1383_s12 = scalar_lea.vmem %s1507_s0, %s1109_s7  ;;  %s1426_s23 = scalar_lea.vmem %s1511_s4, %s1109_s7 }
   0xf   : > { %v1111_v8 = vld [vmem:[%s1383_s12] sm:$0xff]  ;;  %v1112_v12 = vld [vmem:[%s1383_s12 + $0x8] sm:$0xff]  ;;  %v1113_v16 = vld [vmem:[%s1383_s12 + $0x10] sm:$0xff] }
  0x10   : > { %v1115_v9 = vld [vmem:[%s1383_s12 + $0x20] sm:$0xff]  ;;  %v1116_v13 = vld [vmem:[%s1383_s12 + $0x28] sm:$0xff]  ;;  %v1117_v17 = vld [vmem:[%s1383_s12 + $0x30] sm:$0xff] }
  0x11   : > { %538 = vmatpush.bf16.msra.mxu0 %v1133_v1  ;;  %1233 = vmatpush.bf16.msra.mxu1 %v1133_v1  ;;  %v1119_v10 = vld [vmem:[%s1383_s12 + $0x40] sm:$0xff]  ;;  %v1120_v14 = vld [vmem:[%s1383_s12 + $0x48] sm:$0xff]  ;;  %v1121_v18 = vld [vmem:[%s1383_s12 + $0x50] sm:$0xff] }
  0x12   : > { %1234 = vmatpush.bf16.msra.mxu2 %v1133_v1  ;;  %1235 = vmatpush.bf16.msra.mxu3 %v1133_v1  ;;  %v1123_v11 = vld [vmem:[%s1383_s12 + $0x60] sm:$0xff]  ;;  %v1124_v15 = vld [vmem:[%s1383_s12 + $0x68] sm:$0xff]  ;;  %v1125_v19 = vld [vmem:[%s1383_s12 + $0x70] sm:$0xff] }
  0x13   : > { %v1114_v20 = vld [vmem:[%s1383_s12 + $0x18] sm:$0xff]  ;;  %v1404_v26 = vld [vmem:[%s1509_s2] ss:$0 sm:$0xff] }
  0x14   : > { %v1118_v21 = vld [vmem:[%s1383_s12 + $0x38] sm:$0xff]  ;;  %v1410_v28 = vld [vmem:[%s1510_s3] ss:$0 sm:$0xff] }
  0x15   : > { %539 = vmatpush.bf16.msra.mxu0 %v1132_v2  ;;  %1236 = vmatpush.bf16.msra.mxu1 %v1132_v2  ;;  %v1122_v22 = vld [vmem:[%s1383_s12 + $0x58] sm:$0xff] }
  0x16   : > { %1237 = vmatpush.bf16.msra.mxu2 %v1132_v2  ;;  %1238 = vmatpush.bf16.msra.mxu3 %v1132_v2  ;;  %v1126_v23 = vld [vmem:[%s1383_s12 + $0x78] sm:$0xff] }
  0x19   : > { %540 = vmatpush.bf16.msra.mxu0 %v1131_v3  ;;  %1239 = vmatpush.bf16.msra.mxu1 %v1131_v3 }
  0x1a   : > { %1240 = vmatpush.bf16.msra.mxu2 %v1131_v3  ;;  %1241 = vmatpush.bf16.msra.mxu3 %v1131_v3 }
  0x1d   : > { %541 = vmatpush.bf16.msra.mxu0 %v1130_v4  ;;  %1242 = vmatpush.bf16.msra.mxu1 %v1130_v4 }
  0x1e   : > { %1243 = vmatpush.bf16.msra.mxu2 %v1130_v4  ;;  %1244 = vmatpush.bf16.msra.mxu3 %v1130_v4 }
  0x21   : > { %542 = vmatpush.bf16.msra.mxu0 %v1129_v5  ;;  %1245 = vmatpush.bf16.msra.mxu1 %v1129_v5 }
  0x22   : > { %1246 = vmatpush.bf16.msra.mxu2 %v1129_v5  ;;  %1247 = vmatpush.bf16.msra.mxu3 %v1129_v5 }
  0x25   : > { %543 = vmatpush.bf16.msra.mxu0 %v1128_v6  ;;  %1248 = vmatpush.bf16.msra.mxu1 %v1128_v6 }
  0x26   : > { %1249 = vmatpush.bf16.msra.mxu2 %v1128_v6  ;;  %1250 = vmatpush.bf16.msra.mxu3 %v1128_v6 }
  0x29   : > { %544 = vmatpush.bf16.msra.mxu0 %v1127_v7  ;;  %1251 = vmatpush.bf16.msra.mxu1 %v1127_v7 }
  0x2a   : > { %1252 = vmatpush.bf16.msra.mxu2 %v1127_v7  ;;  %1253 = vmatpush.bf16.msra.mxu3 %v1127_v7 }
  0x2c   : > { %545 = vmatmul.bf16.vlgmr.msra.gmra.mxu0 %v1111_v8  ;;  %565 = vmatmul.bf16.vlgmr.msra.gmra.mxu1 %v1115_v9 }
  0x2d   : > { %585 = vmatmul.bf16.vlgmr.msra.gmra.mxu2 %v1119_v10  ;;  %605 = vmatmul.bf16.vlgmr.msra.gmra.mxu3 %v1123_v11 }
  0x3c   : > { %550 = vmatmul.bf16.gmra.mxu0 %v1112_v12  ;;  %570 = vmatmul.bf16.gmra.mxu1 %v1116_v13 }
  0x3d   : > { %590 = vmatmul.bf16.gmra.mxu2 %v1120_v14  ;;  %610 = vmatmul.bf16.gmra.mxu3 %v1124_v15 }
  0x4c   : > { %555 = vmatmul.bf16.gmra.mxu0 %v1113_v16  ;;  %575 = vmatmul.bf16.gmra.mxu1 %v1117_v17 }
  0x4d   : > { %595 = vmatmul.bf16.gmra.mxu2 %v1121_v18  ;;  %615 = vmatmul.bf16.gmra.mxu3 %v1125_v19 }
  0x5c   : > { %560 = vmatmul.bf16.gmra.mxu0 %v1114_v20  ;;  %580 = vmatmul.bf16.gmra.mxu1 %v1118_v21 }
  0x5d   : > { %600 = vmatmul.bf16.gmra.mxu2 %v1122_v22  ;;  %620 = vmatmul.bf16.gmra.mxu3 %v1126_v23 }
  0xa9   : > { %v546_v24 = vpop.f32.mrf.mxu0  ;;  %v566_v25 = vpop.f32.mrf.mxu1 }
  0xaa   : > { %v729_v27 = vmul.f32 %v1404_v26, %v546_v24  ;;  %v737_v29 = vmul.f32 %v1404_v26, %v566_v25 }
  0xac   : > { %v765_v34 = vadd.f32 %v1410_v28, %v729_v27  ;;  %v773_v35 = vadd.f32 %v1410_v28, %v737_v29 }
  0xae   : > { %v797_v42 = vmax.f32 %v765_v34, 0.0  ;;  %v805_v43 = vmax.f32 %v773_v35, 0.0 }
  0xb0   : > { %v586_v30 = vpop.f32.mrf.mxu2  ;;  %v606_v31 = vpop.f32.mrf.mxu3 }
  0xb1   : > { %v548_v32 = vpop.f32.mrf.mxu0  ;;  %v568_v33 = vpop.f32.mrf.mxu1  ;;  %v745_v40 = vmul.f32 %v1404_v26, %v586_v30  ;;  %v753_v41 = vmul.f32 %v1404_v26, %v606_v31 }
  0xb2   : > { %v730_v36 = vmul.f32 %v1404_v26, %v548_v32  ;;  %v738_v37 = vmul.f32 %v1404_v26, %v568_v33 }
  0xb3   : > { %v781_v50 = vadd.f32 %v1410_v28, %v745_v40  ;;  %v789_v51 = vadd.f32 %v1410_v28, %v753_v41 }
  0xb4   : > { %v766_v38 = vadd.f32 %v1410_v28, %v730_v36  ;;  %v774_v39 = vadd.f32 %v1410_v28, %v738_v37 }
  0xb5   : > { %v813_v58 = vmax.f32 %v781_v50, 0.0  ;;  %v821_v59 = vmax.f32 %v789_v51, 0.0 }
  0xb6   : > { %v798_v44 = vmax.f32 %v766_v38, 0.0  ;;  %v806_v45 = vmax.f32 %v774_v39, 0.0 }
  0xb8   : > { %v1138_v46 = vpack.c.bf16 %v798_v44, %v797_v42  ;;  %v1158_v47 = vpack.c.bf16 %v806_v45, %v805_v43  ;;  %v588_v48 = vpop.f32.mrf.mxu2  ;;  %v608_v49 = vpop.f32.mrf.mxu3 }
  0xb9   : > { %v746_v52 = vmul.f32 %v1404_v26, %v588_v48  ;;  %v754_v53 = vmul.f32 %v1404_v26, %v608_v49  ;;  %v551_v54 = vpop.f32.mrf.mxu0  ;;  %v571_v55 = vpop.f32.mrf.mxu1 }
  0xba   : > { %1139 = vst [vmem:[%s1426_s23] sm:$0xff] %v1138_v46   ;;  %v731_v62 = vmul.f32 %v1404_v26, %v551_v54  ;;  %v739_v63 = vmul.f32 %v1404_v26, %v571_v55 }
  0xbb   : > { %1218 = vst [vmem:[%s1426_s23 + $0x20] sm:$0xff] %v1158_v47   ;;  %v782_v56 = vadd.f32 %v1410_v28, %v746_v52  ;;  %v790_v57 = vadd.f32 %v1410_v28, %v754_v53 }
  0xbc   : > { %v767_v6 = vadd.f32 %v1410_v28, %v731_v62  ;;  %v775_v7 = vadd.f32 %v1410_v28, %v739_v63 }
  0xbd   : > { %v814_v60 = vmax.f32 %v782_v56, 0.0  ;;  %v822_v61 = vmax.f32 %v790_v57, 0.0 }
  0xbe   : > { %v799_v14 = vmax.f32 %v767_v6, 0.0  ;;  %v807_v15 = vmax.f32 %v775_v7, 0.0 }
  0xbf   : > { %v1178_v0 = vpack.c.bf16 %v814_v60, %v813_v58  ;;  %v1198_v1 = vpack.c.bf16 %v822_v61, %v821_v59 }
  0xc0   : > { %v591_v2 = vpop.f32.mrf.mxu2  ;;  %v611_v3 = vpop.f32.mrf.mxu3 }
  0xc1   : > { %1222 = vst [vmem:[%s1426_s23 + $0x40] sm:$0xff] %v1178_v0   ;;  %v553_v4 = vpop.f32.mrf.mxu0  ;;  %v573_v5 = vpop.f32.mrf.mxu1  ;;  %v747_v12 = vmul.f32 %v1404_v26, %v591_v2  ;;  %v755_v13 = vmul.f32 %v1404_v26, %v611_v3 }
  0xc2   : > { %1226 = vst [vmem:[%s1426_s23 + $0x60] sm:$0xff] %v1198_v1   ;;  %v732_v8 = vmul.f32 %v1404_v26, %v553_v4  ;;  %v740_v9 = vmul.f32 %v1404_v26, %v573_v5 }
  0xc3   : > { %v783_v22 = vadd.f32 %v1410_v28, %v747_v12  ;;  %v791_v23 = vadd.f32 %v1410_v28, %v755_v13 }
  0xc4   : > { %v768_v10 = vadd.f32 %v1410_v28, %v732_v8  ;;  %v776_v11 = vadd.f32 %v1410_v28, %v740_v9 }
  0xc5   : > { %v815_v32 = vmax.f32 %v783_v22, 0.0  ;;  %v823_v33 = vmax.f32 %v791_v23, 0.0 }
  0xc6   : > { %v800_v16 = vmax.f32 %v768_v10, 0.0  ;;  %v808_v17 = vmax.f32 %v776_v11, 0.0 }
  0xc8   : > { %v1143_v18 = vpack.c.bf16 %v800_v16, %v799_v14  ;;  %v1163_v19 = vpack.c.bf16 %v808_v17, %v807_v15  ;;  %v593_v20 = vpop.f32.mrf.mxu2  ;;  %v613_v21 = vpop.f32.mrf.mxu3 }
  0xc9   : > { %v748_v24 = vmul.f32 %v1404_v26, %v593_v20  ;;  %v756_v25 = vmul.f32 %v1404_v26, %v613_v21  ;;  %v556_v27 = vpop.f32.mrf.mxu0  ;;  %v576_v29 = vpop.f32.mrf.mxu1 }
  0xca   : > { %1215 = vst [vmem:[%s1426_s23 + $0x8] sm:$0xff] %v1143_v18   ;;  %v733_v36 = vmul.f32 %v1404_v26, %v556_v27  ;;  %v741_v37 = vmul.f32 %v1404_v26, %v576_v29 }
  0xcb   : > { %1219 = vst [vmem:[%s1426_s23 + $0x28] sm:$0xff] %v1163_v19   ;;  %v784_v30 = vadd.f32 %v1410_v28, %v748_v24  ;;  %v792_v31 = vadd.f32 %v1410_v28, %v756_v25 }
  0xcc   : > { %v769_v44 = vadd.f32 %v1410_v28, %v733_v36  ;;  %v777_v45 = vadd.f32 %v1410_v28, %v741_v37 }
  0xcd   : > { %v816_v34 = vmax.f32 %v784_v30, 0.0  ;;  %v824_v35 = vmax.f32 %v792_v31, 0.0 }
  0xce   : > { %v801_v52 = vmax.f32 %v769_v44, 0.0  ;;  %v809_v53 = vmax.f32 %v777_v45, 0.0 }
  0xcf   : > { %v1183_v38 = vpack.c.bf16 %v816_v34, %v815_v32  ;;  %v1203_v39 = vpack.c.bf16 %v824_v35, %v823_v33 }
  0xd0   : > { %v596_v40 = vpop.f32.mrf.mxu2  ;;  %v616_v41 = vpop.f32.mrf.mxu3 }
  0xd1   : > { %1223 = vst [vmem:[%s1426_s23 + $0x48] sm:$0xff] %v1183_v38   ;;  %v558_v42 = vpop.f32.mrf.mxu0  ;;  %v578_v43 = vpop.f32.mrf.mxu1  ;;  %v749_v50 = vmul.f32 %v1404_v26, %v596_v40  ;;  %v757_v51 = vmul.f32 %v1404_v26, %v616_v41 }
  0xd2   : > { %1227 = vst [vmem:[%s1426_s23 + $0x68] sm:$0xff] %v1203_v39   ;;  %v734_v46 = vmul.f32 %v1404_v26, %v558_v42  ;;  %v742_v47 = vmul.f32 %v1404_v26, %v578_v43 }
  0xd3   : > { %v785_v60 = vadd.f32 %v1410_v28, %v749_v50  ;;  %v793_v61 = vadd.f32 %v1410_v28, %v757_v51 }
  0xd4   : > { %v770_v48 = vadd.f32 %v1410_v28, %v734_v46  ;;  %v778_v49 = vadd.f32 %v1410_v28, %v742_v47 }
  0xd5   : > { %v817_v4 = vmax.f32 %v785_v60, 0.0  ;;  %v825_v5 = vmax.f32 %v793_v61, 0.0 }
  0xd6   : > { %v802_v54 = vmax.f32 %v770_v48, 0.0  ;;  %v810_v55 = vmax.f32 %v778_v49, 0.0 }
  0xd8   : > { %v1148_v56 = vpack.c.bf16 %v802_v54, %v801_v52  ;;  %v1168_v57 = vpack.c.bf16 %v810_v55, %v809_v53  ;;  %v598_v58 = vpop.f32.mrf.mxu2  ;;  %v618_v59 = vpop.f32.mrf.mxu3 }
  0xd9   : > { %v750_v62 = vmul.f32 %v1404_v26, %v598_v58  ;;  %v758_v63 = vmul.f32 %v1404_v26, %v618_v59  ;;  %v561_v0 = vpop.f32.mrf.mxu0  ;;  %v581_v1 = vpop.f32.mrf.mxu1 }
  0xda   : > { %1216 = vst [vmem:[%s1426_s23 + $0x10] sm:$0xff] %v1148_v56   ;;  %v735_v8 = vmul.f32 %v1404_v26, %v561_v0  ;;  %v743_v9 = vmul.f32 %v1404_v26, %v581_v1 }
  0xdb   : > { %1220 = vst [vmem:[%s1426_s23 + $0x30] sm:$0xff] %v1168_v57   ;;  %v786_v2 = vadd.f32 %v1410_v28, %v750_v62  ;;  %v794_v3 = vadd.f32 %v1410_v28, %v758_v63 }
  0xdc   : > { %v771_v16 = vadd.f32 %v1410_v28, %v735_v8  ;;  %v779_v17 = vadd.f32 %v1410_v28, %v743_v9 }
  0xdd   : > { %v818_v6 = vmax.f32 %v786_v2, 0.0  ;;  %v826_v7 = vmax.f32 %v794_v3, 0.0 }
  0xde   : > { %v803_v24 = vmax.f32 %v771_v16, 0.0  ;;  %v811_v25 = vmax.f32 %v779_v17, 0.0 }
  0xdf   : > { %v1188_v10 = vpack.c.bf16 %v818_v6, %v817_v4  ;;  %v1208_v11 = vpack.c.bf16 %v826_v7, %v825_v5 }
  0xe0   : > { %v601_v12 = vpop.f32.mrf.mxu2  ;;  %v621_v13 = vpop.f32.mrf.mxu3 }
  0xe1   : > { %1224 = vst [vmem:[%s1426_s23 + $0x50] sm:$0xff] %v1188_v10   ;;  %v563_v14 = vpop.f32.mrf.mxu0  ;;  %v583_v15 = vpop.f32.mrf.mxu1  ;;  %v751_v22 = vmul.f32 %v1404_v26, %v601_v12  ;;  %v759_v23 = vmul.f32 %v1404_v26, %v621_v13 }
  0xe2   : > { %1228 = vst [vmem:[%s1426_s23 + $0x70] sm:$0xff] %v1208_v11   ;;  %v736_v18 = vmul.f32 %v1404_v26, %v563_v14  ;;  %v744_v19 = vmul.f32 %v1404_v26, %v583_v15 }
  0xe3   : > { %v787_v34 = vadd.f32 %v1410_v28, %v751_v22  ;;  %v795_v35 = vadd.f32 %v1410_v28, %v759_v23 }
  0xe4   : > { %v772_v20 = vadd.f32 %v1410_v28, %v736_v18  ;;  %v780_v21 = vadd.f32 %v1410_v28, %v744_v19 }
  0xe5   : > { %v819_v40 = vmax.f32 %v787_v34, 0.0  ;;  %v827_v41 = vmax.f32 %v795_v35, 0.0 }
  0xe6   : > { %v804_v27 = vmax.f32 %v772_v20, 0.0  ;;  %v812_v29 = vmax.f32 %v780_v21, 0.0 }
  0xe8   : > { %v1153_v30 = vpack.c.bf16 %v804_v27, %v803_v24  ;;  %v1173_v31 = vpack.c.bf16 %v812_v29, %v811_v25  ;;  %v603_v32 = vpop.f32.mrf.mxu2  ;;  %v623_v33 = vpop.f32.mrf.mxu3 }
  0xe9   : > { %v752_v36 = vmul.f32 %v1404_v26, %v603_v32  ;;  %v760_v37 = vmul.f32 %v1404_v26, %v623_v33 }
  0xea   : > { %1217 = vst [vmem:[%s1426_s23 + $0x18] sm:$0xff] %v1153_v30  }
  0xeb   : > { %1221 = vst [vmem:[%s1426_s23 + $0x38] sm:$0xff] %v1173_v31   ;;  %v788_v38 = vadd.f32 %v1410_v28, %v752_v36  ;;  %v796_v39 = vadd.f32 %v1410_v28, %v760_v37 }
  0xed   : > { %v820_v42 = vmax.f32 %v788_v38, 0.0  ;;  %v828_v43 = vmax.f32 %v796_v39, 0.0 }
  0xef   : > { %v1193_v44 = vpack.c.bf16 %v820_v42, %v819_v40  ;;  %v1213_v45 = vpack.c.bf16 %v828_v43, %v827_v41 }
  0xf1   : > { %1225 = vst [vmem:[%s1426_s23 + $0x58] sm:$0xff] %v1193_v44  }
  0xf2   : > { %1229 = vst [vmem:[%s1426_s23 + $0x78] sm:$0xff] %v1213_v45  }
  0xf3 PF: > { %s14_s17 = sadd.s32 1, %s1302_s17   ;;  %s1512_s15 = smov %s1298_s16 }
  0xf4   : > { %p11_p5 = scmp.ge.s32.totalorder %s14_s17, 4   ;;  %s1513_s16 = smov %s1515_s18 }
  0xf6   :  { %13 = sbr.rel (!%p11_p5) target bundleno = 2 (0x2), region = 77 }

// kernel: a_unet_forward.25
= control target key start
LH: loop header
LB: loop body
LE: loop exit
PB: predicated region body
PF: predicated region fallthrough
CT: control target
= control target key end

     0   :  { %s526_s15 = smov 0   ;;  %s528_s16 = smov 0   ;;  %s565_s0 = inlined_call_operand.vmem [shape: bf16[2,8,64], index: 0, kind: input, shape index: {}]   ;;  %s566_s1 = inlined_call_operand.vmem [shape: bf16[2,8,64], index: 1, kind: input, shape index: {}]   ;;  %s567_s2 = inlined_call_operand.vmem [shape: bf16[2,8,64], index: 2, kind: input, shape index: {}]   ;;  %s568_s3 = inlined_call_operand.vmem [shape: bf16[2,8,64], index: 3, kind: input, shape index: {}]   ;;  %s569_s4 = inlined_call_operand.vmem [shape: bf16[2,8,64], index: 4, kind: output, shape index: {}]  }
   0x1   :  { %s530_s17 = smov 0  }
   0x2 LB: > { %s26_s18 = sadd.s32 1, %s495_s16  ;;  %p445_p0 = scmp.ge.s32.totalorder %s499_s17, 1  ;;  %s499_s17 = sphi %s530_s17, %s14_s17   ;;  %s495_s16 = sphi %s528_s16, %s571_s16   ;;  %s491_s15 = sphi %s526_s15, %s570_s15  }
   0x3   : > { %p28_p1 = scmp.ge.s32.totalorder %s26_s18, 2  ;;  %p222_p2 = scmp.lt.s32.totalorder %s499_s17, 3 }
   0x5   : > { %s573_s18 = smov (%p28_p1, %s26_s18), 0  ;;  %p223_p3 = pnand %p445_p0, %p222_p2 }
   0x6   : > { %p273_p4 = scmp.lt.s32.totalorder (!%p223_p3), %s491_s15, 1 }
   0x7   : > { %226 = sbr.rel (%p223_p3) target bundleno = 28 (0x1c), region = 36 }
   0xc   : > { %s575_s15 = smov (!%p273_p4, %s491_s15), 1  ;;  %vm320_vm0 = vcmask 519168  }
   0xd   : > { %s446_s19 = sshll.u32 %s575_s15, 2 }
   0xe   : > { %s279_s22 = scalar_lea.vmem %s565_s0, %s446_s19  ;;  %s286_s25 = scalar_lea.vmem %s566_s1, %s446_s19 }
   0xf   : > { %s293_s28 = scalar_lea.vmem %s567_s2, %s446_s19  ;;  %s300_s5 = scalar_lea.vmem %s568_s3, %s446_s19  ;;  %v308_v0 = vld [vmem:[%s279_s22] sm:$0xf] }
  0x10   : > { %v310_v1 = vld [vmem:[%s286_s25] sm:$0xf]  ;;  %v309_v2 = vunpack.c.l.bf16 %v308_v0  ;;  %s307_s8 = scalar_lea.vmem %s569_s4, %s446_s19 }
  0x11   : > { %v311_v3 = vunpack.c.l.bf16 %v310_v1  ;;  %v312_v4 = vld [vmem:[%s293_s28] sm:$0xf] }
  0x12   : > { %v314_v5 = vld [vmem:[%s300_s5] sm:$0xf]  ;;  %v313_v6 = vunpack.c.l.bf16 %v312_v4 }
  0x13   : > { %v315_v7 = vunpack.c.l.bf16 %v314_v5  ;;  %v316_v8 = vmax.f32 %v309_v2, %v311_v3 }
  0x15   : > { %v317_v9 = vmax.f32 %v313_v6, %v315_v7 }
  0x17   : > { %v318_v10 = vmax.f32 %v316_v8, %v317_v9 }
  0x19   : > { %v319_v11 = vpack.c.bf16 %v318_v10, %v318_v10 }
  0x1b   : > { %321 = vst.msk [vmem:[%s307_s8] sm:$0xf] %vm320_vm0, %v319_v11 }
  0x1c PF: > { %s14_s17 = sadd.s32 1, %s499_s17   ;;  %s570_s15 = smov %s495_s16 }
  0x1d   : > { %p11_p5 = scmp.ge.s32.totalorder %s14_s17, 4   ;;  %s571_s16 = smov %s573_s18 }
  0x1f   :  { %13 = sbr.rel (!%p11_p5) target bundleno = 2 (0x2), region = 75 }

// kernel: a_unet_forward.26
= control target key start
LH: loop header
LB: loop body
LE: loop exit
PB: predicated region body
PF: predicated region fallthrough
CT: control target
= control target key end

     0   :  { %s801_s15 = smov 0   ;;  %s803_s16 = smov 0   ;;  %s875_s0 = inlined_call_operand.vmem [shape: bf16[2,64,128], index: 0, kind: input, shape index: {}]   ;;  %s876_s1 = inlined_call_operand.vmem [shape: bf16[128,128], index: 1, kind: input, shape index: {}]   ;;  %s877_s2 = inlined_call_operand.vmem [shape: f32[1,128], index: 2, kind: input, shape index: {}]   ;;  %s878_s3 = inlined_call_operand.vmem [shape: f32[1,128], index: 3, kind: input, shape index: {}]   ;;  %s879_s4 = inlined_call_operand.vmem [shape: bf16[2,64,128], index: 4, kind: output, shape index: {}]  }
   0x1   :  { %s805_s17 = smov 0  }
   0x2 LB: > { %s33_s18 = sadd.s32 1, %s770_s16  ;;  %p610_p0 = scmp.ge.s32.totalorder %s774_s17, 1  ;;  %s774_s17 = sphi %s805_s17, %s14_s17   ;;  %s770_s16 = sphi %s803_s16, %s881_s16   ;;  %s766_s15 = sphi %s801_s15, %s880_s15  }
   0x3   : > { %p35_p1 = scmp.ge.s32.totalorder %s33_s18, 2  ;;  %p206_p2 = scmp.lt.s32.totalorder %s774_s17, 3 }
   0x5   : > { %s883_s18 = smov (%p35_p1, %s33_s18), 0  ;;  %p207_p3 = pnand %p610_p0, %p206_p2 }
   0x6   : > { %p249_p4 = scmp.lt.s32.totalorder (!%p207_p3), %s766_s15, 1 }
   0x7   : > { %210 = sbr.rel (%p207_p3) target bundleno = 195 (0xc3), region = 36 }
   0xc   : > { %v678_v0 = vld [vmem:[%s876_s1 + $0x38] sm:$0xff]  ;;  %v677_v1 = vld [vmem:[%s876_s1 + $0x30] sm:$0xff]  ;;  %v676_v2 = vld [vmem:[%s876_s1 + $0x28] sm:$0xff]  ;;  %s885_s15 = smov (!%p249_p4, %s766_s15), 1 }
   0xd   : > { %393 = vmatpush.bf16.msra.mxu0 %v678_v0  ;;  %702 = vmatpush.bf16.msra.mxu1 %v678_v0  ;;  %v675_v3 = vld [vmem:[%s876_s1 + $0x20] sm:$0xff]  ;;  %v674_v4 = vld [vmem:[%s876_s1 + $0x18] sm:$0xff]  ;;  %v673_v5 = vld [vmem:[%s876_s1 + $0x10] sm:$0xff]  ;;  %s665_s7 = sshll.u32 %s885_s15, 5 }
   0xe   : > { %703 = vmatpush.bf16.msra.mxu2 %v678_v0  ;;  %704 = vmatpush.bf16.msra.mxu3 %v678_v0  ;;  %v672_v6 = vld [vmem:[%s876_s1 + $0x8] sm:$0xff]  ;;  %v671_v7 = vld [vmem:[%s876_s1] sm:$0xff]  ;;  %s259_s12 = scalar_lea.vmem %s875_s0, %s665_s7  ;;  %s275_s23 = scalar_lea.vmem %s879_s4, %s665_s7 }
   0xf   : > { %v667_v8 = vld [vmem:[%s259_s12] sm:$0xff]  ;;  %v668_v9 = vld [vmem:[%s259_s12 + $0x8] sm:$0xff]  ;;  %v669_v10 = vld [vmem:[%s259_s12 + $0x10] sm:$0xff] }
  0x10   : > { %v670_v11 = vld [vmem:[%s259_s12 + $0x18] sm:$0xff]  ;;  %v750_v14 = vld [vmem:[%s877_s2] ss:$0 sm:$0xff] }
  0x11   : > { %394 = vmatpush.bf16.msra.mxu0 %v677_v1  ;;  %705 = vmatpush.bf16.msra.mxu1 %v677_v1  ;;  %v751_v16 = vld [vmem:[%s878_s3] ss:$0 sm:$0xff] }
  0x12   : > { %706 = vmatpush.bf16.msra.mxu2 %v677_v1  ;;  %707 = vmatpush.bf16.msra.mxu3 %v677_v1 }
  0x15   : > { %395 = vmatpush.bf16.msra.mxu0 %v676_v2  ;;  %708 = vmatpush.bf16.msra.mxu1 %v676_v2 }
  0x16   : > { %709 = vmatpush.bf16.msra.mxu2 %v676_v2  ;;  %710 = vmatpush.bf16.msra.mxu3 %v676_v2 }
  0x19   : > { %396 = vmatpush.bf16.msra.mxu0 %v675_v3  ;;  %711 = vmatpush.bf16.msra.mxu1 %v675_v3 }
  0x1a   : > { %712 = vmatpush.bf16.msra.mxu2 %v675_v3  ;;  %713 = vmatpush.bf16.msra.mxu3 %v675_v3 }
  0x1d   : > { %397 = vmatpush.bf16.msra.mxu0 %v674_v4  ;;  %714 = vmatpush.bf16.msra.mxu1 %v674_v4 }
  0x1e   : > { %715 = vmatpush.bf16.msra.mxu2 %v674_v4  ;;  %716 = vmatpush.bf16.msra.mxu3 %v674_v4 }
  0x21   : > { %398 = vmatpush.bf16.msra.mxu0 %v673_v5  ;;  %717 = vmatpush.bf16.msra.mxu1 %v673_v5 }
  0x22   : > { %718 = vmatpush.bf16.msra.mxu2 %v673_v5  ;;  %719 = vmatpush.bf16.msra.mxu3 %v673_v5 }
  0x25   : > { %399 = vmatpush.bf16.msra.mxu0 %v672_v6  ;;  %720 = vmatpush.bf16.msra.mxu1 %v672_v6 }
  0x26   : > { %721 = vmatpush.bf16.msra.mxu2 %v672_v6  ;;  %722 = vmatpush.bf16.msra.mxu3 %v672_v6 }
  0x29   : > { %400 = vmatpush.bf16.msra.mxu0 %v671_v7  ;;  %723 = vmatpush.bf16.msra.mxu1 %v671_v7 }
  0x2a   : > { %724 = vmatpush.bf16.msra.mxu2 %v671_v7  ;;  %725 = vmatpush.bf16.msra.mxu3 %v671_v7 }
  0x2c   : > { %401 = vmatmul.bf16.vlgmr.msra.gmra.mxu0 %v667_v8  ;;  %406 = vmatmul.bf16.vlgmr.msra.gmra.mxu1 %v668_v9 }
  0x2d   : > { %411 = vmatmul.bf16.vlgmr.msra.gmra.mxu2 %v669_v10  ;;  %416 = vmatmul.bf16.vlgmr.msra.gmra.mxu3 %v670_v11 }
  0xa9   : > { %v402_v12 = vpop.f32.mrf.mxu0  ;;  %v407_v13 = vpop.f32.mrf.mxu1 }
  0xaa   : > { %v453_v15 = vmul.f32 %v750_v14, %v402_v12  ;;  %v455_v17 = vmul.f32 %v750_v14, %v407_v13 }
  0xac   : > { %v465_v22 = vadd.f32 %v751_v16, %v453_v15  ;;  %v467_v23 = vadd.f32 %v751_v16, %v455_v17 }
  0xae   : > { %v473_v30 = vmax.f32 %v465_v22, 0.0  ;;  %v475_v31 = vmax.f32 %v467_v23, 0.0 }
  0xb0   : > { %v412_v18 = vpop.f32.mrf.mxu2  ;;  %v417_v19 = vpop.f32.mrf.mxu3 }
  0xb1   : > { %v404_v20 = vpop.f32.mrf.mxu0  ;;  %v409_v21 = vpop.f32.mrf.mxu1  ;;  %v457_v28 = vmul.f32 %v750_v14, %v412_v18  ;;  %v459_v29 = vmul.f32 %v750_v14, %v417_v19 }
  0xb2   : > { %v454_v24 = vmul.f32 %v750_v14, %v404_v20  ;;  %v456_v25 = vmul.f32 %v750_v14, %v409_v21 }
  0xb3   : > { %v469_v38 = vadd.f32 %v751_v16, %v457_v28  ;;  %v471_v39 = vadd.f32 %v751_v16, %v459_v29 }
  0xb4   : > { %v466_v26 = vadd.f32 %v751_v16, %v454_v24  ;;  %v468_v27 = vadd.f32 %v751_v16, %v456_v25 }
  0xb5   : > { %v477_v44 = vmax.f32 %v469_v38, 0.0  ;;  %v479_v45 = vmax.f32 %v471_v39, 0.0 }
  0xb6   : > { %v474_v32 = vmax.f32 %v466_v26, 0.0  ;;  %v476_v33 = vmax.f32 %v468_v27, 0.0 }
  0xb8   : > { %v682_v34 = vpack.c.bf16 %v474_v32, %v473_v30  ;;  %v687_v35 = vpack.c.bf16 %v476_v33, %v475_v31  ;;  %v414_v36 = vpop.f32.mrf.mxu2  ;;  %v419_v37 = vpop.f32.mrf.mxu3 }
  0xb9   : > { %v458_v40 = vmul.f32 %v750_v14, %v414_v36  ;;  %v460_v41 = vmul.f32 %v750_v14, %v419_v37 }
  0xba   : > { %683 = vst [vmem:[%s275_s23] sm:$0xff] %v682_v34  }
  0xbb   : > { %699 = vst [vmem:[%s275_s23 + $0x8] sm:$0xff] %v687_v35   ;;  %v470_v42 = vadd.f32 %v751_v16, %v458_v40  ;;  %v472_v43 = vadd.f32 %v751_v16, %v460_v41 }
  0xbd   : > { %v478_v46 = vmax.f32 %v470_v42, 0.0  ;;  %v480_v47 = vmax.f32 %v472_v43, 0.0 }
  0xbf   : > { %v692_v48 = vpack.c.bf16 %v478_v46, %v477_v44  ;;  %v697_v49 = vpack.c.bf16 %v480_v47, %v479_v45 }
  0xc1   : > { %700 = vst [vmem:[%s275_s23 + $0x10] sm:$0xff] %v692_v48  }
  0xc2   : > { %701 = vst [vmem:[%s275_s23 + $0x18] sm:$0xff] %v697_v49  }
  0xc3 PF: > { %s14_s17 = sadd.s32 1, %s774_s17   ;;  %s880_s15 = smov %s770_s16 }
  0xc4   : > { %p11_p5 = scmp.ge.s32.totalorder %s14_s17, 4   ;;  %s881_s16 = smov %s883_s18 }
  0xc6   :  { %13 = sbr.rel (!%p11_p5) target bundleno = 2 (0x2), region = 77 }

// kernel: a_unet_forward.27
= control target key start
LH: loop header
LB: loop body
LE: loop exit
PB: predicated region body
PF: predicated region fallthrough
CT: control target
= control target key end

     0   :  { %s973_s15 = smov 0   ;;  %s975_s16 = smov 0   ;;  %s1092_s0 = inlined_call_operand.vmem [shape: bf16[2,64,256], index: 0, kind: input, shape index: {}]   ;;  %s1093_s1 = inlined_call_operand.vmem [shape: bf16[256,128], index: 1, kind: input, shape index: {}]   ;;  %s1094_s2 = inlined_call_operand.vmem [shape: f32[1,128], index: 2, kind: input, shape index: {}]   ;;  %s1095_s3 = inlined_call_operand.vmem [shape: f32[1,128], index: 3, kind: input, shape index: {}]   ;;  %s1096_s4 = inlined_call_operand.vmem [shape: bf16[2,64,128], index: 4, kind: output, shape index: {}]  }
   0x1   :  { %s977_s17 = smov 0  }
   0x2 LB: > { %s33_s18 = sadd.s32 1, %s942_s16  ;;  %p730_p0 = scmp.ge.s32.totalorder %s946_s17, 1  ;;  %s946_s17 = sphi %s977_s17, %s14_s17   ;;  %s942_s16 = sphi %s975_s16, %s1098_s16   ;;  %s938_s15 = sphi %s973_s15, %s1097_s15  }
   0x3   : > { %p35_p1 = scmp.ge.s32.totalorder %s33_s18, 2  ;;  %p209_p2 = scmp.lt.s32.totalorder %s946_s17, 3 }
   0x5   : > { %s1100_s18 = smov (%p35_p1, %s33_s18), 0  ;;  %p210_p3 = pnand %p730_p0, %p209_p2 }
   0x6   : > { %p255_p4 = scmp.lt.s32.totalorder (!%p210_p3), %s938_s15, 1 }
   0x7   : > { %213 = sbr.rel (%p210_p3) target bundleno = 212 (0xd4), region = 36 }
   0xc   : > { %v850_v0 = vld [vmem:[%s1093_s1 + $0x38] sm:$0xff]  ;;  %v849_v2 = vld [vmem:[%s1093_s1 + $0x30] sm:$0xff]  ;;  %v848_v4 = vld [vmem:[%s1093_s1 + $0x28] sm:$0xff]  ;;  %s1102_s15 = smov (!%p255_p4, %s938_s15), 1 }
   0xd   : > { %v858_v1 = vld [vmem:[%s1093_s1 + $0x78] sm:$0xff]  ;;  %481 = vmatpush.bf16.msra.mxu0 %v850_v0  ;;  %882 = vmatpush.bf16.msra.mxu2 %v850_v0  ;;  %v857_v3 = vld [vmem:[%s1093_s1 + $0x70] sm:$0xff]  ;;  %v856_v5 = vld [vmem:[%s1093_s1 + $0x68] sm:$0xff]  ;;  %s833_s21 = sshll.u32 %s1102_s15, 6  ;;  %s834_s11 = sshll.u32 %s1102_s15, 5 }
   0xe   : > { %510 = vmatpush.bf16.msra.mxu1 %v858_v1  ;;  %890 = vmatpush.bf16.msra.mxu3 %v858_v1  ;;  %v847_v6 = vld [vmem:[%s1093_s1 + $0x20] sm:$0xff]  ;;  %v846_v8 = vld [vmem:[%s1093_s1 + $0x18] sm:$0xff]  ;;  %v845_v10 = vld [vmem:[%s1093_s1 + $0x10] sm:$0xff]  ;;  %s1040_s26 = scalar_lea.vmem %s1092_s0, %s833_s21  ;;  %s1077_s14 = scalar_lea.vmem %s1096_s4, %s834_s11 }
   0xf   : > { %v855_v7 = vld [vmem:[%s1093_s1 + $0x60] sm:$0xff]  ;;  %v854_v9 = vld [vmem:[%s1093_s1 + $0x58] sm:$0xff]  ;;  %v853_v11 = vld [vmem:[%s1093_s1 + $0x50] sm:$0xff] }
  0x10   : > { %v844_v12 = vld [vmem:[%s1093_s1 + $0x8] sm:$0xff]  ;;  %v843_v14 = vld [vmem:[%s1093_s1] sm:$0xff]  ;;  %v745_v28 = vld [vmem:[%s1040_s26 + $0x10] sm:$0xf] }
  0x11   : > { %482 = vmatpush.bf16.msra.mxu0 %v849_v2  ;;  %883 = vmatpush.bf16.msra.mxu2 %v849_v2  ;;  %v852_v13 = vld [vmem:[%s1093_s1 + $0x48] sm:$0xff]  ;;  %v851_v15 = vld [vmem:[%s1093_s1 + $0x40] sm:$0xff]  ;;  %v838_v29 = vld [vmem:[%s1040_s26 + $0x14] sm:$0xf0] }
  0x12   : > { %511 = vmatpush.bf16.msra.mxu1 %v857_v3  ;;  %891 = vmatpush.bf16.msra.mxu3 %v857_v3  ;;  %v737_v16 = vld [vmem:[%s1040_s26] sm:$0xf]  ;;  %v836_v17 = vld [vmem:[%s1040_s26 + $0x4] sm:$0xf0]  ;;  %v835_v20 = vld [vmem:[%s1040_s26 + $0x4] sm:$0xf]  ;;  %v746_v36 = vor.u32 %v838_v29, %v745_v28 }
  0x13   : > { %v753_v18 = vld [vmem:[%s1040_s26 + $0x20] sm:$0xf]  ;;  %v840_v19 = vld [vmem:[%s1040_s26 + $0x24] sm:$0xf0]  ;;  %v739_v21 = vld [vmem:[%s1040_s26 + $0x8] sm:$0xf0]  ;;  %v738_v24 = vor.u32 %v836_v17, %v737_v16 }
  0x14   : > { %v839_v22 = vld [vmem:[%s1040_s26 + $0x24] sm:$0xf]  ;;  %v755_v23 = vld [vmem:[%s1040_s26 + $0x28] sm:$0xf0]  ;;  %v754_v25 = vor.u32 %v840_v19, %v753_v18  ;;  %v742_v26 = vor.u32 %v835_v20, %v739_v21  ;;  %v761_v30 = vld [vmem:[%s1040_s26 + $0x30] sm:$0xf] }
  0x15   : > { %483 = vmatpush.bf16.msra.mxu0 %v848_v4  ;;  %884 = vmatpush.bf16.msra.mxu2 %v848_v4  ;;  %v758_v27 = vor.u32 %v839_v22, %v755_v23  ;;  %v842_v31 = vld [vmem:[%s1040_s26 + $0x34] sm:$0xf0]  ;;  %v837_v32 = vld [vmem:[%s1040_s26 + $0x14] sm:$0xf]  ;;  %v747_v33 = vld [vmem:[%s1040_s26 + $0x18] sm:$0xf0] }
  0x16   : > { %512 = vmatpush.bf16.msra.mxu1 %v856_v5  ;;  %892 = vmatpush.bf16.msra.mxu3 %v856_v5  ;;  %v841_v34 = vld [vmem:[%s1040_s26 + $0x34] sm:$0xf]  ;;  %v763_v35 = vld [vmem:[%s1040_s26 + $0x38] sm:$0xf0]  ;;  %v762_v37 = vor.u32 %v842_v31, %v761_v30  ;;  %v750_v38 = vor.u32 %v837_v32, %v747_v33  ;;  %v922_v43 = vld [vmem:[%s1094_s2] ss:$0 sm:$0xff] }
  0x17   : > { %v766_v39 = vor.u32 %v841_v34, %v763_v35  ;;  %v923_v47 = vld [vmem:[%s1095_s3] ss:$0 sm:$0xff] }
  0x19   : > { %484 = vmatpush.bf16.msra.mxu0 %v847_v6  ;;  %885 = vmatpush.bf16.msra.mxu2 %v847_v6 }
  0x1a   : > { %513 = vmatpush.bf16.msra.mxu1 %v855_v7  ;;  %893 = vmatpush.bf16.msra.mxu3 %v855_v7 }
  0x1d   : > { %485 = vmatpush.bf16.msra.mxu0 %v846_v8  ;;  %886 = vmatpush.bf16.msra.mxu2 %v846_v8 }
  0x1e   : > { %514 = vmatpush.bf16.msra.mxu1 %v854_v9  ;;  %894 = vmatpush.bf16.msra.mxu3 %v854_v9 }
  0x21   : > { %486 = vmatpush.bf16.msra.mxu0 %v845_v10  ;;  %887 = vmatpush.bf16.msra.mxu2 %v845_v10 }
  0x22   : > { %515 = vmatpush.bf16.msra.mxu1 %v853_v11  ;;  %895 = vmatpush.bf16.msra.mxu3 %v853_v11 }
  0x25   : > { %487 = vmatpush.bf16.msra.mxu0 %v844_v12  ;;  %888 = vmatpush.bf16.msra.mxu2 %v844_v12 }
  0x26   : > { %516 = vmatpush.bf16.msra.mxu1 %v852_v13  ;;  %896 = vmatpush.bf16.msra.mxu3 %v852_v13 }
  0x29   : > { %488 = vmatpush.bf16.msra.mxu0 %v843_v14  ;;  %889 = vmatpush.bf16.msra.mxu2 %v843_v14 }
  0x2a   : > { %517 = vmatpush.bf16.msra.mxu1 %v851_v15  ;;  %897 = vmatpush.bf16.msra.mxu3 %v851_v15 }
  0x2c   : > { %489 = vmatmul.bf16.vlgmr.msra.gmra.mxu0 %v738_v24  ;;  %499 = vmatmul.bf16.vlgmr.msra.gmra.mxu2 %v754_v25 }
  0x2d   : > { %518 = vmatmul.bf16.vlgmr.msra.gmra.mxu1 %v742_v26  ;;  %528 = vmatmul.bf16.vlgmr.msra.gmra.mxu3 %v758_v27 }
  0x3c   : > { %494 = vmatmul.bf16.gmra.mxu0 %v746_v36  ;;  %504 = vmatmul.bf16.gmra.mxu2 %v762_v37 }
  0x3d   : > { %523 = vmatmul.bf16.gmra.mxu1 %v750_v38  ;;  %533 = vmatmul.bf16.gmra.mxu3 %v766_v39 }
  0xa9   : > { %v490_v40 = vpop.f32.mrf.mxu0 }
  0xaa   : > { %v519_v41 = vpop.f32.mrf.mxu1 }
  0xab   : > { %v520_v42 = vadd.f32 %v519_v41, %v490_v40 }
  0xad   : > { %v570_v46 = vmul.f32 %v922_v43, %v520_v42 }
  0xaf   : > { %v500_v44 = vpop.f32.mrf.mxu2  ;;  %v582_v52 = vadd.f32 %v923_v47, %v570_v46 }
  0xb0   : > { %v529_v45 = vpop.f32.mrf.mxu3 }
  0xb1   : > { %v492_v48 = vpop.f32.mrf.mxu0  ;;  %v530_v50 = vadd.f32 %v529_v45, %v500_v44  ;;  %v590_v58 = vmax.f32 %v582_v52, 0.0 }
  0xb2   : > { %v521_v49 = vpop.f32.mrf.mxu1 }
  0xb3   : > { %v522_v51 = vadd.f32 %v521_v49, %v492_v48  ;;  %v574_v54 = vmul.f32 %v922_v43, %v530_v50 }
  0xb5   : > { %v571_v53 = vmul.f32 %v922_v43, %v522_v51  ;;  %v586_v63 = vadd.f32 %v923_v47, %v574_v54 }
  0xb7   : > { %v583_v55 = vadd.f32 %v923_v47, %v571_v53  ;;  %v502_v56 = vpop.f32.mrf.mxu2  ;;  %v594_v4 = vmax.f32 %v586_v63, 0.0 }
  0xb8   : > { %v531_v57 = vpop.f32.mrf.mxu3 }
  0xb9   : > { %v591_v59 = vmax.f32 %v583_v55, 0.0  ;;  %v532_v60 = vadd.f32 %v531_v57, %v502_v56  ;;  %v495_v61 = vpop.f32.mrf.mxu0 }
  0xba   : > { %v524_v62 = vpop.f32.mrf.mxu1 }
  0xbb   : > { %v862_v0 = vpack.c.bf16 %v591_v59, %v590_v58  ;;  %v575_v1 = vmul.f32 %v922_v43, %v532_v60  ;;  %v525_v3 = vadd.f32 %v524_v62, %v495_v61 }
  0xbd   : > { %863 = vst [vmem:[%s1077_s14] sm:$0xff] %v862_v0   ;;  %v587_v2 = vadd.f32 %v923_v47, %v575_v1  ;;  %v572_v9 = vmul.f32 %v922_v43, %v525_v3 }
  0xbf   : > { %v595_v5 = vmax.f32 %v587_v2, 0.0  ;;  %v505_v6 = vpop.f32.mrf.mxu2  ;;  %v584_v14 = vadd.f32 %v923_v47, %v572_v9 }
  0xc0   : > { %v534_v7 = vpop.f32.mrf.mxu3 }
  0xc1   : > { %v872_v8 = vpack.c.bf16 %v595_v5, %v594_v4  ;;  %v497_v10 = vpop.f32.mrf.mxu0  ;;  %v535_v12 = vadd.f32 %v534_v7, %v505_v6  ;;  %v592_v20 = vmax.f32 %v584_v14, 0.0 }
  0xc2   : > { %v526_v11 = vpop.f32.mrf.mxu1 }
  0xc3   : > { %880 = vst [vmem:[%s1077_s14 + $0x10] sm:$0xff] %v872_v8   ;;  %v527_v13 = vadd.f32 %v526_v11, %v497_v10  ;;  %v576_v16 = vmul.f32 %v922_v43, %v535_v12 }
  0xc5   : > { %v573_v15 = vmul.f32 %v922_v43, %v527_v13  ;;  %v588_v23 = vadd.f32 %v923_v47, %v576_v16 }
  0xc7   : > { %v585_v17 = vadd.f32 %v923_v47, %v573_v15  ;;  %v507_v18 = vpop.f32.mrf.mxu2  ;;  %v596_v27 = vmax.f32 %v588_v23, 0.0 }
  0xc8   : > { %v536_v19 = vpop.f32.mrf.mxu3 }
  0xc9   : > { %v593_v21 = vmax.f32 %v585_v17, 0.0  ;;  %v537_v22 = vadd.f32 %v536_v19, %v507_v18 }
  0xcb   : > { %v867_v24 = vpack.c.bf16 %v593_v21, %v592_v20  ;;  %v577_v25 = vmul.f32 %v922_v43, %v537_v22 }
  0xcd   : > { %879 = vst [vmem:[%s1077_s14 + $0x8] sm:$0xff] %v867_v24   ;;  %v589_v26 = vadd.f32 %v923_v47, %v577_v25 }
  0xcf   : > { %v597_v28 = vmax.f32 %v589_v26, 0.0 }
  0xd1   : > { %v877_v29 = vpack.c.bf16 %v597_v28, %v596_v27 }
  0xd3   : > { %881 = vst [vmem:[%s1077_s14 + $0x18] sm:$0xff] %v877_v29  }
  0xd4 PF: > { %s14_s17 = sadd.s32 1, %s946_s17   ;;  %s1097_s15 = smov %s942_s16 }
  0xd5   : > { %p11_p5 = scmp.ge.s32.totalorder %s14_s17, 4   ;;  %s1098_s16 = smov %s1100_s18 }
  0xd7   :  { %13 = sbr.rel (!%p11_p5) target bundleno = 2 (0x2), region = 77 }

// kernel: a_unet_forward.28
= control target key start
LH: loop header
LB: loop body
LE: loop exit
PB: predicated region body
PF: predicated region fallthrough
CT: control target
= control target key end

     0   :  { %s526_s15 = smov 0   ;;  %s528_s16 = smov 0   ;;  %s565_s0 = inlined_call_operand.vmem [shape: bf16[2,4,64], index: 0, kind: input, shape index: {}]   ;;  %s566_s1 = inlined_call_operand.vmem [shape: bf16[2,4,64], index: 1, kind: input, shape index: {}]   ;;  %s567_s2 = inlined_call_operand.vmem [shape: bf16[2,4,64], index: 2, kind: input, shape index: {}]   ;;  %s568_s3 = inlined_call_operand.vmem [shape: bf16[2,4,64], index: 3, kind: input, shape index: {}]   ;;  %s569_s4 = inlined_call_operand.vmem [shape: bf16[2,4,64], index: 4, kind: output, shape index: {}]  }
   0x1   :  { %s530_s17 = smov 0  }
   0x2 LB: > { %s26_s18 = sadd.s32 1, %s495_s16  ;;  %p445_p0 = scmp.ge.s32.totalorder %s499_s17, 1  ;;  %s499_s17 = sphi %s530_s17, %s14_s17   ;;  %s495_s16 = sphi %s528_s16, %s571_s16   ;;  %s491_s15 = sphi %s526_s15, %s570_s15  }
   0x3   : > { %p28_p1 = scmp.ge.s32.totalorder %s26_s18, 2  ;;  %p222_p2 = scmp.lt.s32.totalorder %s499_s17, 3 }
   0x5   : > { %s573_s18 = smov (%p28_p1, %s26_s18), 0  ;;  %p223_p3 = pnand %p445_p0, %p222_p2 }
   0x6   : > { %p273_p4 = scmp.lt.s32.totalorder (!%p223_p3), %s491_s15, 1 }
   0x7   : > { %226 = sbr.rel (%p223_p3) target bundleno = 28 (0x1c), region = 36 }
   0xc   : > { %s575_s15 = smov (!%p273_p4, %s491_s15), 1  ;;  %vm320_vm0 = vcmask 517120  }
   0xd   : > { %s446_s19 = sshll.u32 %s575_s15, 1 }
   0xe   : > { %s279_s22 = scalar_lea.vmem %s565_s0, %s446_s19  ;;  %s286_s25 = scalar_lea.vmem %s566_s1, %s446_s19 }
   0xf   : > { %s293_s28 = scalar_lea.vmem %s567_s2, %s446_s19  ;;  %s300_s5 = scalar_lea.vmem %s568_s3, %s446_s19  ;;  %v308_v0 = vld [vmem:[%s279_s22] sm:$0x3] }
  0x10   : > { %v310_v1 = vld [vmem:[%s286_s25] sm:$0x3]  ;;  %v309_v2 = vunpack.c.l.bf16 %v308_v0  ;;  %s307_s8 = scalar_lea.vmem %s569_s4, %s446_s19 }
  0x11   : > { %v311_v3 = vunpack.c.l.bf16 %v310_v1  ;;  %v312_v4 = vld [vmem:[%s293_s28] sm:$0x3] }
  0x12   : > { %v314_v5 = vld [vmem:[%s300_s5] sm:$0x3]  ;;  %v313_v6 = vunpack.c.l.bf16 %v312_v4 }
  0x13   : > { %v315_v7 = vunpack.c.l.bf16 %v314_v5  ;;  %v316_v8 = vmax.f32 %v309_v2, %v311_v3 }
  0x15   : > { %v317_v9 = vmax.f32 %v313_v6, %v315_v7 }
  0x17   : > { %v318_v10 = vmax.f32 %v316_v8, %v317_v9 }
  0x19   : > { %v319_v11 = vpack.c.bf16 %v318_v10, %v318_v10 }
  0x1b   : > { %321 = vst.msk [vmem:[%s307_s8] sm:$0x3] %vm320_vm0, %v319_v11 }
  0x1c PF: > { %s14_s17 = sadd.s32 1, %s499_s17   ;;  %s570_s15 = smov %s495_s16 }
  0x1d   : > { %p11_p5 = scmp.ge.s32.totalorder %s14_s17, 4   ;;  %s571_s16 = smov %s573_s18 }
  0x1f   :  { %13 = sbr.rel (!%p11_p5) target bundleno = 2 (0x2), region = 75 }

// kernel: a_unet_forward.29
= control target key start
LH: loop header
LB: loop body
LE: loop exit
PB: predicated region body
PF: predicated region fallthrough
CT: control target
= control target key end

     0   :  { %s783_s15 = smov 0   ;;  %s785_s16 = smov 0   ;;  %s874_s0 = inlined_call_operand.vmem [shape: bf16[2,16,256], index: 0, kind: input, shape index: {}]   ;;  %s875_s1 = inlined_call_operand.vmem [shape: bf16[256,128], index: 1, kind: input, shape index: {}]   ;;  %s876_s2 = inlined_call_operand.vmem [shape: f32[1,128], index: 2, kind: input, shape index: {}]   ;;  %s877_s3 = inlined_call_operand.vmem [shape: f32[1,128], index: 3, kind: input, shape index: {}]   ;;  %s878_s4 = inlined_call_operand.vmem [shape: bf16[2,16,128], index: 4, kind: output, shape index: {}]  }
   0x1   :  { %s787_s17 = smov 0  }
   0x2 LB: > { %s33_s18 = sadd.s32 1, %s752_s16  ;;  %p604_p0 = scmp.ge.s32.totalorder %s756_s17, 1  ;;  %s756_s17 = sphi %s787_s17, %s14_s17   ;;  %s752_s16 = sphi %s785_s16, %s880_s16   ;;  %s748_s15 = sphi %s783_s15, %s879_s15  }
   0x3   : > { %p35_p1 = scmp.ge.s32.totalorder %s33_s18, 2  ;;  %p209_p2 = scmp.lt.s32.totalorder %s756_s17, 3 }
   0x5   : > { %s882_s18 = smov (%p35_p1, %s33_s18), 0  ;;  %p210_p3 = pnand %p604_p0, %p209_p2 }
   0x6   : > { %p255_p4 = scmp.lt.s32.totalorder (!%p210_p3), %s748_s15, 1 }
   0x7   : > { %213 = sbr.rel (%p210_p3) target bundleno = 190 (0xbe), region = 36 }
   0xc   : > { %v694_v0 = vld [vmem:[%s875_s1 + $0x38] sm:$0xff]  ;;  %v693_v2 = vld [vmem:[%s875_s1 + $0x30] sm:$0xff]  ;;  %v692_v4 = vld [vmem:[%s875_s1 + $0x28] sm:$0xff]  ;;  %s884_s15 = smov (!%p255_p4, %s748_s15), 1 }
   0xd   : > { %v702_v1 = vld [vmem:[%s875_s1 + $0x78] sm:$0xff]  ;;  %433 = vmatpush.bf16.msra.mxu0 %v694_v0  ;;  %v701_v3 = vld [vmem:[%s875_s1 + $0x70] sm:$0xff]  ;;  %v700_v5 = vld [vmem:[%s875_s1 + $0x68] sm:$0xff]  ;;  %s683_s21 = sshll.u32 %s884_s15, 4  ;;  %s684_s11 = sshll.u32 %s884_s15, 3 }
   0xe   : > { %447 = vmatpush.bf16.msra.mxu1 %v702_v1  ;;  %v691_v6 = vld [vmem:[%s875_s1 + $0x20] sm:$0xff]  ;;  %v690_v8 = vld [vmem:[%s875_s1 + $0x18] sm:$0xff]  ;;  %v689_v10 = vld [vmem:[%s875_s1 + $0x10] sm:$0xff]  ;;  %s266_s28 = scalar_lea.vmem %s874_s0, %s683_s21  ;;  %s283_s14 = scalar_lea.vmem %s878_s4, %s684_s11 }
   0xf   : > { %v699_v7 = vld [vmem:[%s875_s1 + $0x60] sm:$0xff]  ;;  %v698_v9 = vld [vmem:[%s875_s1 + $0x58] sm:$0xff]  ;;  %v697_v11 = vld [vmem:[%s875_s1 + $0x50] sm:$0xff] }
  0x10   : > { %v688_v12 = vld [vmem:[%s875_s1 + $0x8] sm:$0xff]  ;;  %v687_v14 = vld [vmem:[%s875_s1] sm:$0xff] }
  0x11   : > { %434 = vmatpush.bf16.msra.mxu0 %v693_v2  ;;  %v696_v13 = vld [vmem:[%s875_s1 + $0x48] sm:$0xff]  ;;  %v695_v15 = vld [vmem:[%s875_s1 + $0x40] sm:$0xff] }
  0x12   : > { %448 = vmatpush.bf16.msra.mxu1 %v701_v3  ;;  %v611_v16 = vld [vmem:[%s266_s28] sm:$0xf]  ;;  %v686_v17 = vld [vmem:[%s266_s28 + $0x4] sm:$0xf0]  ;;  %v685_v18 = vld [vmem:[%s266_s28 + $0x4] sm:$0xf] }
  0x13   : > { %v613_v19 = vld [vmem:[%s266_s28 + $0x8] sm:$0xf0]  ;;  %v612_v20 = vor.u32 %v686_v17, %v611_v16  ;;  %v732_v25 = vld [vmem:[%s876_s2] ss:$0 sm:$0xff] }
  0x14   : > { %v616_v21 = vor.u32 %v685_v18, %v613_v19  ;;  %v733_v27 = vld [vmem:[%s877_s3] ss:$0 sm:$0xff] }
  0x15   : > { %435 = vmatpush.bf16.msra.mxu0 %v692_v4 }
  0x16   : > { %449 = vmatpush.bf16.msra.mxu1 %v700_v5 }
  0x19   : > { %436 = vmatpush.bf16.msra.mxu0 %v691_v6 }
  0x1a   : > { %450 = vmatpush.bf16.msra.mxu1 %v699_v7 }
  0x1d   : > { %437 = vmatpush.bf16.msra.mxu0 %v690_v8 }
  0x1e   : > { %451 = vmatpush.bf16.msra.mxu1 %v698_v9 }
  0x21   : > { %438 = vmatpush.bf16.msra.mxu0 %v689_v10 }
  0x22   : > { %452 = vmatpush.bf16.msra.mxu1 %v697_v11 }
  0x25   : > { %439 = vmatpush.bf16.msra.mxu0 %v688_v12 }
  0x26   : > { %453 = vmatpush.bf16.msra.mxu1 %v696_v13 }
  0x29   : > { %440 = vmatpush.bf16.msra.mxu0 %v687_v14 }
  0x2a   : > { %454 = vmatpush.bf16.msra.mxu1 %v695_v15 }
  0x2c   : > { %441 = vmatmul.bf16.vlgmr.msra.gmra.mxu0 %v612_v20 }
  0x2d   : > { %455 = vmatmul.bf16.vlgmr.msra.gmra.mxu1 %v616_v21 }
  0xa9   : > { %v442_v22 = vpop.f32.mrf.mxu0 }
  0xaa   : > { %v456_v23 = vpop.f32.mrf.mxu1 }
  0xab   : > { %v457_v24 = vadd.f32 %v456_v23, %v442_v22 }
  0xad   : > { %v474_v26 = vmul.f32 %v732_v25, %v457_v24 }
  0xaf   : > { %v480_v31 = vadd.f32 %v733_v27, %v474_v26 }
  0xb1   : > { %v444_v28 = vpop.f32.mrf.mxu0  ;;  %v482_v34 = vmax.f32 %v480_v31, 0.0 }
  0xb2   : > { %v458_v29 = vpop.f32.mrf.mxu1 }
  0xb3   : > { %v459_v30 = vadd.f32 %v458_v29, %v444_v28 }
  0xb5   : > { %v475_v32 = vmul.f32 %v732_v25, %v459_v30 }
  0xb7   : > { %v481_v33 = vadd.f32 %v733_v27, %v475_v32 }
  0xb9   : > { %v483_v35 = vmax.f32 %v481_v33, 0.0 }
  0xbb   : > { %v706_v36 = vpack.c.bf16 %v483_v35, %v482_v34 }
  0xbd   : > { %707 = vst [vmem:[%s283_s14] sm:$0xff] %v706_v36  }
  0xbe PF: > { %s14_s17 = sadd.s32 1, %s756_s17   ;;  %s879_s15 = smov %s752_s16 }
  0xbf   : > { %p11_p5 = scmp.ge.s32.totalorder %s14_s17, 4   ;;  %s880_s16 = smov %s882_s18 }
  0xc1   :  { %13 = sbr.rel (!%p11_p5) target bundleno = 2 (0x2), region = 77 }

// kernel: a_unet_forward.30
= control target key start
LH: loop header
LB: loop body
LE: loop exit
PB: predicated region body
PF: predicated region fallthrough
CT: control target
= control target key end

     0   :  { %s913_s15 = smov 0   ;;  %s915_s16 = smov 0   ;;  %s1032_s0 = inlined_call_operand.vmem [shape: bf16[2,16,384], index: 0, kind: input, shape index: {}]   ;;  %s1033_s1 = inlined_call_operand.vmem [shape: bf16[384,128], index: 1, kind: input, shape index: {}]   ;;  %s1034_s2 = inlined_call_operand.vmem [shape: f32[1,128], index: 2, kind: input, shape index: {}]   ;;  %s1035_s3 = inlined_call_operand.vmem [shape: f32[1,128], index: 3, kind: input, shape index: {}]   ;;  %s1036_s4 = inlined_call_operand.vmem [shape: bf16[2,16,128], index: 4, kind: output, shape index: {}]  }
   0x1   :  { %s917_s17 = smov 0  }
   0x2 LB: > { %s33_s18 = sadd.s32 1, %s882_s16  ;;  %p690_p0 = scmp.ge.s32.totalorder %s886_s17, 1  ;;  %s886_s17 = sphi %s917_s17, %s14_s17   ;;  %s882_s16 = sphi %s915_s16, %s1038_s16   ;;  %s878_s15 = sphi %s913_s15, %s1037_s15  }
   0x3   : > { %p35_p1 = scmp.ge.s32.totalorder %s33_s18, 2  ;;  %p209_p2 = scmp.lt.s32.totalorder %s886_s17, 3 }
   0x5   : > { %s1040_s18 = smov (%p35_p1, %s33_s18), 0  ;;  %p210_p3 = pnand %p690_p0, %p209_p2 }
   0x6   : > { %p255_p4 = scmp.lt.s32.totalorder (!%p210_p3), %s878_s15, 1 }
   0x7   : > { %213 = sbr.rel (%p210_p3) target bundleno = 197 (0xc5), region = 36 }
   0xc   : > { %v815_v0 = vld [vmem:[%s1033_s1 + $0x38] sm:$0xff]  ;;  %v814_v3 = vld [vmem:[%s1033_s1 + $0x30] sm:$0xff]  ;;  %v813_v6 = vld [vmem:[%s1033_s1 + $0x28] sm:$0xff]  ;;  %s1042_s15 = smov (!%p255_p4, %s878_s15), 1 }
   0xd   : > { %v823_v1 = vld [vmem:[%s1033_s1 + $0x78] sm:$0xff]  ;;  %505 = vmatpush.bf16.msra.mxu0 %v815_v0  ;;  %v822_v4 = vld [vmem:[%s1033_s1 + $0x70] sm:$0xff]  ;;  %v821_v7 = vld [vmem:[%s1033_s1 + $0x68] sm:$0xff]  ;;  %s837_s5 = smul.u32 24, %s1042_s15 }
   0xe   : > { %v831_v2 = vld [vmem:[%s1033_s1 + $0xb8] sm:$0xff]  ;;  %519 = vmatpush.bf16.msra.mxu1 %v823_v1  ;;  %v830_v5 = vld [vmem:[%s1033_s1 + $0xb0] sm:$0xff]  ;;  %v829_v8 = vld [vmem:[%s1033_s1 + $0xa8] sm:$0xff] }
   0xf   : > { %533 = vmatpush.bf16.msra.mxu2 %v831_v2  ;;  %v812_v9 = vld [vmem:[%s1033_s1 + $0x20] sm:$0xff]  ;;  %v811_v12 = vld [vmem:[%s1033_s1 + $0x18] sm:$0xff]  ;;  %v810_v15 = vld [vmem:[%s1033_s1 + $0x10] sm:$0xff]  ;;  %s266_s14 = scalar_lea.vmem %s1032_s0, %s837_s5  ;;  %s804_s5 = sshll.u32 %s1042_s15, 3 }
  0x10   : > { %v820_v10 = vld [vmem:[%s1033_s1 + $0x60] sm:$0xff]  ;;  %v819_v13 = vld [vmem:[%s1033_s1 + $0x58] sm:$0xff]  ;;  %v818_v16 = vld [vmem:[%s1033_s1 + $0x50] sm:$0xff]  ;;  %s283_s8 = scalar_lea.vmem %s1036_s4, %s804_s5 }
  0x11   : > { %506 = vmatpush.bf16.msra.mxu0 %v814_v3  ;;  %v828_v11 = vld [vmem:[%s1033_s1 + $0xa0] sm:$0xff]  ;;  %v827_v14 = vld [vmem:[%s1033_s1 + $0x98] sm:$0xff]  ;;  %v826_v17 = vld [vmem:[%s1033_s1 + $0x90] sm:$0xff] }
  0x12   : > { %520 = vmatpush.bf16.msra.mxu1 %v822_v4  ;;  %v809_v18 = vld [vmem:[%s1033_s1 + $0x8] sm:$0xff]  ;;  %v808_v21 = vld [vmem:[%s1033_s1] sm:$0xff]  ;;  %v698_v26 = vld [vmem:[%s266_s14 + $0xc] sm:$0xf0] }
  0x13   : > { %534 = vmatpush.bf16.msra.mxu2 %v830_v5  ;;  %v817_v19 = vld [vmem:[%s1033_s1 + $0x48] sm:$0xff]  ;;  %v816_v22 = vld [vmem:[%s1033_s1 + $0x40] sm:$0xff]  ;;  %v807_v29 = vld [vmem:[%s266_s14 + $0x10] sm:$0xf0] }
  0x14   : > { %v825_v20 = vld [vmem:[%s1033_s1 + $0x88] sm:$0xff]  ;;  %v696_v23 = vld [vmem:[%s266_s14] sm:$0xf]  ;;  %v805_v25 = vld [vmem:[%s266_s14 + $0x4] sm:$0xf] }
  0x15   : > { %507 = vmatpush.bf16.msra.mxu0 %v813_v6  ;;  %v806_v24 = vld [vmem:[%s266_s14 + $0x8] sm:$0xf0]  ;;  %v824_v27 = vld [vmem:[%s1033_s1 + $0x80] sm:$0xff]  ;;  %v704_v28 = vld [vmem:[%s266_s14 + $0x8] sm:$0xf]  ;;  %v701_v31 = vor.u32 %v805_v25, %v698_v26 }
  0x16   : > { %521 = vmatpush.bf16.msra.mxu1 %v821_v7  ;;  %v697_v30 = vor.u32 %v806_v24, %v696_v23  ;;  %v705_v32 = vor.u32 %v807_v29, %v704_v28  ;;  %v862_v38 = vld [vmem:[%s1034_s2] ss:$0 sm:$0xff] }
  0x17   : > { %535 = vmatpush.bf16.msra.mxu2 %v829_v8  ;;  %v863_v42 = vld [vmem:[%s1035_s3] ss:$0 sm:$0xff] }
  0x19   : > { %508 = vmatpush.bf16.msra.mxu0 %v812_v9 }
  0x1a   : > { %522 = vmatpush.bf16.msra.mxu1 %v820_v10 }
  0x1b   : > { %536 = vmatpush.bf16.msra.mxu2 %v828_v11 }
  0x1d   : > { %509 = vmatpush.bf16.msra.mxu0 %v811_v12 }
  0x1e   : > { %523 = vmatpush.bf16.msra.mxu1 %v819_v13 }
  0x1f   : > { %537 = vmatpush.bf16.msra.mxu2 %v827_v14 }
  0x21   : > { %510 = vmatpush.bf16.msra.mxu0 %v810_v15 }
  0x22   : > { %524 = vmatpush.bf16.msra.mxu1 %v818_v16 }
  0x23   : > { %538 = vmatpush.bf16.msra.mxu2 %v826_v17 }
  0x25   : > { %511 = vmatpush.bf16.msra.mxu0 %v809_v18 }
  0x26   : > { %525 = vmatpush.bf16.msra.mxu1 %v817_v19 }
  0x27   : > { %539 = vmatpush.bf16.msra.mxu2 %v825_v20 }
  0x29   : > { %512 = vmatpush.bf16.msra.mxu0 %v808_v21 }
  0x2a   : > { %526 = vmatpush.bf16.msra.mxu1 %v816_v22 }
  0x2b   : > { %540 = vmatpush.bf16.msra.mxu2 %v824_v27 }
  0x2c   : > { %513 = vmatmul.bf16.vlgmr.msra.gmra.mxu0 %v697_v30 }
  0x2d   : > { %527 = vmatmul.bf16.vlgmr.msra.gmra.mxu1 %v701_v31 }
  0x2e   : > { %541 = vmatmul.bf16.vlgmr.msra.gmra.mxu2 %v705_v32 }
  0xa9   : > { %v514_v33 = vpop.f32.mrf.mxu0 }
  0xaa   : > { %v528_v34 = vpop.f32.mrf.mxu1 }
  0xab   : > { %v529_v35 = vadd.f32 %v528_v34, %v514_v33 }
  0xb1   : > { %v542_v36 = vpop.f32.mrf.mxu2  ;;  %v516_v39 = vpop.f32.mrf.mxu0 }
  0xb2   : > { %v543_v37 = vadd.f32 %v542_v36, %v529_v35  ;;  %v530_v40 = vpop.f32.mrf.mxu1 }
  0xb3   : > { %v531_v43 = vadd.f32 %v530_v40, %v516_v39 }
  0xb4   : > { %v560_v41 = vmul.f32 %v862_v38, %v543_v37 }
  0xb6   : > { %v566_v46 = vadd.f32 %v863_v42, %v560_v41 }
  0xb8   : > { %v568_v49 = vmax.f32 %v566_v46, 0.0 }
  0xb9   : > { %v544_v44 = vpop.f32.mrf.mxu2 }
  0xba   : > { %v545_v45 = vadd.f32 %v544_v44, %v531_v43 }
  0xbc   : > { %v561_v47 = vmul.f32 %v862_v38, %v545_v45 }
  0xbe   : > { %v567_v48 = vadd.f32 %v863_v42, %v561_v47 }
  0xc0   : > { %v569_v50 = vmax.f32 %v567_v48, 0.0 }
  0xc2   : > { %v835_v51 = vpack.c.bf16 %v569_v50, %v568_v49 }
  0xc4   : > { %836 = vst [vmem:[%s283_s8] sm:$0xff] %v835_v51  }
  0xc5 PF: > { %s14_s17 = sadd.s32 1, %s886_s17   ;;  %s1037_s15 = smov %s882_s16 }
  0xc6   : > { %p11_p5 = scmp.ge.s32.totalorder %s14_s17, 4   ;;  %s1038_s16 = smov %s1040_s18 }
  0xc8   :  { %13 = sbr.rel (!%p11_p5) target bundleno = 2 (0x2), region = 77 }

// kernel: a_unet_forward.31
= control target key start
LH: loop header
LB: loop body
LE: loop exit
PB: predicated region body
PF: predicated region fallthrough
CT: control target
= control target key end

     0   :  { %s489_s15 = smov 0   ;;  %s491_s16 = smov 0   ;;  %s528_s0 = inlined_call_operand.vmem [shape: bf16[2,2,64], index: 0, kind: input, shape index: {}]   ;;  %s529_s1 = inlined_call_operand.vmem [shape: bf16[2,2,64], index: 1, kind: input, shape index: {}]   ;;  %s530_s2 = inlined_call_operand.vmem [shape: bf16[2,2,64], index: 2, kind: input, shape index: {}]   ;;  %s531_s3 = inlined_call_operand.vmem [shape: bf16[2,2,64], index: 3, kind: input, shape index: {}]   ;;  %s532_s4 = inlined_call_operand.vmem [shape: bf16[2,2,64], index: 4, kind: output, shape index: {}]  }
   0x1   :  { %s493_s17 = smov 0  }
   0x2 LB: > { %s26_s18 = sadd.s32 1, %s458_s16  ;;  %p413_p0 = scmp.ge.s32.totalorder %s462_s17, 1  ;;  %s462_s17 = sphi %s493_s17, %s14_s17   ;;  %s458_s16 = sphi %s491_s16, %s534_s16   ;;  %s454_s15 = sphi %s489_s15, %s533_s15  }
   0x3   : > { %p28_p1 = scmp.ge.s32.totalorder %s26_s18, 2  ;;  %p218_p2 = scmp.lt.s32.totalorder %s462_s17, 3 }
   0x5   : > { %s536_s18 = smov (%p28_p1, %s26_s18), 0  ;;  %p219_p3 = pnand %p413_p0, %p218_p2 }
   0x6   : > { %p264_p4 = scmp.lt.s32.totalorder (!%p219_p3), %s454_s15, 1 }
   0x7   : > { %222 = sbr.rel (%p219_p3) target bundleno = 27 (0x1b), region = 36 }
   0xc   : > { %s538_s15 = smov (!%p264_p4, %s454_s15), 1  ;;  %vm306_vm0 = vcmask 516096  }
   0xd   : > { %s269_s21 = scalar_lea.vmem %s528_s0, %s538_s15  ;;  %s275_s24 = scalar_lea.vmem %s529_s1, %s538_s15 }
   0xe   : > { %s281_s27 = scalar_lea.vmem %s530_s2, %s538_s15  ;;  %s287_s30 = scalar_lea.vmem %s531_s3, %s538_s15  ;;  %v294_v0 = vld [vmem:[%s269_s21] sm:$0x1] }
   0xf   : > { %v296_v1 = vld [vmem:[%s275_s24] sm:$0x1]  ;;  %v295_v2 = vunpack.c.l.bf16 %v294_v0  ;;  %s293_s7 = scalar_lea.vmem %s532_s4, %s538_s15 }
  0x10   : > { %v297_v3 = vunpack.c.l.bf16 %v296_v1  ;;  %v298_v4 = vld [vmem:[%s281_s27] sm:$0x1] }
  0x11   : > { %v300_v5 = vld [vmem:[%s287_s30] sm:$0x1]  ;;  %v299_v6 = vunpack.c.l.bf16 %v298_v4 }
  0x12   : > { %v301_v7 = vunpack.c.l.bf16 %v300_v5  ;;  %v302_v8 = vmax.f32 %v295_v2, %v297_v3 }
  0x14   : > { %v303_v9 = vmax.f32 %v299_v6, %v301_v7 }
  0x16   : > { %v304_v10 = vmax.f32 %v302_v8, %v303_v9 }
  0x18   : > { %v305_v11 = vpack.c.bf16 %v304_v10, %v304_v10 }
  0x1a   : > { %307 = vst.msk [vmem:[%s293_s7] sm:$0x1] %vm306_vm0, %v305_v11 }
  0x1b PF: > { %s14_s17 = sadd.s32 1, %s462_s17   ;;  %s533_s15 = smov %s458_s16 }
  0x1c   : > { %p11_p5 = scmp.ge.s32.totalorder %s14_s17, 4   ;;  %s534_s16 = smov %s536_s18 }
  0x1e   :  { %13 = sbr.rel (!%p11_p5) target bundleno = 2 (0x2), region = 75 }

// kernel: a_unet_forward.34
= control target key start
LH: loop header
LB: loop body
LE: loop exit
PB: predicated region body
PF: predicated region fallthrough
CT: control target
= control target key end

     0   :  { %s493_s15 = smov 0   ;;  %s495_s16 = smov 0   ;;  %s535_s0 = inlined_call_operand.vmem [shape: bf16[2,1,64], index: 0, kind: input, shape index: {}]   ;;  %s536_s1 = inlined_call_operand.vmem [shape: bf16[2,1,64], index: 1, kind: input, shape index: {}]   ;;  %s537_s2 = inlined_call_operand.vmem [shape: bf16[2,1,64], index: 2, kind: input, shape index: {}]   ;;  %s538_s3 = inlined_call_operand.vmem [shape: bf16[2,1,64], index: 3, kind: input, shape index: {}]   ;;  %s539_s4 = inlined_call_operand.vmem [shape: bf16[2,1,64], index: 4, kind: output, shape index: {}]  }
   0x1   :  { %s497_s17 = smov 0  }
   0x2 LB: > { %s26_s18 = sadd.s32 1, %s462_s16  ;;  %p417_p0 = scmp.ge.s32.totalorder %s466_s17, 1  ;;  %s466_s17 = sphi %s497_s17, %s14_s17   ;;  %s462_s16 = sphi %s495_s16, %s541_s16   ;;  %s458_s15 = sphi %s493_s15, %s540_s15  }
   0x3   : > { %p28_p1 = scmp.ge.s32.totalorder %s26_s18, 2  ;;  %p218_p2 = scmp.lt.s32.totalorder %s466_s17, 3 }
   0x5   : > { %s543_s18 = smov (%p28_p1, %s26_s18), 0  ;;  %p219_p3 = pnand %p417_p0, %p218_p2 }
   0x6   : > { %p264_p4 = scmp.lt.s32.totalorder (!%p219_p3), %s458_s15, 1 }
   0x7   : > { %222 = sbr.rel (%p219_p3) target bundleno = 28 (0x1c), region = 36 }
   0xc   : > { %s545_s15 = smov (!%p264_p4, %s458_s15), 1  ;;  %vm306_vm0 = vcmask 516096   ;;  %vm307_vm1 = vsmask.f32 256 }
   0xd   : > { %s269_s21 = scalar_lea.vmem %s535_s0, %s545_s15  ;;  %s275_s24 = scalar_lea.vmem %s536_s1, %s545_s15  ;;  %vm308_vm2 = vmand %vm306_vm0, %vm307_vm1 }
   0xe   : > { %s281_s27 = scalar_lea.vmem %s537_s2, %s545_s15  ;;  %s287_s30 = scalar_lea.vmem %s538_s3, %s545_s15  ;;  %v294_v0 = vld [vmem:[%s269_s21] sm:$0x1] }
   0xf   : > { %v296_v1 = vld [vmem:[%s275_s24] sm:$0x1]  ;;  %v295_v2 = vunpack.c.l.bf16 %v294_v0  ;;  %s293_s7 = scalar_lea.vmem %s539_s4, %s545_s15 }
  0x10   : > { %v297_v3 = vunpack.c.l.bf16 %v296_v1  ;;  %v298_v4 = vld [vmem:[%s281_s27] sm:$0x1] }
  0x11   : > { %v300_v5 = vld [vmem:[%s287_s30] sm:$0x1]  ;;  %v299_v6 = vunpack.c.l.bf16 %v298_v4 }
  0x12   : > { %v301_v7 = vunpack.c.l.bf16 %v300_v5  ;;  %v302_v8 = vmax.f32 %v295_v2, %v297_v3  ;;  %v309_v11 = vld [vmem:[%s293_s7] sm:$0x1] }
  0x14   : > { %v303_v9 = vmax.f32 %v299_v6, %v301_v7 }
  0x16   : > { %v304_v10 = vmax.f32 %v302_v8, %v303_v9 }
  0x18   : > { %v305_v12 = vpack.c.bf16 %v304_v10, %v304_v10 }
  0x1a   : > { %v310_v13 = vsel %vm308_vm2, %v305_v12, %v309_v11 }
  0x1b   : > { %311 = vst [vmem:[%s293_s7] sm:$0x1] %v310_v13 }
  0x1c PF: > { %s14_s17 = sadd.s32 1, %s466_s17   ;;  %s540_s15 = smov %s462_s16 }
  0x1d   : > { %p11_p5 = scmp.ge.s32.totalorder %s14_s17, 4   ;;  %s541_s16 = smov %s543_s18 }
  0x1f   :  { %13 = sbr.rel (!%p11_p5) target bundleno = 2 (0x2), region = 75 }

// kernel: a_unet_forward.33
= control target key start
LH: loop header
LB: loop body
LE: loop exit
PB: predicated region body
PF: predicated region fallthrough
CT: control target
= control target key end

     0   :  { %s1171_s15 = smov 0   ;;  %s1173_s16 = smov 0   ;;  %s1350_s0 = inlined_call_operand.vmem [shape: bf16[2,16,640], index: 0, kind: input, shape index: {}]   ;;  %s1351_s1 = inlined_call_operand.vmem [shape: bf16[640,128], index: 1, kind: input, shape index: {}]   ;;  %s1352_s2 = inlined_call_operand.vmem [shape: f32[1,128], index: 2, kind: input, shape index: {}]   ;;  %s1353_s3 = inlined_call_operand.vmem [shape: f32[1,128], index: 3, kind: input, shape index: {}]   ;;  %s1354_s4 = inlined_call_operand.vmem [shape: bf16[2,16,128], index: 4, kind: output, shape index: {}]  }
   0x1   :  { %s1175_s17 = smov 0  }
   0x2 LB: > { %s33_s18 = sadd.s32 1, %s1140_s16  ;;  %p858_p0 = scmp.ge.s32.totalorder %s1144_s17, 1  ;;  %s1144_s17 = sphi %s1175_s17, %s14_s17   ;;  %s1140_s16 = sphi %s1173_s16, %s1356_s16   ;;  %s1136_s15 = sphi %s1171_s15, %s1355_s15  }
   0x3   : > { %p35_p1 = scmp.ge.s32.totalorder %s33_s18, 2  ;;  %p209_p2 = scmp.lt.s32.totalorder %s1144_s17, 3 }
   0x5   : > { %s1358_s18 = smov (%p35_p1, %s33_s18), 0  ;;  %p210_p3 = pnand %p858_p0, %p209_p2 }
   0x6   : > { %p255_p4 = scmp.lt.s32.totalorder (!%p210_p3), %s1136_s15, 1 }
   0x7   : > { %213 = sbr.rel (%p210_p3) target bundleno = 221 (0xdd), region = 36 }
   0xc   : > { %v1057_v0 = vld [vmem:[%s1351_s1 + $0x38] sm:$0xff]  ;;  %v1056_v4 = vld [vmem:[%s1351_s1 + $0x30] sm:$0xff]  ;;  %v1055_v8 = vld [vmem:[%s1351_s1 + $0x28] sm:$0xff]  ;;  %s1360_s15 = smov (!%p255_p4, %s1136_s15), 1 }
   0xd   : > { %v1073_v1 = vld [vmem:[%s1351_s1 + $0xb8] sm:$0xff]  ;;  %645 = vmatpush.bf16.msra.mxu0 %v1057_v0  ;;  %v1072_v5 = vld [vmem:[%s1351_s1 + $0xb0] sm:$0xff]  ;;  %v1071_v9 = vld [vmem:[%s1351_s1 + $0xa8] sm:$0xff]  ;;  %s1095_s19 = smul.u32 40, %s1360_s15 }
   0xe   : > { %v1081_v2 = vld [vmem:[%s1351_s1 + $0xf8] sm:$0xff]  ;;  %673 = vmatpush.bf16.msra.mxu2 %v1073_v1  ;;  %v1080_v6 = vld [vmem:[%s1351_s1 + $0xf0] sm:$0xff]  ;;  %v1079_v10 = vld [vmem:[%s1351_s1 + $0xe8] sm:$0xff] }
   0xf   : > { %v1065_v3 = vld [vmem:[%s1351_s1 + $0x78] sm:$0xff]  ;;  %687 = vmatpush.bf16.msra.mxu3 %v1081_v2  ;;  %v1064_v7 = vld [vmem:[%s1351_s1 + $0x70] sm:$0xff]  ;;  %v1063_v11 = vld [vmem:[%s1351_s1 + $0x68] sm:$0xff]  ;;  %s1277_s30 = scalar_lea.vmem %s1350_s0, %s1095_s19  ;;  %s1044_s19 = sshll.u32 %s1360_s15, 3 }
  0x10   : > { %659 = vmatpush.bf16.msra.mxu1 %v1065_v3  ;;  %v1054_v12 = vld [vmem:[%s1351_s1 + $0x20] sm:$0xff]  ;;  %v1053_v16 = vld [vmem:[%s1351_s1 + $0x18] sm:$0xff]  ;;  %v1052_v20 = vld [vmem:[%s1351_s1 + $0x10] sm:$0xff]  ;;  %s283_s22 = scalar_lea.vmem %s1354_s4, %s1044_s19 }
  0x11   : > { %646 = vmatpush.bf16.msra.mxu0 %v1056_v4  ;;  %v1070_v13 = vld [vmem:[%s1351_s1 + $0xa0] sm:$0xff]  ;;  %v1069_v17 = vld [vmem:[%s1351_s1 + $0x98] sm:$0xff]  ;;  %v1068_v21 = vld [vmem:[%s1351_s1 + $0x90] sm:$0xff] }
  0x12   : > { %674 = vmatpush.bf16.msra.mxu2 %v1072_v5  ;;  %v1078_v14 = vld [vmem:[%s1351_s1 + $0xe0] sm:$0xff]  ;;  %v1077_v18 = vld [vmem:[%s1351_s1 + $0xd8] sm:$0xff]  ;;  %v1076_v22 = vld [vmem:[%s1351_s1 + $0xd0] sm:$0xff] }
  0x13   : > { %688 = vmatpush.bf16.msra.mxu3 %v1080_v6  ;;  %v1062_v15 = vld [vmem:[%s1351_s1 + $0x60] sm:$0xff]  ;;  %v1061_v19 = vld [vmem:[%s1351_s1 + $0x58] sm:$0xff]  ;;  %v1060_v23 = vld [vmem:[%s1351_s1 + $0x50] sm:$0xff] }
  0x14   : > { %660 = vmatpush.bf16.msra.mxu1 %v1064_v7  ;;  %v1051_v24 = vld [vmem:[%s1351_s1 + $0x8] sm:$0xff]  ;;  %v1050_v28 = vld [vmem:[%s1351_s1] sm:$0xff]  ;;  %v1089_v30 = vld [vmem:[%s1351_s1 + $0x138] sm:$0xff] }
  0x15   : > { %647 = vmatpush.bf16.msra.mxu0 %v1055_v8  ;;  %v1067_v25 = vld [vmem:[%s1351_s1 + $0x88] sm:$0xff]  ;;  %v1066_v29 = vld [vmem:[%s1351_s1 + $0x80] sm:$0xff]  ;;  %v1048_v32 = vld [vmem:[%s1277_s30 + $0x18] sm:$0xf0] }
  0x16   : > { %675 = vmatpush.bf16.msra.mxu2 %v1071_v9  ;;  %v1075_v26 = vld [vmem:[%s1351_s1 + $0xc8] sm:$0xff]  ;;  %v864_v33 = vld [vmem:[%s1277_s30] sm:$0xf]  ;;  %v1047_v34 = vld [vmem:[%s1277_s30 + $0x10] sm:$0xf0] }
  0x17   : > { %689 = vmatpush.bf16.msra.mxu3 %v1079_v10  ;;  %v1059_v27 = vld [vmem:[%s1351_s1 + $0x48] sm:$0xff]  ;;  %v1074_v35 = vld [vmem:[%s1351_s1 + $0xc0] sm:$0xff]  ;;  %v866_v40 = vld [vmem:[%s1277_s30 + $0x14] sm:$0xf0]  ;;  %v865_v42 = vor.u32 %v1047_v34, %v864_v33 }
  0x18   : > { %661 = vmatpush.bf16.msra.mxu1 %v1063_v11  ;;  %v872_v31 = vld [vmem:[%s1277_s30 + $0x8] sm:$0xf]  ;;  %v1046_v36 = vld [vmem:[%s1277_s30 + $0xc] sm:$0xf]  ;;  %v874_v37 = vld [vmem:[%s1277_s30 + $0x1c] sm:$0xf0] }
  0x19   : > { %648 = vmatpush.bf16.msra.mxu0 %v1054_v12  ;;  %v1058_v38 = vld [vmem:[%s1351_s1 + $0x40] sm:$0xff]  ;;  %v873_v41 = vor.u32 %v1048_v32, %v872_v31  ;;  %v877_v43 = vor.u32 %v1046_v36, %v874_v37  ;;  %v1088_v44 = vld [vmem:[%s1351_s1 + $0x130] sm:$0xff]  ;;  %v1087_v46 = vld [vmem:[%s1351_s1 + $0x128] sm:$0xff] }
  0x1a   : > { %676 = vmatpush.bf16.msra.mxu2 %v1070_v13  ;;  %v1045_v39 = vld [vmem:[%s1277_s30 + $0x4] sm:$0xf]  ;;  %v1085_v48 = vld [vmem:[%s1351_s1 + $0x118] sm:$0xff]  ;;  %v1084_v49 = vld [vmem:[%s1351_s1 + $0x110] sm:$0xff] }
  0x1b   : > { %690 = vmatpush.bf16.msra.mxu3 %v1078_v14  ;;  %v869_v45 = vor.u32 %v1045_v39, %v866_v40  ;;  %v1086_v47 = vld [vmem:[%s1351_s1 + $0x120] sm:$0xff]  ;;  %v1083_v50 = vld [vmem:[%s1351_s1 + $0x108] sm:$0xff]  ;;  %v880_v52 = vld [vmem:[%s1277_s30 + $0x10] sm:$0xf] }
  0x1c   : > { %662 = vmatpush.bf16.msra.mxu1 %v1062_v15  ;;  %v1082_v51 = vld [vmem:[%s1351_s1 + $0x100] sm:$0xff] }
  0x1d   : > { %649 = vmatpush.bf16.msra.mxu0 %v1053_v16  ;;  %v1049_v53 = vld [vmem:[%s1277_s30 + $0x20] sm:$0xf0]  ;;  %v1120_v5 = vld [vmem:[%s1352_s2] ss:$0 sm:$0xff] }
  0x1e   : > { %677 = vmatpush.bf16.msra.mxu2 %v1069_v17  ;;  %v881_v54 = vor.u32 %v1049_v53, %v880_v52  ;;  %v1121_v9 = vld [vmem:[%s1353_s3] ss:$0 sm:$0xff] }
  0x1f   : > { %691 = vmatpush.bf16.msra.mxu3 %v1077_v18 }
  0x20   : > { %663 = vmatpush.bf16.msra.mxu1 %v1061_v19 }
  0x21   : > { %650 = vmatpush.bf16.msra.mxu0 %v1052_v20 }
  0x22   : > { %678 = vmatpush.bf16.msra.mxu2 %v1068_v21 }
  0x23   : > { %692 = vmatpush.bf16.msra.mxu3 %v1076_v22 }
  0x24   : > { %664 = vmatpush.bf16.msra.mxu1 %v1060_v23 }
  0x25   : > { %651 = vmatpush.bf16.msra.mxu0 %v1051_v24 }
  0x26   : > { %679 = vmatpush.bf16.msra.mxu2 %v1067_v25 }
  0x27   : > { %693 = vmatpush.bf16.msra.mxu3 %v1075_v26 }
  0x28   : > { %665 = vmatpush.bf16.msra.mxu1 %v1059_v27 }
  0x29   : > { %652 = vmatpush.bf16.msra.mxu0 %v1050_v28 }
  0x2a   : > { %680 = vmatpush.bf16.msra.mxu2 %v1066_v29 }
  0x2b   : > { %694 = vmatpush.bf16.msra.mxu3 %v1074_v35 }
  0x2c   : > { %666 = vmatpush.bf16.msra.mxu1 %v1058_v38  ;;  %653 = vmatmul.bf16.vlgmr.msra.gmra.mxu0 %v865_v42 }
  0x2d   : > { %701 = vmatpush.bf16.msrb.mxu0 %v1089_v30  ;;  %681 = vmatmul.bf16.vlgmr.msra.gmra.mxu2 %v873_v41 }
  0x2e   : > { %695 = vmatmul.bf16.vlgmr.msra.gmra.mxu3 %v877_v43 }
  0x2f   : > { %667 = vmatmul.bf16.vlgmr.msra.gmra.mxu1 %v869_v45 }
  0x31   : > { %702 = vmatpush.bf16.msrb.mxu0 %v1088_v44 }
  0x35   : > { %703 = vmatpush.bf16.msrb.mxu0 %v1087_v46 }
  0x39   : > { %704 = vmatpush.bf16.msrb.mxu0 %v1086_v47 }
  0x3d   : > { %705 = vmatpush.bf16.msrb.mxu0 %v1085_v48 }
  0x41   : > { %706 = vmatpush.bf16.msrb.mxu0 %v1084_v49 }
  0x45   : > { %707 = vmatpush.bf16.msrb.mxu0 %v1083_v50 }
  0x49   : > { %708 = vmatpush.bf16.msrb.mxu0 %v1082_v51 }
  0x4c   : > { %709 = vmatmul.bf16.vlgmr.msrb.gmra.mxu0 %v881_v54 }
  0xa9   : > { %v654_v55 = vpop.f32.mrf.mxu0 }
  0xac   : > { %v668_v56 = vpop.f32.mrf.mxu1 }
  0xad   : > { %v669_v59 = vadd.f32 %v668_v56, %v654_v55 }
  0xb0   : > { %v682_v57 = vpop.f32.mrf.mxu2 }
  0xb1   : > { %v656_v58 = vpop.f32.mrf.mxu0  ;;  %v696_v60 = vpop.f32.mrf.mxu3  ;;  %v683_v62 = vadd.f32 %v682_v57, %v669_v59 }
  0xb3   : > { %v697_v2 = vadd.f32 %v696_v60, %v683_v62 }
  0xb4   : > { %v670_v61 = vpop.f32.mrf.mxu1 }
  0xb5   : > { %v671_v63 = vadd.f32 %v670_v61, %v656_v58 }
  0xb8   : > { %v684_v0 = vpop.f32.mrf.mxu2 }
  0xb9   : > { %v685_v3 = vadd.f32 %v684_v0, %v671_v63  ;;  %v698_v6 = vpop.f32.mrf.mxu3 }
  0xbb   : > { %v699_v7 = vadd.f32 %v698_v6, %v685_v3 }
  0xc9   : > { %v710_v1 = vpop.f32.mrf.mxu0 }
  0xca   : > { %v711_v4 = vadd.f32 %v710_v1, %v697_v2 }
  0xcc   : > { %v728_v8 = vmul.f32 %v1120_v5, %v711_v4 }
  0xce   : > { %v734_v12 = vadd.f32 %v1121_v9, %v728_v8 }
  0xd0   : > { %v736_v15 = vmax.f32 %v734_v12, 0.0 }
  0xd1   : > { %v712_v10 = vpop.f32.mrf.mxu0 }
  0xd2   : > { %v713_v11 = vadd.f32 %v712_v10, %v699_v7 }
  0xd4   : > { %v729_v13 = vmul.f32 %v1120_v5, %v713_v11 }
  0xd6   : > { %v735_v14 = vadd.f32 %v1121_v9, %v729_v13 }
  0xd8   : > { %v737_v16 = vmax.f32 %v735_v14, 0.0 }
  0xda   : > { %v1093_v17 = vpack.c.bf16 %v737_v16, %v736_v15 }
  0xdc   : > { %1094 = vst [vmem:[%s283_s22] sm:$0xff] %v1093_v17  }
  0xdd PF: > { %s14_s17 = sadd.s32 1, %s1144_s17   ;;  %s1355_s15 = smov %s1140_s16 }
  0xde   : > { %p11_p5 = scmp.ge.s32.totalorder %s14_s17, 4   ;;  %s1356_s16 = smov %s1358_s18 }
  0xe0   :  { %13 = sbr.rel (!%p11_p5) target bundleno = 2 (0x2), region = 77 }

// kernel: a_unet_forward.36
= control target key start
LH: loop header
LB: loop body
LE: loop exit
PB: predicated region body
PF: predicated region fallthrough
CT: control target
= control target key end

     0   :  { %s1003_s15 = smov 0   ;;  %s1005_s16 = smov 0   ;;  %s1141_s0 = inlined_call_operand.vmem [shape: bf16[2,16,1152], index: 0, kind: input, shape index: {}]   ;;  %s1142_s1 = inlined_call_operand.vmem [shape: bf16[1152,128], index: 1, kind: input, shape index: {}]   ;;  %s1143_s2 = inlined_call_operand.vmem [shape: f32[1,128], index: 2, kind: input, shape index: {}]   ;;  %s1144_s3 = inlined_call_operand.vmem [shape: f32[1,128], index: 3, kind: input, shape index: {}]   ;;  %s1145_s4 = inlined_call_operand.vmem [shape: bf16[2,16,128], index: 4, kind: output, shape index: {}]  }
   0x1   :  { %s1007_s17 = smov 0   ;;  %s1009_s18 = smov 0  }
   0x2   :  { %s1011_s19 = smov 0   ;;  %s1013_s20 = smov 0  }
   0x3   :  { %s1015_s21 = smov 0  }
   0x4 LB: > { %s26_s22 = sadd.s32 1, %s967_s19  ;;  %s33_s23 = sadd.s32 1, %s971_s20  ;;  %s975_s21 = sphi %s1015_s21, %s14_s21   ;;  %s971_s20 = sphi %s1013_s20, %s1151_s20   ;;  %s967_s19 = sphi %s1011_s19, %s1150_s19   ;;  %s963_s18 = sphi %s1009_s18, %s1149_s18   ;;  %s959_s17 = sphi %s1007_s17, %s1148_s17   ;;  %s955_s16 = sphi %s1005_s16, %s1147_s16   ;;  %s951_s15 = sphi %s1003_s15, %s1146_s15  }
   0x5   : > { %p27_p0 = scmp.ge.s32.totalorder %s26_s22, 3  ;;  %p51_p1 = scmp.ne.s32.totalorder %s955_s16, %s951_s15 }
   0x6   : > { %p52_p2 = scmp.eq.s32.totalorder %s975_s21, 0  ;;  %s44_s27 = sadd.s32 1, %s955_s16 }
   0x7   : > { %s1153_s22 = smov (%p27_p0, %s26_s22), 0  ;;  %s1155_s23 = smov (!%p27_p0, %s33_s23), %s971_s20 }
   0x8   : > { %p53_p3 = por %p52_p2, %p51_p1  ;;  %p35_p4 = scmp.ge.s32.totalorder %s1155_s23, 2 }
   0x9   : > { %s40_s24 = ssub.s32 %s967_s19, %s1153_s22  ;;  %p704_p6 = scmp.ge.s32.totalorder %s975_s21, 6 }
   0xa   : > { %s1157_s23 = smov (%p35_p4, %s1155_s23), 0 }
   0xb   : > { %s37_s25 = ssub.s32 %s971_s20, %s1157_s23  ;;  %179 = sbr.rel (%p704_p6) target bundleno = 29 (0x1d), region = 24 }
   0xc   : > { %s41_s26 = sor.u32 %s40_s24, %s37_s25 }
   0xd   : > { %p42_p5 = scmp.eq.s32.totalorder %s41_s26, 0 }
   0xf   : > { %s1054_s28 = scalar_select %p42_p5, %s955_s16, %s44_s27  }
  0x10   : > { %182 = sbr.rel (!%p53_p3) target bundleno = 29 (0x1d), region = 28  ;;  %s184_s29 = sand.u32 (%p53_p3), 1, %s955_s16  }
  0x11   : > { %s188_s30 = smul.u32 (%p53_p3), 3, %s967_s19 }
  0x12   : > { %s859_s5 = smul.u32 (%p53_p3), 24, %s184_s29 }
  0x13   : > { %s860_s6 = smul.u32 (%p53_p3), 18, %s971_s20 }
  0x14   : > { %s186_s12 = scalar_lea.vmem (%p53_p3), [#allocation3], %s859_s5 }
  0x15   : > { %s192_s7 = sadd.s32 %s860_s6, %s188_s30 }
  0x16   : > { %s705_s8 = sshll.u32 %s192_s7, 2 }
  0x17   : > { %s194_s11 = scalar_lea.vmem %s1141_s0, %s705_s8 }
  0x18   : > { %v209_v0 = vld [vmem:[%s194_s11] sm:$0xff]  ;;  %v706_v2 = vld [vmem:[%s194_s11 + $0x8] sm:$0xf]  ;;  %v708_v3 = vld [vmem:[%s194_s11 + $0x2c] sm:$0xf] }
  0x19   : > { %v211_v1 = vld [vmem:[%s194_s11 + $0x24] sm:$0xff]  ;;  %210 = vst [vmem:[%s186_s12] sm:$0xff] %v209_v0 }
  0x1a   : > { %212 = vst [vmem:[%s186_s12 + $0xc] sm:$0xff] %v211_v1 }
  0x1b   : > { %707 = vst [vmem:[%s186_s12 + $0x8] sm:$0xf] %v706_v2 }
  0x1c   : > { %709 = vst [vmem:[%s186_s12 + $0x14] sm:$0xf] %v708_v3 }
  0x1d PF: > { %p710_p7 = scmp.ge.s32.totalorder %s975_s21, 1  ;;  %p238_p8 = scmp.lt.s32.totalorder %s975_s21, 7 }
  0x1f   : > { %p239_p9 = pnand %p710_p7, %p238_p8 }
  0x20   : > { %s245_s13 = sand.u32 (!%p239_p9), 1, %s951_s15   ;;  %s281_s14 = smul.u32 (!%p239_p9), 48, %s959_s17 }
  0x21   : > { %242 = sbr.rel (%p239_p9) target bundleno = 244 (0xf4), region = 58  ;;  %p288_p10 = scmp.lt.s32.totalorder (!%p239_p9), %s963_s18, 1 }
  0x22   : > { %s861_s24 = smul.u32 (!%p239_p9), 24, %s245_s13  ;;  %p282_p11 = scmp.lt.s32.totalorder (!%p239_p9), %s281_s14, 143 }
  0x23   : > { %p714_p12 = scmp.ne.s32.totalorder (!%p239_p9), %s959_s17, 0 }
  0x24   : > { %s1079_s8 = scalar_lea.vmem (!%p239_p9), [#allocation3], %s861_s24 }
  0x26   : > { %s1159_s14 = smov (!%p282_p11, %s281_s14), 143  ;;  %s1161_s18 = smov (!%p288_p10, %s963_s18), 1 }
  0x27   : > { %s711_s25 = sshll.u32 %s1159_s14, 2  ;;  %s826_s30 = sshll.u32 %s1161_s18, 3 }
  0x28   : > { %s1072_s29 = scalar_lea.vmem %s1142_s1, %s711_s25  ;;  %s1077_s7 = scalar_lea.vmem %s1145_s4, %s826_s30 }
  0x29   : > { %300 = sbr.rel (%p714_p12) target bundleno = 49 (0x31), region = 66 }
  0x2e   : > { %v977_v4 = vmov 0.0  }
  0x2f   : > { %301 = vst [vmem:[#allocation2] sm:$0xff] %v977_v4 }
  0x30   : > { %302 = vst [vmem:[#allocation2 + $0x8] sm:$0xff] %v977_v4 }
  0x31 PF: > { %v837_v5 = vld [vmem:[%s1072_s29 + $0x38] sm:$0xff]  ;;  %v836_v8 = vld [vmem:[%s1072_s29 + $0x30] sm:$0xff]  ;;  %v835_v11 = vld [vmem:[%s1072_s29 + $0x28] sm:$0xff]  ;;  %p823_p13 = scmp.ne.s32.totalorder %s959_s17, 2 }
  0x32   : > { %v845_v6 = vld [vmem:[%s1072_s29 + $0x78] sm:$0xff]  ;;  %517 = vmatpush.bf16.msra.mxu0 %v837_v5  ;;  %v844_v9 = vld [vmem:[%s1072_s29 + $0x70] sm:$0xff]  ;;  %v843_v12 = vld [vmem:[%s1072_s29 + $0x68] sm:$0xff] }
  0x33   : > { %v853_v7 = vld [vmem:[%s1072_s29 + $0xb8] sm:$0xff]  ;;  %531 = vmatpush.bf16.msra.mxu1 %v845_v6  ;;  %v852_v10 = vld [vmem:[%s1072_s29 + $0xb0] sm:$0xff]  ;;  %v851_v13 = vld [vmem:[%s1072_s29 + $0xa8] sm:$0xff] }
  0x34   : > { %545 = vmatpush.bf16.msra.mxu2 %v853_v7  ;;  %v834_v14 = vld [vmem:[%s1072_s29 + $0x20] sm:$0xff]  ;;  %v833_v17 = vld [vmem:[%s1072_s29 + $0x18] sm:$0xff]  ;;  %v832_v20 = vld [vmem:[%s1072_s29 + $0x10] sm:$0xff] }
  0x35   : > { %v842_v15 = vld [vmem:[%s1072_s29 + $0x60] sm:$0xff]  ;;  %v841_v18 = vld [vmem:[%s1072_s29 + $0x58] sm:$0xff]  ;;  %v840_v21 = vld [vmem:[%s1072_s29 + $0x50] sm:$0xff] }
  0x36   : > { %518 = vmatpush.bf16.msra.mxu0 %v836_v8  ;;  %v850_v16 = vld [vmem:[%s1072_s29 + $0xa0] sm:$0xff]  ;;  %v849_v19 = vld [vmem:[%s1072_s29 + $0x98] sm:$0xff]  ;;  %v848_v22 = vld [vmem:[%s1072_s29 + $0x90] sm:$0xff] }
  0x37   : > { %532 = vmatpush.bf16.msra.mxu1 %v844_v9  ;;  %v831_v23 = vld [vmem:[%s1072_s29 + $0x8] sm:$0xff]  ;;  %v830_v26 = vld [vmem:[%s1072_s29] sm:$0xff]  ;;  %v828_v29 = vld [vmem:[%s1079_s8 + $0x8] sm:$0xf0] }
  0x38   : > { %546 = vmatpush.bf16.msra.mxu2 %v852_v10  ;;  %v839_v24 = vld [vmem:[%s1072_s29 + $0x48] sm:$0xff]  ;;  %v838_v27 = vld [vmem:[%s1072_s29 + $0x40] sm:$0xff]  ;;  %v725_v33 = vld [vmem:[%s1079_s8 + $0x8] sm:$0xf] }
  0x39   : > { %v847_v25 = vld [vmem:[%s1072_s29 + $0x88] sm:$0xff]  ;;  %v719_v31 = vld [vmem:[%s1079_s8 + $0xc] sm:$0xf0]  ;;  %v829_v34 = vld [vmem:[%s1079_s8 + $0x10] sm:$0xf0] }
  0x3a   : > { %519 = vmatpush.bf16.msra.mxu0 %v835_v11  ;;  %v717_v28 = vld [vmem:[%s1079_s8] sm:$0xf]  ;;  %v827_v30 = vld [vmem:[%s1079_s8 + $0x4] sm:$0xf]  ;;  %v846_v32 = vld [vmem:[%s1072_s29 + $0x80] sm:$0xff]  ;;  %v726_v37 = vor.u32 %v829_v34, %v725_v33 }
  0x3b   : > { %533 = vmatpush.bf16.msra.mxu1 %v843_v12  ;;  %v718_v35 = vor.u32 %v828_v29, %v717_v28  ;;  %v722_v36 = vor.u32 %v827_v30, %v719_v31  ;;  %v303_v41 = vld [vmem:[#allocation2] sm:$0xff]  ;;  %v304_v48 = vld [vmem:[#allocation2 + $0x8] sm:$0xff] }
  0x3c   : > { %547 = vmatpush.bf16.msra.mxu2 %v851_v13 }
  0x3e   : > { %520 = vmatpush.bf16.msra.mxu0 %v834_v14 }
  0x3f   : > { %534 = vmatpush.bf16.msra.mxu1 %v842_v15 }
  0x40   : > { %548 = vmatpush.bf16.msra.mxu2 %v850_v16 }
  0x42   : > { %521 = vmatpush.bf16.msra.mxu0 %v833_v17 }
  0x43   : > { %535 = vmatpush.bf16.msra.mxu1 %v841_v18 }
  0x44   : > { %549 = vmatpush.bf16.msra.mxu2 %v849_v19 }
  0x46   : > { %522 = vmatpush.bf16.msra.mxu0 %v832_v20 }
  0x47   : > { %536 = vmatpush.bf16.msra.mxu1 %v840_v21 }
  0x48   : > { %550 = vmatpush.bf16.msra.mxu2 %v848_v22 }
  0x4a   : > { %523 = vmatpush.bf16.msra.mxu0 %v831_v23 }
  0x4b   : > { %537 = vmatpush.bf16.msra.mxu1 %v839_v24 }
  0x4c   : > { %551 = vmatpush.bf16.msra.mxu2 %v847_v25 }
  0x4e   : > { %524 = vmatpush.bf16.msra.mxu0 %v830_v26 }
  0x4f   : > { %538 = vmatpush.bf16.msra.mxu1 %v838_v27 }
  0x50   : > { %552 = vmatpush.bf16.msra.mxu2 %v846_v32 }
  0x51   : > { %525 = vmatmul.bf16.vlgmr.msra.gmra.mxu0 %v718_v35 }
  0x52   : > { %539 = vmatmul.bf16.vlgmr.msra.gmra.mxu1 %v722_v36 }
  0x53   : > { %553 = vmatmul.bf16.vlgmr.msra.gmra.mxu2 %v726_v37 }
  0xce   : > { %v526_v38 = vpop.f32.mrf.mxu0 }
  0xcf   : > { %v540_v39 = vpop.f32.mrf.mxu1 }
  0xd0   : > { %v541_v40 = vadd.f32 %v540_v39, %v526_v38 }
  0xd6   : > { %v554_v42 = vpop.f32.mrf.mxu2  ;;  %v528_v45 = vpop.f32.mrf.mxu0 }
  0xd7   : > { %v555_v43 = vadd.f32 %v554_v42, %v541_v40  ;;  %v542_v46 = vpop.f32.mrf.mxu1 }
  0xd8   : > { %v543_v47 = vadd.f32 %v542_v46, %v528_v45 }
  0xd9   : > { %v559_v44 = vadd.f32 %v555_v43, %v303_v41 }
  0xdb   : > { %561 = vst [vmem:[#allocation2] sm:$0xff] %v559_v44 }
  0xde   : > { %v556_v49 = vpop.f32.mrf.mxu2 }
  0xdf   : > { %v557_v50 = vadd.f32 %v556_v49, %v543_v47  ;;  %566 = sbr.rel (%p823_p13) target bundleno = 244 (0xf4), region = 70 }
  0xe1   : > { %v560_v51 = vadd.f32 %v557_v50, %v304_v48 }
  0xe3   : > { %562 = vst [vmem:[#allocation2 + $0x8] sm:$0xff] %v560_v51 }
  0xe4   : > { %v567_v52 = vld [vmem:[#allocation2] sm:$0xff] }
  0xe5   : > { %v919_v54 = vld [vmem:[%s1143_s2] ss:$0 sm:$0xff] }
  0xe6   : > { %v920_v55 = vld [vmem:[%s1144_s3] ss:$0 sm:$0xff]  ;;  %v573_v56 = vmul.f32 %v919_v54, %v567_v52 }
  0xe8   : > { %v579_v58 = vadd.f32 %v920_v55, %v573_v56 }
  0xea   : > { %v568_v53 = vld [vmem:[#allocation2 + $0x8] sm:$0xff]  ;;  %v581_v60 = vmax.f32 %v579_v58, 0.0 }
  0xeb   : > { %v574_v57 = vmul.f32 %v919_v54, %v568_v53 }
  0xed   : > { %v580_v59 = vadd.f32 %v920_v55, %v574_v57 }
  0xef   : > { %v582_v61 = vmax.f32 %v580_v59, 0.0 }
  0xf1   : > { %v857_v62 = vpack.c.bf16 %v582_v61, %v581_v60 }
  0xf3   : > { %858 = vst [vmem:[%s1077_s7] sm:$0xff] %v857_v62  }
  0xf4 PF: > { %s14_s21 = sadd.s32 1, %s975_s21   ;;  %s1146_s15 = smov %s955_s16 }
  0xf5   : > { %p11_p0 = scmp.ge.s32.totalorder %s14_s21, 8   ;;  %s1147_s16 = smov %s1054_s28 }
  0xf6   : > { %s1148_s17 = smov %s967_s19  ;;  %s1149_s18 = smov %s971_s20 }
  0xf7   : > { %s1150_s19 = smov %s1153_s22  ;;  %s1151_s20 = smov %s1157_s23 }
  0xf8   :  { %13 = sbr.rel (!%p11_p0) target bundleno = 4 (0x4), region = 114 }

// kernel: a_unet_forward.41
= control target key start
LH: loop header
LB: loop body
LE: loop exit
PB: predicated region body
PF: predicated region fallthrough
CT: control target
= control target key end

     0   :  { %s1149_s15 = smov 0   ;;  %s1151_s16 = smov 0   ;;  %s1310_s0 = inlined_call_operand.vmem [shape: bf16[2,64,384], index: 0, kind: input, shape index: {}]   ;;  %s1311_s1 = inlined_call_operand.vmem [shape: bf16[384,128], index: 1, kind: input, shape index: {}]   ;;  %s1312_s2 = inlined_call_operand.vmem [shape: f32[1,128], index: 2, kind: input, shape index: {}]   ;;  %s1313_s3 = inlined_call_operand.vmem [shape: f32[1,128], index: 3, kind: input, shape index: {}]   ;;  %s1314_s4 = inlined_call_operand.vmem [shape: bf16[2,64,128], index: 4, kind: output, shape index: {}]  }
   0x1   :  { %s1153_s17 = smov 0  }
   0x2 LB: > { %s33_s18 = sadd.s32 1, %s1118_s16  ;;  %p855_p0 = scmp.ge.s32.totalorder %s1122_s17, 1  ;;  %s1122_s17 = sphi %s1153_s17, %s14_s17   ;;  %s1118_s16 = sphi %s1151_s16, %s1316_s16   ;;  %s1114_s15 = sphi %s1149_s15, %s1315_s15  }
   0x3   : > { %p35_p1 = scmp.ge.s32.totalorder %s33_s18, 2  ;;  %p209_p2 = scmp.lt.s32.totalorder %s1122_s17, 3 }
   0x5   : > { %s1318_s18 = smov (%p35_p1, %s33_s18), 0  ;;  %p210_p3 = pnand %p855_p0, %p209_p2 }
   0x6   : > { %p255_p4 = scmp.lt.s32.totalorder (!%p210_p3), %s1114_s15, 1 }
   0x7   : > { %213 = sbr.rel (%p210_p3) target bundleno = 245 (0xf5), region = 36 }
   0xc   : > { %v1025_v0 = vld [vmem:[%s1311_s1 + $0x38] sm:$0xff]  ;;  %v1024_v3 = vld [vmem:[%s1311_s1 + $0x30] sm:$0xff]  ;;  %v1023_v6 = vld [vmem:[%s1311_s1 + $0x28] sm:$0xff]  ;;  %s1320_s15 = smov (!%p255_p4, %s1114_s15), 1 }
   0xd   : > { %v1033_v1 = vld [vmem:[%s1311_s1 + $0x78] sm:$0xff]  ;;  %577 = vmatpush.bf16.msra.mxu0 %v1025_v0  ;;  %v1032_v4 = vld [vmem:[%s1311_s1 + $0x70] sm:$0xff]  ;;  %1065 = vmatpush.bf16.msra.mxu3 %v1025_v0  ;;  %v1031_v7 = vld [vmem:[%s1311_s1 + $0x68] sm:$0xff]  ;;  %s1073_s5 = smul.u32 96, %s1320_s15 }
   0xe   : > { %v1041_v2 = vld [vmem:[%s1311_s1 + $0xb8] sm:$0xff]  ;;  %606 = vmatpush.bf16.msra.mxu1 %v1033_v1  ;;  %v1040_v5 = vld [vmem:[%s1311_s1 + $0xb0] sm:$0xff]  ;;  %v1039_v8 = vld [vmem:[%s1311_s1 + $0xa8] sm:$0xff] }
   0xf   : > { %635 = vmatpush.bf16.msra.mxu2 %v1041_v2  ;;  %v1022_v9 = vld [vmem:[%s1311_s1 + $0x20] sm:$0xff]  ;;  %v1021_v12 = vld [vmem:[%s1311_s1 + $0x18] sm:$0xff]  ;;  %v1020_v15 = vld [vmem:[%s1311_s1 + $0x10] sm:$0xff]  ;;  %s1237_s14 = scalar_lea.vmem %s1310_s0, %s1073_s5  ;;  %s1005_s5 = sshll.u32 %s1320_s15, 5 }
  0x10   : > { %v1030_v10 = vld [vmem:[%s1311_s1 + $0x60] sm:$0xff]  ;;  %v1029_v13 = vld [vmem:[%s1311_s1 + $0x58] sm:$0xff]  ;;  %v1028_v16 = vld [vmem:[%s1311_s1 + $0x50] sm:$0xff]  ;;  %s1289_s8 = scalar_lea.vmem %s1314_s4, %s1005_s5 }
  0x11   : > { %578 = vmatpush.bf16.msra.mxu0 %v1024_v3  ;;  %1066 = vmatpush.bf16.msra.mxu3 %v1024_v3  ;;  %v1038_v11 = vld [vmem:[%s1311_s1 + $0xa0] sm:$0xff]  ;;  %v1037_v14 = vld [vmem:[%s1311_s1 + $0x98] sm:$0xff]  ;;  %v1036_v17 = vld [vmem:[%s1311_s1 + $0x90] sm:$0xff] }
  0x12   : > { %607 = vmatpush.bf16.msra.mxu1 %v1032_v4  ;;  %v1019_v18 = vld [vmem:[%s1311_s1 + $0x8] sm:$0xff]  ;;  %v1018_v21 = vld [vmem:[%s1311_s1] sm:$0xff]  ;;  %v863_v27 = vld [vmem:[%s1237_s14 + $0xc] sm:$0xf0] }
  0x13   : > { %636 = vmatpush.bf16.msra.mxu2 %v1040_v5  ;;  %v1027_v19 = vld [vmem:[%s1311_s1 + $0x48] sm:$0xff]  ;;  %v1026_v22 = vld [vmem:[%s1311_s1 + $0x40] sm:$0xff]  ;;  %v1008_v29 = vld [vmem:[%s1237_s14 + $0x10] sm:$0xf0] }
  0x14   : > { %v1035_v20 = vld [vmem:[%s1311_s1 + $0x88] sm:$0xff]  ;;  %v1034_v23 = vld [vmem:[%s1311_s1 + $0x80] sm:$0xff]  ;;  %v873_v30 = vld [vmem:[%s1237_s14 + $0x18] sm:$0xf] }
  0x15   : > { %579 = vmatpush.bf16.msra.mxu0 %v1023_v6  ;;  %1067 = vmatpush.bf16.msra.mxu3 %v1023_v6  ;;  %v861_v24 = vld [vmem:[%s1237_s14] sm:$0xf]  ;;  %v1007_v25 = vld [vmem:[%s1237_s14 + $0x8] sm:$0xf0]  ;;  %v1006_v26 = vld [vmem:[%s1237_s14 + $0x4] sm:$0xf] }
  0x16   : > { %608 = vmatpush.bf16.msra.mxu1 %v1031_v7  ;;  %v869_v28 = vld [vmem:[%s1237_s14 + $0x8] sm:$0xf]  ;;  %v1010_v31 = vld [vmem:[%s1237_s14 + $0x20] sm:$0xf0]  ;;  %v862_v32 = vor.u32 %v1007_v25, %v861_v24  ;;  %v866_v33 = vor.u32 %v1006_v26, %v863_v27  ;;  %v1009_v36 = vld [vmem:[%s1237_s14 + $0x1c] sm:$0xf] }
  0x17   : > { %637 = vmatpush.bf16.msra.mxu2 %v1039_v8  ;;  %v870_v34 = vor.u32 %v1008_v29, %v869_v28  ;;  %v874_v35 = vor.u32 %v1010_v31, %v873_v30  ;;  %v875_v37 = vld [vmem:[%s1237_s14 + $0x24] sm:$0xf0]  ;;  %v881_v38 = vld [vmem:[%s1237_s14 + $0x20] sm:$0xf]  ;;  %v1011_v39 = vld [vmem:[%s1237_s14 + $0x28] sm:$0xf0] }
  0x18   : > { %v885_v40 = vld [vmem:[%s1237_s14 + $0x30] sm:$0xf]  ;;  %v1013_v41 = vld [vmem:[%s1237_s14 + $0x38] sm:$0xf0]  ;;  %v878_v42 = vor.u32 %v1009_v36, %v875_v37  ;;  %v882_v43 = vor.u32 %v1011_v39, %v881_v38  ;;  %v1012_v45 = vld [vmem:[%s1237_s14 + $0x34] sm:$0xf] }
  0x19   : > { %580 = vmatpush.bf16.msra.mxu0 %v1022_v9  ;;  %1068 = vmatpush.bf16.msra.mxu3 %v1022_v9  ;;  %v886_v44 = vor.u32 %v1013_v41, %v885_v40  ;;  %v887_v46 = vld [vmem:[%s1237_s14 + $0x3c] sm:$0xf0]  ;;  %v893_v47 = vld [vmem:[%s1237_s14 + $0x38] sm:$0xf]  ;;  %v1014_v48 = vld [vmem:[%s1237_s14 + $0x40] sm:$0xf0] }
  0x1a   : > { %609 = vmatpush.bf16.msra.mxu1 %v1030_v10  ;;  %v897_v49 = vld [vmem:[%s1237_s14 + $0x48] sm:$0xf]  ;;  %v1016_v50 = vld [vmem:[%s1237_s14 + $0x50] sm:$0xf0]  ;;  %v890_v51 = vor.u32 %v1012_v45, %v887_v46  ;;  %v894_v52 = vor.u32 %v1014_v48, %v893_v47  ;;  %v1015_v54 = vld [vmem:[%s1237_s14 + $0x4c] sm:$0xf] }
  0x1b   : > { %638 = vmatpush.bf16.msra.mxu2 %v1038_v11  ;;  %v898_v53 = vor.u32 %v1016_v50, %v897_v49  ;;  %v899_v55 = vld [vmem:[%s1237_s14 + $0x54] sm:$0xf0]  ;;  %v905_v56 = vld [vmem:[%s1237_s14 + $0x50] sm:$0xf]  ;;  %v1017_v57 = vld [vmem:[%s1237_s14 + $0x58] sm:$0xf0] }
  0x1c   : > { %v902_v58 = vor.u32 %v1015_v54, %v899_v55  ;;  %v906_v59 = vor.u32 %v1017_v57, %v905_v56  ;;  %v1278_v2 = vld [vmem:[%s1312_s2] ss:$0 sm:$0xff] }
  0x1d   : > { %581 = vmatpush.bf16.msra.mxu0 %v1021_v12  ;;  %1069 = vmatpush.bf16.msra.mxu3 %v1021_v12  ;;  %v1099_v6 = vld [vmem:[%s1313_s3] ss:$0 sm:$0xff] }
  0x1e   : > { %610 = vmatpush.bf16.msra.mxu1 %v1029_v13 }
  0x1f   : > { %639 = vmatpush.bf16.msra.mxu2 %v1037_v14 }
  0x21   : > { %582 = vmatpush.bf16.msra.mxu0 %v1020_v15  ;;  %1070 = vmatpush.bf16.msra.mxu3 %v1020_v15 }
  0x22   : > { %611 = vmatpush.bf16.msra.mxu1 %v1028_v16 }
  0x23   : > { %640 = vmatpush.bf16.msra.mxu2 %v1036_v17 }
  0x25   : > { %583 = vmatpush.bf16.msra.mxu0 %v1019_v18  ;;  %1071 = vmatpush.bf16.msra.mxu3 %v1019_v18 }
  0x26   : > { %612 = vmatpush.bf16.msra.mxu1 %v1027_v19 }
  0x27   : > { %641 = vmatpush.bf16.msra.mxu2 %v1035_v20 }
  0x29   : > { %584 = vmatpush.bf16.msra.mxu0 %v1018_v21  ;;  %1072 = vmatpush.bf16.msra.mxu3 %v1018_v21 }
  0x2a   : > { %613 = vmatpush.bf16.msra.mxu1 %v1026_v22 }
  0x2b   : > { %642 = vmatpush.bf16.msra.mxu2 %v1034_v23 }
  0x2c   : > { %585 = vmatmul.bf16.vlgmr.msra.gmra.mxu0 %v862_v32  ;;  %590 = vmatmul.bf16.vlgmr.msra.gmra.mxu3 %v874_v35 }
  0x2d   : > { %614 = vmatmul.bf16.vlgmr.msra.gmra.mxu1 %v866_v33 }
  0x2e   : > { %643 = vmatmul.bf16.vlgmr.msra.gmra.mxu2 %v870_v34 }
  0x3c   : > { %595 = vmatmul.bf16.gmra.mxu3 %v886_v44 }
  0x3d   : > { %619 = vmatmul.bf16.gmra.mxu1 %v878_v42 }
  0x3e   : > { %648 = vmatmul.bf16.gmra.mxu2 %v882_v43 }
  0x4c   : > { %600 = vmatmul.bf16.gmra.mxu3 %v898_v53 }
  0x4d   : > { %624 = vmatmul.bf16.gmra.mxu1 %v890_v51 }
  0x4e   : > { %653 = vmatmul.bf16.gmra.mxu2 %v894_v52 }
  0x5d   : > { %629 = vmatmul.bf16.gmra.mxu1 %v902_v58 }
  0x5e   : > { %658 = vmatmul.bf16.gmra.mxu2 %v906_v59 }
  0xa9   : > { %v586_v61 = vpop.f32.mrf.mxu0 }
  0xaa   : > { %v615_v60 = vpop.f32.mrf.mxu1 }
  0xab   : > { %v616_v62 = vadd.f32 %v615_v60, %v586_v61 }
  0xaf   : > { %v591_v4 = vpop.f32.mrf.mxu3 }
  0xb1   : > { %v644_v63 = vpop.f32.mrf.mxu2  ;;  %v588_v3 = vpop.f32.mrf.mxu0 }
  0xb2   : > { %v617_v0 = vpop.f32.mrf.mxu1  ;;  %v645_v1 = vadd.f32 %v644_v63, %v616_v62 }
  0xb3   : > { %v618_v7 = vadd.f32 %v617_v0, %v588_v3 }
  0xb4   : > { %v695_v5 = vmul.f32 %v1278_v2, %v645_v1 }
  0xb6   : > { %v707_v11 = vadd.f32 %v1099_v6, %v695_v5 }
  0xb7   : > { %v593_v14 = vpop.f32.mrf.mxu3 }
  0xb8   : > { %v715_v15 = vmax.f32 %v707_v11, 0.0 }
  0xb9   : > { %v646_v8 = vpop.f32.mrf.mxu2 }
  0xba   : > { %v647_v9 = vadd.f32 %v646_v8, %v618_v7  ;;  %v620_v10 = vpop.f32.mrf.mxu1 }
  0xbb   : > { %v621_v17 = vadd.f32 %v620_v10, %v591_v4 }
  0xbc   : > { %v696_v12 = vmul.f32 %v1278_v2, %v647_v9 }
  0xbe   : > { %v708_v13 = vadd.f32 %v1099_v6, %v696_v12 }
  0xbf   : > { %v596_v24 = vpop.f32.mrf.mxu3 }
  0xc0   : > { %v716_v16 = vmax.f32 %v708_v13, 0.0 }
  0xc1   : > { %v649_v18 = vpop.f32.mrf.mxu2 }
  0xc2   : > { %v1045_v19 = vpack.c.bf16 %v716_v16, %v715_v15  ;;  %v622_v20 = vpop.f32.mrf.mxu1  ;;  %v650_v21 = vadd.f32 %v649_v18, %v621_v17 }
  0xc3   : > { %v623_v23 = vadd.f32 %v622_v20, %v593_v14 }
  0xc4   : > { %1046 = vst [vmem:[%s1289_s8] sm:$0xff] %v1045_v19   ;;  %v697_v22 = vmul.f32 %v1278_v2, %v650_v21 }
  0xc6   : > { %v709_v28 = vadd.f32 %v1099_v6, %v697_v22 }
  0xc7   : > { %v598_v37 = vpop.f32.mrf.mxu3 }
  0xc8   : > { %v717_v31 = vmax.f32 %v709_v28, 0.0 }
  0xc9   : > { %v651_v25 = vpop.f32.mrf.mxu2 }
  0xca   : > { %v652_v26 = vadd.f32 %v651_v25, %v623_v23  ;;  %v625_v27 = vpop.f32.mrf.mxu1 }
  0xcb   : > { %v626_v33 = vadd.f32 %v625_v27, %v596_v24 }
  0xcc   : > { %v698_v29 = vmul.f32 %v1278_v2, %v652_v26 }
  0xce   : > { %v710_v30 = vadd.f32 %v1099_v6, %v698_v29 }
  0xcf   : > { %v601_v46 = vpop.f32.mrf.mxu3 }
  0xd0   : > { %v718_v32 = vmax.f32 %v710_v30, 0.0 }
  0xd1   : > { %v654_v34 = vpop.f32.mrf.mxu2 }
  0xd2   : > { %v1050_v35 = vpack.c.bf16 %v718_v32, %v717_v31  ;;  %v627_v36 = vpop.f32.mrf.mxu1  ;;  %v655_v38 = vadd.f32 %v654_v34, %v626_v33 }
  0xd3   : > { %v628_v40 = vadd.f32 %v627_v36, %v598_v37 }
  0xd4   : > { %1062 = vst [vmem:[%s1289_s8 + $0x8] sm:$0xff] %v1050_v35   ;;  %v699_v39 = vmul.f32 %v1278_v2, %v655_v38 }
  0xd6   : > { %v711_v44 = vadd.f32 %v1099_v6, %v699_v39 }
  0xd7   : > { %v603_v55 = vpop.f32.mrf.mxu3 }
  0xd8   : > { %v719_v48 = vmax.f32 %v711_v44, 0.0 }
  0xd9   : > { %v656_v41 = vpop.f32.mrf.mxu2 }
  0xda   : > { %v657_v42 = vadd.f32 %v656_v41, %v628_v40  ;;  %v630_v43 = vpop.f32.mrf.mxu1 }
  0xdb   : > { %v631_v50 = vadd.f32 %v630_v43, %v601_v46 }
  0xdc   : > { %v700_v45 = vmul.f32 %v1278_v2, %v657_v42 }
  0xde   : > { %v712_v47 = vadd.f32 %v1099_v6, %v700_v45 }
  0xe0   : > { %v720_v49 = vmax.f32 %v712_v47, 0.0 }
  0xe1   : > { %v659_v51 = vpop.f32.mrf.mxu2 }
  0xe2   : > { %v1055_v52 = vpack.c.bf16 %v720_v49, %v719_v48  ;;  %v660_v53 = vadd.f32 %v659_v51, %v631_v50  ;;  %v632_v54 = vpop.f32.mrf.mxu1 }
  0xe3   : > { %v633_v57 = vadd.f32 %v632_v54, %v603_v55 }
  0xe4   : > { %1063 = vst [vmem:[%s1289_s8 + $0x10] sm:$0xff] %v1055_v52   ;;  %v701_v56 = vmul.f32 %v1278_v2, %v660_v53 }
  0xe6   : > { %v713_v60 = vadd.f32 %v1099_v6, %v701_v56 }
  0xe8   : > { %v721_v63 = vmax.f32 %v713_v60, 0.0 }
  0xe9   : > { %v661_v58 = vpop.f32.mrf.mxu2 }
  0xea   : > { %v662_v59 = vadd.f32 %v661_v58, %v633_v57 }
  0xec   : > { %v702_v61 = vmul.f32 %v1278_v2, %v662_v59 }
  0xee   : > { %v714_v62 = vadd.f32 %v1099_v6, %v702_v61 }
  0xf0   : > { %v722_v0 = vmax.f32 %v714_v62, 0.0 }
  0xf2   : > { %v1060_v1 = vpack.c.bf16 %v722_v0, %v721_v63 }
  0xf4   : > { %1064 = vst [vmem:[%s1289_s8 + $0x18] sm:$0xff] %v1060_v1  }
  0xf5 PF: > { %s14_s17 = sadd.s32 1, %s1122_s17   ;;  %s1315_s15 = smov %s1118_s16 }
  0xf6   : > { %p11_p5 = scmp.ge.s32.totalorder %s14_s17, 4   ;;  %s1316_s16 = smov %s1318_s18 }
  0xf8   :  { %13 = sbr.rel (!%p11_p5) target bundleno = 2 (0x2), region = 77 }

// kernel: a_unet_forward.43
= control target key start
LH: loop header
LB: loop body
LE: loop exit
PB: predicated region body
PF: predicated region fallthrough
CT: control target
= control target key end

     0   :  { %s1669_s15 = smov 0   ;;  %s1671_s16 = smov 0   ;;  %s1916_s0 = inlined_call_operand.vmem [shape: bf16[2,256,256], index: 0, kind: input, shape index: {}]   ;;  %s1917_s1 = inlined_call_operand.vmem [shape: bf16[256,128], index: 1, kind: input, shape index: {}]   ;;  %s1918_s2 = inlined_call_operand.vmem [shape: f32[1,128], index: 2, kind: input, shape index: {}]   ;;  %s1919_s3 = inlined_call_operand.vmem [shape: f32[1,128], index: 3, kind: input, shape index: {}]   ;;  %s1920_s4 = inlined_call_operand.vmem [shape: bf16[2,256,128], index: 4, kind: output, shape index: {}]  }
   0x1   :  { %s1673_s17 = smov 0  }
   0x2 LB: > { %s33_s18 = sadd.s32 1, %s1638_s16  ;;  %p1234_p0 = scmp.ge.s32.totalorder %s1642_s17, 1  ;;  %s1642_s17 = sphi %s1673_s17, %s14_s17   ;;  %s1638_s16 = sphi %s1671_s16, %s1922_s16   ;;  %s1634_s15 = sphi %s1669_s15, %s1921_s15  }
   0x3   : > { %p35_p1 = scmp.ge.s32.totalorder %s33_s18, 2  ;;  %p209_p2 = scmp.lt.s32.totalorder %s1642_s17, 3 }
   0x5   : > { %s1924_s18 = smov (%p35_p1, %s33_s18), 0  ;;  %p210_p3 = pnand %p1234_p0, %p209_p2 }
   0x6   : > { %p255_p4 = scmp.lt.s32.totalorder (!%p210_p3), %s1634_s15, 1 }
   0x7   : > { %213 = sbr.rel (%p210_p3) target bundleno = 308 (0x134), region = 36 }
   0xc   : > { %v1474_v0 = vld [vmem:[%s1917_s1 + $0x38] sm:$0xff]  ;;  %v1473_v2 = vld [vmem:[%s1917_s1 + $0x30] sm:$0xff]  ;;  %v1472_v4 = vld [vmem:[%s1917_s1 + $0x28] sm:$0xff]  ;;  %s1926_s15 = smov (!%p255_p4, %s1634_s15), 1 }
   0xd   : > { %v1482_v1 = vld [vmem:[%s1917_s1 + $0x78] sm:$0xff]  ;;  %673 = vmatpush.bf16.msra.mxu0 %v1474_v0  ;;  %1578 = vmatpush.bf16.msra.mxu2 %v1474_v0  ;;  %v1481_v3 = vld [vmem:[%s1917_s1 + $0x70] sm:$0xff]  ;;  %v1480_v5 = vld [vmem:[%s1917_s1 + $0x68] sm:$0xff]  ;;  %s1433_s21 = sshll.u32 %s1926_s15, 8  ;;  %s1434_s11 = sshll.u32 %s1926_s15, 7 }
   0xe   : > { %762 = vmatpush.bf16.msra.mxu1 %v1482_v1  ;;  %1586 = vmatpush.bf16.msra.mxu3 %v1482_v1  ;;  %v1471_v6 = vld [vmem:[%s1917_s1 + $0x20] sm:$0xff]  ;;  %v1470_v8 = vld [vmem:[%s1917_s1 + $0x18] sm:$0xff]  ;;  %v1469_v10 = vld [vmem:[%s1917_s1 + $0x10] sm:$0xff]  ;;  %s1736_s26 = scalar_lea.vmem %s1916_s0, %s1433_s21  ;;  %s1830_s14 = scalar_lea.vmem %s1920_s4, %s1434_s11 }
   0xf   : > { %v1479_v7 = vld [vmem:[%s1917_s1 + $0x60] sm:$0xff]  ;;  %v1478_v9 = vld [vmem:[%s1917_s1 + $0x58] sm:$0xff]  ;;  %v1477_v11 = vld [vmem:[%s1917_s1 + $0x50] sm:$0xff] }
  0x10   : > { %v1468_v12 = vld [vmem:[%s1917_s1 + $0x8] sm:$0xff]  ;;  %v1467_v14 = vld [vmem:[%s1917_s1] sm:$0xff]  ;;  %v1249_v28 = vld [vmem:[%s1736_s26 + $0x10] sm:$0xf] }
  0x11   : > { %674 = vmatpush.bf16.msra.mxu0 %v1473_v2  ;;  %1579 = vmatpush.bf16.msra.mxu2 %v1473_v2  ;;  %v1476_v13 = vld [vmem:[%s1917_s1 + $0x48] sm:$0xff]  ;;  %v1475_v15 = vld [vmem:[%s1917_s1 + $0x40] sm:$0xff]  ;;  %v1438_v29 = vld [vmem:[%s1736_s26 + $0x14] sm:$0xf0] }
  0x12   : > { %763 = vmatpush.bf16.msra.mxu1 %v1481_v3  ;;  %1587 = vmatpush.bf16.msra.mxu3 %v1481_v3  ;;  %v1241_v16 = vld [vmem:[%s1736_s26] sm:$0xf]  ;;  %v1436_v17 = vld [vmem:[%s1736_s26 + $0x4] sm:$0xf0]  ;;  %v1435_v20 = vld [vmem:[%s1736_s26 + $0x4] sm:$0xf]  ;;  %v1250_v36 = vor.u32 %v1438_v29, %v1249_v28 }
  0x13   : > { %v1305_v18 = vld [vmem:[%s1736_s26 + $0x80] sm:$0xf]  ;;  %v1452_v19 = vld [vmem:[%s1736_s26 + $0x84] sm:$0xf0]  ;;  %v1243_v21 = vld [vmem:[%s1736_s26 + $0x8] sm:$0xf0]  ;;  %v1242_v24 = vor.u32 %v1436_v17, %v1241_v16 }
  0x14   : > { %v1451_v22 = vld [vmem:[%s1736_s26 + $0x84] sm:$0xf]  ;;  %v1307_v23 = vld [vmem:[%s1736_s26 + $0x88] sm:$0xf0]  ;;  %v1306_v25 = vor.u32 %v1452_v19, %v1305_v18  ;;  %v1246_v26 = vor.u32 %v1435_v20, %v1243_v21  ;;  %v1313_v30 = vld [vmem:[%s1736_s26 + $0x90] sm:$0xf] }
  0x15   : > { %675 = vmatpush.bf16.msra.mxu0 %v1472_v4  ;;  %1580 = vmatpush.bf16.msra.mxu2 %v1472_v4  ;;  %v1310_v27 = vor.u32 %v1451_v22, %v1307_v23  ;;  %v1454_v31 = vld [vmem:[%s1736_s26 + $0x94] sm:$0xf0]  ;;  %v1437_v32 = vld [vmem:[%s1736_s26 + $0x14] sm:$0xf]  ;;  %v1251_v33 = vld [vmem:[%s1736_s26 + $0x18] sm:$0xf0] }
  0x16   : > { %764 = vmatpush.bf16.msra.mxu1 %v1480_v5  ;;  %1588 = vmatpush.bf16.msra.mxu3 %v1480_v5  ;;  %v1453_v34 = vld [vmem:[%s1736_s26 + $0x94] sm:$0xf]  ;;  %v1315_v35 = vld [vmem:[%s1736_s26 + $0x98] sm:$0xf0]  ;;  %v1314_v37 = vor.u32 %v1454_v31, %v1313_v30  ;;  %v1254_v38 = vor.u32 %v1437_v32, %v1251_v33  ;;  %v1257_v40 = vld [vmem:[%s1736_s26 + $0x20] sm:$0xf] }
  0x17   : > { %v1318_v39 = vor.u32 %v1453_v34, %v1315_v35  ;;  %v1440_v41 = vld [vmem:[%s1736_s26 + $0x24] sm:$0xf0]  ;;  %v1321_v42 = vld [vmem:[%s1736_s26 + $0xa0] sm:$0xf]  ;;  %v1439_v44 = vld [vmem:[%s1736_s26 + $0x24] sm:$0xf] }
  0x18   : > { %v1456_v43 = vld [vmem:[%s1736_s26 + $0xa4] sm:$0xf0]  ;;  %v1259_v45 = vld [vmem:[%s1736_s26 + $0x28] sm:$0xf0]  ;;  %v1455_v46 = vld [vmem:[%s1736_s26 + $0xa4] sm:$0xf]  ;;  %v1258_v48 = vor.u32 %v1440_v41, %v1257_v40 }
  0x19   : > { %676 = vmatpush.bf16.msra.mxu0 %v1471_v6  ;;  %1581 = vmatpush.bf16.msra.mxu2 %v1471_v6  ;;  %v1323_v47 = vld [vmem:[%s1736_s26 + $0xa8] sm:$0xf0]  ;;  %v1322_v49 = vor.u32 %v1456_v43, %v1321_v42  ;;  %v1262_v50 = vor.u32 %v1439_v44, %v1259_v45  ;;  %v1265_v52 = vld [vmem:[%s1736_s26 + $0x30] sm:$0xf]  ;;  %v1442_v53 = vld [vmem:[%s1736_s26 + $0x34] sm:$0xf0] }
  0x1a   : > { %765 = vmatpush.bf16.msra.mxu1 %v1479_v7  ;;  %1589 = vmatpush.bf16.msra.mxu3 %v1479_v7  ;;  %v1326_v51 = vor.u32 %v1455_v46, %v1323_v47  ;;  %v1329_v54 = vld [vmem:[%s1736_s26 + $0xb0] sm:$0xf]  ;;  %v1458_v55 = vld [vmem:[%s1736_s26 + $0xb4] sm:$0xf0]  ;;  %v1441_v56 = vld [vmem:[%s1736_s26 + $0x34] sm:$0xf]  ;;  %v1266_v60 = vor.u32 %v1442_v53, %v1265_v52 }
  0x1b   : > { %v1267_v57 = vld [vmem:[%s1736_s26 + $0x38] sm:$0xf0]  ;;  %v1457_v58 = vld [vmem:[%s1736_s26 + $0xb4] sm:$0xf]  ;;  %v1330_v61 = vor.u32 %v1458_v55, %v1329_v54  ;;  %v1273_v0 = vld [vmem:[%s1736_s26 + $0x40] sm:$0xf] }
  0x1c   : > { %v1331_v59 = vld [vmem:[%s1736_s26 + $0xb8] sm:$0xf0]  ;;  %v1270_v62 = vor.u32 %v1441_v56, %v1267_v57  ;;  %v1444_v1 = vld [vmem:[%s1736_s26 + $0x44] sm:$0xf0]  ;;  %v1337_v2 = vld [vmem:[%s1736_s26 + $0xc0] sm:$0xf] }
  0x1d   : > { %677 = vmatpush.bf16.msra.mxu0 %v1470_v8  ;;  %1582 = vmatpush.bf16.msra.mxu2 %v1470_v8  ;;  %v1334_v63 = vor.u32 %v1457_v58, %v1331_v59  ;;  %v1460_v3 = vld [vmem:[%s1736_s26 + $0xc4] sm:$0xf0]  ;;  %v1443_v4 = vld [vmem:[%s1736_s26 + $0x44] sm:$0xf]  ;;  %v1275_v5 = vld [vmem:[%s1736_s26 + $0x48] sm:$0xf0]  ;;  %v1274_v8 = vor.u32 %v1444_v1, %v1273_v0 }
  0x1e   : > { %766 = vmatpush.bf16.msra.mxu1 %v1478_v9  ;;  %1590 = vmatpush.bf16.msra.mxu3 %v1478_v9  ;;  %v1459_v6 = vld [vmem:[%s1736_s26 + $0xc4] sm:$0xf]  ;;  %v1339_v7 = vld [vmem:[%s1736_s26 + $0xc8] sm:$0xf0]  ;;  %v1338_v9 = vor.u32 %v1460_v3, %v1337_v2  ;;  %v1445_v16 = vld [vmem:[%s1736_s26 + $0x54] sm:$0xf] }
  0x1f   : > { %v1283_v17 = vld [vmem:[%s1736_s26 + $0x58] sm:$0xf0]  ;;  %v1461_v18 = vld [vmem:[%s1736_s26 + $0xd4] sm:$0xf]  ;;  %v1447_v28 = vld [vmem:[%s1736_s26 + $0x64] sm:$0xf] }
  0x20   : > { %v1347_v19 = vld [vmem:[%s1736_s26 + $0xd8] sm:$0xf0]  ;;  %v1286_v22 = vor.u32 %v1445_v16, %v1283_v17  ;;  %v1291_v29 = vld [vmem:[%s1736_s26 + $0x68] sm:$0xf0]  ;;  %v1463_v30 = vld [vmem:[%s1736_s26 + $0xe4] sm:$0xf] }
  0x21   : > { %678 = vmatpush.bf16.msra.mxu0 %v1469_v10  ;;  %1583 = vmatpush.bf16.msra.mxu2 %v1469_v10  ;;  %v1278_v10 = vor.u32 %v1443_v4, %v1275_v5  ;;  %v1350_v23 = vor.u32 %v1461_v18, %v1347_v19  ;;  %v1355_v31 = vld [vmem:[%s1736_s26 + $0xe8] sm:$0xf0]  ;;  %v1294_v34 = vor.u32 %v1447_v28, %v1291_v29  ;;  %v1449_v40 = vld [vmem:[%s1736_s26 + $0x74] sm:$0xf]  ;;  %v1299_v41 = vld [vmem:[%s1736_s26 + $0x78] sm:$0xf0] }
  0x22   : > { %767 = vmatpush.bf16.msra.mxu1 %v1477_v11  ;;  %1591 = vmatpush.bf16.msra.mxu3 %v1477_v11  ;;  %v1342_v11 = vor.u32 %v1459_v6, %v1339_v7  ;;  %v1358_v35 = vor.u32 %v1463_v30, %v1355_v31  ;;  %v1465_v42 = vld [vmem:[%s1736_s26 + $0xf4] sm:$0xf]  ;;  %v1363_v43 = vld [vmem:[%s1736_s26 + $0xf8] sm:$0xf0]  ;;  %v1302_v46 = vor.u32 %v1449_v40, %v1299_v41  ;;  %v1820_v55 = vld [vmem:[%s1919_s3] ss:$0 sm:$0xff] }
  0x23   : > { %v1366_v47 = vor.u32 %v1465_v42, %v1363_v43 }
  0x25   : > { %679 = vmatpush.bf16.msra.mxu0 %v1468_v12  ;;  %1584 = vmatpush.bf16.msra.mxu2 %v1468_v12  ;;  %v1281_v12 = vld [vmem:[%s1736_s26 + $0x50] sm:$0xf] }
  0x26   : > { %768 = vmatpush.bf16.msra.mxu1 %v1476_v13  ;;  %1592 = vmatpush.bf16.msra.mxu3 %v1476_v13  ;;  %v1446_v13 = vld [vmem:[%s1736_s26 + $0x54] sm:$0xf0] }
  0x27   : > { %v1282_v20 = vor.u32 %v1446_v13, %v1281_v12 }
  0x29   : > { %680 = vmatpush.bf16.msra.mxu0 %v1467_v14  ;;  %1585 = vmatpush.bf16.msra.mxu2 %v1467_v14  ;;  %v1345_v14 = vld [vmem:[%s1736_s26 + $0xd0] sm:$0xf] }
  0x2a   : > { %769 = vmatpush.bf16.msra.mxu1 %v1475_v15  ;;  %1593 = vmatpush.bf16.msra.mxu3 %v1475_v15  ;;  %v1462_v15 = vld [vmem:[%s1736_s26 + $0xd4] sm:$0xf0] }
  0x2b   : > { %v1346_v21 = vor.u32 %v1462_v15, %v1345_v14 }
  0x2c   : > { %681 = vmatmul.bf16.vlgmr.msra.gmra.mxu0 %v1242_v24  ;;  %721 = vmatmul.bf16.vlgmr.msra.gmra.mxu2 %v1306_v25  ;;  %v1289_v24 = vld [vmem:[%s1736_s26 + $0x60] sm:$0xf]  ;;  %v1448_v25 = vld [vmem:[%s1736_s26 + $0x64] sm:$0xf0] }
  0x2d   : > { %770 = vmatmul.bf16.vlgmr.msra.gmra.mxu1 %v1246_v26  ;;  %810 = vmatmul.bf16.vlgmr.msra.gmra.mxu3 %v1310_v27  ;;  %v1353_v26 = vld [vmem:[%s1736_s26 + $0xe0] sm:$0xf]  ;;  %v1464_v27 = vld [vmem:[%s1736_s26 + $0xe4] sm:$0xf0]  ;;  %v1290_v32 = vor.u32 %v1448_v25, %v1289_v24 }
  0x2e   : > { %v1354_v33 = vor.u32 %v1464_v27, %v1353_v26 }
  0x3c   : > { %686 = vmatmul.bf16.gmra.mxu0 %v1250_v36  ;;  %726 = vmatmul.bf16.gmra.mxu2 %v1314_v37  ;;  %v1297_v36 = vld [vmem:[%s1736_s26 + $0x70] sm:$0xf]  ;;  %v1450_v37 = vld [vmem:[%s1736_s26 + $0x74] sm:$0xf0] }
  0x3d   : > { %775 = vmatmul.bf16.gmra.mxu1 %v1254_v38  ;;  %815 = vmatmul.bf16.gmra.mxu3 %v1318_v39  ;;  %v1361_v38 = vld [vmem:[%s1736_s26 + $0xf0] sm:$0xf]  ;;  %v1466_v39 = vld [vmem:[%s1736_s26 + $0xf4] sm:$0xf0]  ;;  %v1298_v44 = vor.u32 %v1450_v37, %v1297_v36 }
  0x3e   : > { %v1362_v45 = vor.u32 %v1466_v39, %v1361_v38 }
  0x4c   : > { %691 = vmatmul.bf16.gmra.mxu0 %v1258_v48  ;;  %731 = vmatmul.bf16.gmra.mxu2 %v1322_v49 }
  0x4d   : > { %780 = vmatmul.bf16.gmra.mxu1 %v1262_v50  ;;  %820 = vmatmul.bf16.gmra.mxu3 %v1326_v51  ;;  %v1814_v51 = vld [vmem:[%s1918_s2] ss:$0 sm:$0xff] }
  0x5c   : > { %696 = vmatmul.bf16.gmra.mxu0 %v1266_v60  ;;  %736 = vmatmul.bf16.gmra.mxu2 %v1330_v61 }
  0x5d   : > { %785 = vmatmul.bf16.gmra.mxu1 %v1270_v62  ;;  %825 = vmatmul.bf16.gmra.mxu3 %v1334_v63 }
  0x6c   : > { %701 = vmatmul.bf16.gmra.mxu0 %v1274_v8  ;;  %741 = vmatmul.bf16.gmra.mxu2 %v1338_v9 }
  0x6d   : > { %790 = vmatmul.bf16.gmra.mxu1 %v1278_v10  ;;  %830 = vmatmul.bf16.gmra.mxu3 %v1342_v11 }
  0x7c   : > { %706 = vmatmul.bf16.gmra.mxu0 %v1282_v20  ;;  %746 = vmatmul.bf16.gmra.mxu2 %v1346_v21 }
  0x7d   : > { %795 = vmatmul.bf16.gmra.mxu1 %v1286_v22  ;;  %835 = vmatmul.bf16.gmra.mxu3 %v1350_v23 }
  0x8c   : > { %711 = vmatmul.bf16.gmra.mxu0 %v1290_v32  ;;  %751 = vmatmul.bf16.gmra.mxu2 %v1354_v33 }
  0x8d   : > { %800 = vmatmul.bf16.gmra.mxu1 %v1294_v34  ;;  %840 = vmatmul.bf16.gmra.mxu3 %v1358_v35 }
  0x9c   : > { %716 = vmatmul.bf16.gmra.mxu0 %v1298_v44  ;;  %756 = vmatmul.bf16.gmra.mxu2 %v1362_v45 }
  0x9d   : > { %805 = vmatmul.bf16.gmra.mxu1 %v1302_v46  ;;  %845 = vmatmul.bf16.gmra.mxu3 %v1366_v47 }
  0xa9   : > { %v682_v48 = vpop.f32.mrf.mxu0 }
  0xaa   : > { %v771_v49 = vpop.f32.mrf.mxu1 }
  0xab   : > { %v772_v50 = vadd.f32 %v771_v49, %v682_v48 }
  0xad   : > { %v954_v54 = vmul.f32 %v1814_v51, %v772_v50 }
  0xaf   : > { %v722_v52 = vpop.f32.mrf.mxu2  ;;  %v990_v60 = vadd.f32 %v1820_v55, %v954_v54 }
  0xb0   : > { %v811_v53 = vpop.f32.mrf.mxu3 }
  0xb1   : > { %v684_v56 = vpop.f32.mrf.mxu0  ;;  %v812_v58 = vadd.f32 %v811_v53, %v722_v52  ;;  %v1022_v2 = vmax.f32 %v990_v60, 0.0 }
  0xb2   : > { %v773_v57 = vpop.f32.mrf.mxu1 }
  0xb3   : > { %v774_v59 = vadd.f32 %v773_v57, %v684_v56  ;;  %v970_v62 = vmul.f32 %v1814_v51, %v812_v58 }
  0xb5   : > { %v955_v61 = vmul.f32 %v1814_v51, %v774_v59  ;;  %v1006_v7 = vadd.f32 %v1820_v55, %v970_v62 }
  0xb7   : > { %v991_v63 = vadd.f32 %v1820_v55, %v955_v61  ;;  %v724_v0 = vpop.f32.mrf.mxu2  ;;  %v1038_v12 = vmax.f32 %v1006_v7, 0.0 }
  0xb8   : > { %v813_v1 = vpop.f32.mrf.mxu3 }
  0xb9   : > { %v1023_v3 = vmax.f32 %v991_v63, 0.0  ;;  %v814_v4 = vadd.f32 %v813_v1, %v724_v0  ;;  %v687_v5 = vpop.f32.mrf.mxu0 }
  0xba   : > { %v776_v6 = vpop.f32.mrf.mxu1 }
  0xbb   : > { %v1486_v8 = vpack.c.bf16 %v1023_v3, %v1022_v2  ;;  %v971_v9 = vmul.f32 %v1814_v51, %v814_v4  ;;  %v777_v11 = vadd.f32 %v776_v6, %v687_v5 }
  0xbd   : > { %1487 = vst [vmem:[%s1830_s14] sm:$0xff] %v1486_v8   ;;  %v1007_v10 = vadd.f32 %v1820_v55, %v971_v9  ;;  %v956_v17 = vmul.f32 %v1814_v51, %v777_v11 }
  0xbf   : > { %v1039_v13 = vmax.f32 %v1007_v10, 0.0  ;;  %v727_v14 = vpop.f32.mrf.mxu2  ;;  %v992_v22 = vadd.f32 %v1820_v55, %v956_v17 }
  0xc0   : > { %v816_v15 = vpop.f32.mrf.mxu3 }
  0xc1   : > { %v1526_v16 = vpack.c.bf16 %v1039_v13, %v1038_v12  ;;  %v689_v18 = vpop.f32.mrf.mxu0  ;;  %v817_v20 = vadd.f32 %v816_v15, %v727_v14  ;;  %v1024_v28 = vmax.f32 %v992_v22, 0.0 }
  0xc2   : > { %v778_v19 = vpop.f32.mrf.mxu1 }
  0xc3   : > { %1570 = vst [vmem:[%s1830_s14 + $0x40] sm:$0xff] %v1526_v16   ;;  %v779_v21 = vadd.f32 %v778_v19, %v689_v18  ;;  %v972_v24 = vmul.f32 %v1814_v51, %v817_v20 }
  0xc5   : > { %v957_v23 = vmul.f32 %v1814_v51, %v779_v21  ;;  %v1008_v33 = vadd.f32 %v1820_v55, %v972_v24 }
  0xc7   : > { %v993_v25 = vadd.f32 %v1820_v55, %v957_v23  ;;  %v729_v26 = vpop.f32.mrf.mxu2  ;;  %v1040_v38 = vmax.f32 %v1008_v33, 0.0 }
  0xc8   : > { %v818_v27 = vpop.f32.mrf.mxu3 }
  0xc9   : > { %v1025_v29 = vmax.f32 %v993_v25, 0.0  ;;  %v819_v30 = vadd.f32 %v818_v27, %v729_v26  ;;  %v692_v31 = vpop.f32.mrf.mxu0 }
  0xca   : > { %v781_v32 = vpop.f32.mrf.mxu1 }
  0xcb   : > { %v1491_v34 = vpack.c.bf16 %v1025_v29, %v1024_v28  ;;  %v973_v35 = vmul.f32 %v1814_v51, %v819_v30  ;;  %v782_v37 = vadd.f32 %v781_v32, %v692_v31 }
  0xcd   : > { %1563 = vst [vmem:[%s1830_s14 + $0x8] sm:$0xff] %v1491_v34   ;;  %v1009_v36 = vadd.f32 %v1820_v55, %v973_v35  ;;  %v958_v43 = vmul.f32 %v1814_v51, %v782_v37 }
  0xcf   : > { %v1041_v39 = vmax.f32 %v1009_v36, 0.0  ;;  %v732_v40 = vpop.f32.mrf.mxu2  ;;  %v994_v48 = vadd.f32 %v1820_v55, %v958_v43 }
  0xd0   : > { %v821_v41 = vpop.f32.mrf.mxu3 }
  0xd1   : > { %v1531_v42 = vpack.c.bf16 %v1041_v39, %v1040_v38  ;;  %v694_v44 = vpop.f32.mrf.mxu0  ;;  %v822_v46 = vadd.f32 %v821_v41, %v732_v40  ;;  %v1026_v56 = vmax.f32 %v994_v48, 0.0 }
  0xd2   : > { %v783_v45 = vpop.f32.mrf.mxu1 }
  0xd3   : > { %1571 = vst [vmem:[%s1830_s14 + $0x48] sm:$0xff] %v1531_v42   ;;  %v784_v47 = vadd.f32 %v783_v45, %v694_v44  ;;  %v974_v50 = vmul.f32 %v1814_v51, %v822_v46 }
  0xd5   : > { %v959_v49 = vmul.f32 %v1814_v51, %v784_v47  ;;  %v1010_v61 = vadd.f32 %v1820_v55, %v974_v50 }
  0xd7   : > { %v995_v52 = vadd.f32 %v1820_v55, %v959_v49  ;;  %v734_v53 = vpop.f32.mrf.mxu2  ;;  %v1042_v2 = vmax.f32 %v1010_v61, 0.0 }
  0xd8   : > { %v823_v54 = vpop.f32.mrf.mxu3 }
  0xd9   : > { %v1027_v57 = vmax.f32 %v995_v52, 0.0  ;;  %v824_v58 = vadd.f32 %v823_v54, %v734_v53  ;;  %v697_v59 = vpop.f32.mrf.mxu0 }
  0xda   : > { %v786_v60 = vpop.f32.mrf.mxu1 }
  0xdb   : > { %v1496_v62 = vpack.c.bf16 %v1027_v57, %v1026_v56  ;;  %v975_v63 = vmul.f32 %v1814_v51, %v824_v58  ;;  %v787_v1 = vadd.f32 %v786_v60, %v697_v59 }
  0xdd   : > { %1564 = vst [vmem:[%s1830_s14 + $0x10] sm:$0xff] %v1496_v62   ;;  %v1011_v0 = vadd.f32 %v1820_v55, %v975_v63  ;;  %v960_v7 = vmul.f32 %v1814_v51, %v787_v1 }
  0xdf   : > { %v1043_v3 = vmax.f32 %v1011_v0, 0.0  ;;  %v737_v4 = vpop.f32.mrf.mxu2  ;;  %v996_v12 = vadd.f32 %v1820_v55, %v960_v7 }
  0xe0   : > { %v826_v5 = vpop.f32.mrf.mxu3 }
  0xe1   : > { %v1536_v6 = vpack.c.bf16 %v1043_v3, %v1042_v2  ;;  %v699_v8 = vpop.f32.mrf.mxu0  ;;  %v827_v10 = vadd.f32 %v826_v5, %v737_v4  ;;  %v1028_v18 = vmax.f32 %v996_v12, 0.0 }
  0xe2   : > { %v788_v9 = vpop.f32.mrf.mxu1 }
  0xe3   : > { %1572 = vst [vmem:[%s1830_s14 + $0x50] sm:$0xff] %v1536_v6   ;;  %v789_v11 = vadd.f32 %v788_v9, %v699_v8  ;;  %v976_v14 = vmul.f32 %v1814_v51, %v827_v10 }
  0xe5   : > { %v961_v13 = vmul.f32 %v1814_v51, %v789_v11  ;;  %v1012_v23 = vadd.f32 %v1820_v55, %v976_v14 }
  0xe7   : > { %v997_v15 = vadd.f32 %v1820_v55, %v961_v13  ;;  %v739_v16 = vpop.f32.mrf.mxu2  ;;  %v1044_v28 = vmax.f32 %v1012_v23, 0.0 }
  0xe8   : > { %v828_v17 = vpop.f32.mrf.mxu3 }
  0xe9   : > { %v1029_v19 = vmax.f32 %v997_v15, 0.0  ;;  %v829_v20 = vadd.f32 %v828_v17, %v739_v16  ;;  %v702_v21 = vpop.f32.mrf.mxu0 }
  0xea   : > { %v791_v22 = vpop.f32.mrf.mxu1 }
  0xeb   : > { %v1501_v24 = vpack.c.bf16 %v1029_v19, %v1028_v18  ;;  %v977_v25 = vmul.f32 %v1814_v51, %v829_v20  ;;  %v792_v27 = vadd.f32 %v791_v22, %v702_v21 }
  0xed   : > { %1565 = vst [vmem:[%s1830_s14 + $0x18] sm:$0xff] %v1501_v24   ;;  %v1013_v26 = vadd.f32 %v1820_v55, %v977_v25  ;;  %v962_v33 = vmul.f32 %v1814_v51, %v792_v27 }
  0xef   : > { %v1045_v29 = vmax.f32 %v1013_v26, 0.0  ;;  %v742_v30 = vpop.f32.mrf.mxu2  ;;  %v998_v38 = vadd.f32 %v1820_v55, %v962_v33 }
  0xf0   : > { %v831_v31 = vpop.f32.mrf.mxu3 }
  0xf1   : > { %v1541_v32 = vpack.c.bf16 %v1045_v29, %v1044_v28  ;;  %v704_v34 = vpop.f32.mrf.mxu0  ;;  %v832_v36 = vadd.f32 %v831_v31, %v742_v30  ;;  %v1030_v44 = vmax.f32 %v998_v38, 0.0 }
  0xf2   : > { %v793_v35 = vpop.f32.mrf.mxu1 }
  0xf3   : > { %1573 = vst [vmem:[%s1830_s14 + $0x58] sm:$0xff] %v1541_v32   ;;  %v794_v37 = vadd.f32 %v793_v35, %v704_v34  ;;  %v978_v40 = vmul.f32 %v1814_v51, %v832_v36 }
  0xf5   : > { %v963_v39 = vmul.f32 %v1814_v51, %v794_v37  ;;  %v1014_v49 = vadd.f32 %v1820_v55, %v978_v40 }
  0xf7   : > { %v999_v41 = vadd.f32 %v1820_v55, %v963_v39  ;;  %v744_v42 = vpop.f32.mrf.mxu2  ;;  %v1046_v56 = vmax.f32 %v1014_v49, 0.0 }
  0xf8   : > { %v833_v43 = vpop.f32.mrf.mxu3 }
  0xf9   : > { %v1031_v45 = vmax.f32 %v999_v41, 0.0  ;;  %v834_v46 = vadd.f32 %v833_v43, %v744_v42  ;;  %v707_v47 = vpop.f32.mrf.mxu0 }
  0xfa   : > { %v796_v48 = vpop.f32.mrf.mxu1 }
  0xfb   : > { %v1506_v50 = vpack.c.bf16 %v1031_v45, %v1030_v44  ;;  %v979_v52 = vmul.f32 %v1814_v51, %v834_v46  ;;  %v797_v54 = vadd.f32 %v796_v48, %v707_v47 }
  0xfd   : > { %1566 = vst [vmem:[%s1830_s14 + $0x20] sm:$0xff] %v1506_v50   ;;  %v1015_v53 = vadd.f32 %v1820_v55, %v979_v52  ;;  %v964_v61 = vmul.f32 %v1814_v51, %v797_v54 }
  0xff   : > { %v1047_v57 = vmax.f32 %v1015_v53, 0.0  ;;  %v747_v58 = vpop.f32.mrf.mxu2  ;;  %v1000_v2 = vadd.f32 %v1820_v55, %v964_v61 }
 0x100   : > { %v836_v59 = vpop.f32.mrf.mxu3 }
 0x101   : > { %v1546_v60 = vpack.c.bf16 %v1047_v57, %v1046_v56  ;;  %v709_v62 = vpop.f32.mrf.mxu0  ;;  %v837_v0 = vadd.f32 %v836_v59, %v747_v58  ;;  %v1032_v8 = vmax.f32 %v1000_v2, 0.0 }
 0x102   : > { %v798_v63 = vpop.f32.mrf.mxu1 }
 0x103   : > { %1574 = vst [vmem:[%s1830_s14 + $0x60] sm:$0xff] %v1546_v60   ;;  %v799_v1 = vadd.f32 %v798_v63, %v709_v62  ;;  %v980_v4 = vmul.f32 %v1814_v51, %v837_v0 }
 0x105   : > { %v965_v3 = vmul.f32 %v1814_v51, %v799_v1  ;;  %v1016_v13 = vadd.f32 %v1820_v55, %v980_v4 }
 0x107   : > { %v1001_v5 = vadd.f32 %v1820_v55, %v965_v3  ;;  %v749_v6 = vpop.f32.mrf.mxu2  ;;  %v1048_v18 = vmax.f32 %v1016_v13, 0.0 }
 0x108   : > { %v838_v7 = vpop.f32.mrf.mxu3 }
 0x109   : > { %v1033_v9 = vmax.f32 %v1001_v5, 0.0  ;;  %v839_v10 = vadd.f32 %v838_v7, %v749_v6  ;;  %v712_v11 = vpop.f32.mrf.mxu0 }
 0x10a   : > { %v801_v12 = vpop.f32.mrf.mxu1 }
 0x10b   : > { %v1511_v14 = vpack.c.bf16 %v1033_v9, %v1032_v8  ;;  %v981_v15 = vmul.f32 %v1814_v51, %v839_v10  ;;  %v802_v17 = vadd.f32 %v801_v12, %v712_v11 }
 0x10d   : > { %1567 = vst [vmem:[%s1830_s14 + $0x28] sm:$0xff] %v1511_v14   ;;  %v1017_v16 = vadd.f32 %v1820_v55, %v981_v15  ;;  %v966_v23 = vmul.f32 %v1814_v51, %v802_v17 }
 0x10f   : > { %v1049_v19 = vmax.f32 %v1017_v16, 0.0  ;;  %v752_v20 = vpop.f32.mrf.mxu2  ;;  %v1002_v28 = vadd.f32 %v1820_v55, %v966_v23 }
 0x110   : > { %v841_v21 = vpop.f32.mrf.mxu3 }
 0x111   : > { %v1551_v22 = vpack.c.bf16 %v1049_v19, %v1048_v18  ;;  %v714_v24 = vpop.f32.mrf.mxu0  ;;  %v842_v26 = vadd.f32 %v841_v21, %v752_v20  ;;  %v1034_v34 = vmax.f32 %v1002_v28, 0.0 }
 0x112   : > { %v803_v25 = vpop.f32.mrf.mxu1 }
 0x113   : > { %1575 = vst [vmem:[%s1830_s14 + $0x68] sm:$0xff] %v1551_v22   ;;  %v804_v27 = vadd.f32 %v803_v25, %v714_v24  ;;  %v982_v30 = vmul.f32 %v1814_v51, %v842_v26 }
 0x115   : > { %v967_v29 = vmul.f32 %v1814_v51, %v804_v27  ;;  %v1018_v39 = vadd.f32 %v1820_v55, %v982_v30 }
 0x117   : > { %v1003_v31 = vadd.f32 %v1820_v55, %v967_v29  ;;  %v754_v32 = vpop.f32.mrf.mxu2  ;;  %v1050_v44 = vmax.f32 %v1018_v39, 0.0 }
 0x118   : > { %v843_v33 = vpop.f32.mrf.mxu3 }
 0x119   : > { %v1035_v35 = vmax.f32 %v1003_v31, 0.0  ;;  %v844_v36 = vadd.f32 %v843_v33, %v754_v32  ;;  %v717_v37 = vpop.f32.mrf.mxu0 }
 0x11a   : > { %v806_v38 = vpop.f32.mrf.mxu1 }
 0x11b   : > { %v1516_v40 = vpack.c.bf16 %v1035_v35, %v1034_v34  ;;  %v983_v41 = vmul.f32 %v1814_v51, %v844_v36  ;;  %v807_v43 = vadd.f32 %v806_v38, %v717_v37 }
 0x11d   : > { %1568 = vst [vmem:[%s1830_s14 + $0x30] sm:$0xff] %v1516_v40   ;;  %v1019_v42 = vadd.f32 %v1820_v55, %v983_v41  ;;  %v968_v49 = vmul.f32 %v1814_v51, %v807_v43 }
 0x11f   : > { %v1051_v45 = vmax.f32 %v1019_v42, 0.0  ;;  %v757_v46 = vpop.f32.mrf.mxu2  ;;  %v1004_v56 = vadd.f32 %v1820_v55, %v968_v49 }
 0x120   : > { %v846_v47 = vpop.f32.mrf.mxu3 }
 0x121   : > { %v1556_v48 = vpack.c.bf16 %v1051_v45, %v1050_v44  ;;  %v719_v50 = vpop.f32.mrf.mxu0  ;;  %v847_v53 = vadd.f32 %v846_v47, %v757_v46  ;;  %v1036_v62 = vmax.f32 %v1004_v56, 0.0 }
 0x122   : > { %v808_v52 = vpop.f32.mrf.mxu1 }
 0x123   : > { %1576 = vst [vmem:[%s1830_s14 + $0x70] sm:$0xff] %v1556_v48   ;;  %v809_v54 = vadd.f32 %v808_v52, %v719_v50  ;;  %v984_v58 = vmul.f32 %v1814_v51, %v847_v53 }
 0x125   : > { %v969_v57 = vmul.f32 %v1814_v51, %v809_v54  ;;  %v1020_v1 = vadd.f32 %v1820_v55, %v984_v58 }
 0x127   : > { %v1005_v59 = vadd.f32 %v1820_v55, %v969_v57  ;;  %v759_v60 = vpop.f32.mrf.mxu2  ;;  %v1052_v5 = vmax.f32 %v1020_v1, 0.0 }
 0x128   : > { %v848_v61 = vpop.f32.mrf.mxu3 }
 0x129   : > { %v1037_v63 = vmax.f32 %v1005_v59, 0.0  ;;  %v849_v0 = vadd.f32 %v848_v61, %v759_v60 }
 0x12b   : > { %v1521_v2 = vpack.c.bf16 %v1037_v63, %v1036_v62  ;;  %v985_v3 = vmul.f32 %v1814_v51, %v849_v0 }
 0x12d   : > { %1569 = vst [vmem:[%s1830_s14 + $0x38] sm:$0xff] %v1521_v2   ;;  %v1021_v4 = vadd.f32 %v1820_v55, %v985_v3 }
 0x12f   : > { %v1053_v6 = vmax.f32 %v1021_v4, 0.0 }
 0x131   : > { %v1561_v7 = vpack.c.bf16 %v1053_v6, %v1052_v5 }
 0x133   : > { %1577 = vst [vmem:[%s1830_s14 + $0x78] sm:$0xff] %v1561_v7  }
 0x134 PF: > { %s14_s17 = sadd.s32 1, %s1642_s17   ;;  %s1921_s15 = smov %s1638_s16 }
 0x135   : > { %p11_p5 = scmp.ge.s32.totalorder %s14_s17, 4   ;;  %s1922_s16 = smov %s1924_s18 }
 0x137   :  { %13 = sbr.rel (!%p11_p5) target bundleno = 2 (0x2), region = 77 }

// kernel: a_unet_forward.45
= control target key start
LH: loop header
LB: loop body
LE: loop exit
PB: predicated region body
PF: predicated region fallthrough
CT: control target
= control target key end

     0   :  { %s1170_s15 = smov 0   ;;  %s1172_s16 = smov 0   ;;  %s1361_s0 = inlined_call_operand.vmem [shape: bf16[2,256,128], index: 0, kind: input, shape index: {}]   ;;  %s1362_s1 = inlined_call_operand.vmem [shape: bf16[128,128], index: 1, kind: input, shape index: {}]   ;;  %s1363_s2 = inlined_call_operand.vmem [shape: f32[1,128], index: 2, kind: input, shape index: {}]   ;;  %s1364_s3 = inlined_call_operand.vmem [shape: f32[1,128], index: 3, kind: input, shape index: {}]   ;;  %s1365_s4 = inlined_call_operand.vmem [shape: f32[2,256,128], index: 4, kind: output, shape index: {}]  }
   0x1   :  { %s1174_s17 = smov 0  }
   0x2 LB: > { %s33_s18 = sadd.s32 1, %s1139_s16  ;;  %p942_p0 = scmp.ge.s32.totalorder %s1143_s17, 1  ;;  %s1143_s17 = sphi %s1174_s17, %s14_s17   ;;  %s1139_s16 = sphi %s1172_s16, %s1367_s16   ;;  %s1135_s15 = sphi %s1170_s15, %s1366_s15  }
   0x3   : > { %p35_p1 = scmp.ge.s32.totalorder %s33_s18, 2  ;;  %p206_p2 = scmp.lt.s32.totalorder %s1143_s17, 3 }
   0x5   : > { %s1369_s18 = smov (%p35_p1, %s33_s18), 0  ;;  %p207_p3 = pnand %p942_p0, %p206_p2 }
   0x6   : > { %p249_p4 = scmp.lt.s32.totalorder (!%p207_p3), %s1135_s15, 1 }
   0x7   : > { %210 = sbr.rel (%p207_p3) target bundleno = 239 (0xef), region = 36 }
   0xc   : > { %v1070_v0 = vld [vmem:[%s1362_s1 + $0x38] sm:$0xff]  ;;  %v1069_v1 = vld [vmem:[%s1362_s1 + $0x30] sm:$0xff]  ;;  %v1068_v2 = vld [vmem:[%s1362_s1 + $0x28] sm:$0xff]  ;;  %s1371_s15 = smov (!%p249_p4, %s1135_s15), 1 }
   0xd   : > { %537 = vmatpush.bf16.msra.mxu0 %v1070_v0  ;;  %1071 = vmatpush.bf16.msra.mxu1 %v1070_v0  ;;  %v1067_v3 = vld [vmem:[%s1362_s1 + $0x20] sm:$0xff]  ;;  %v1066_v4 = vld [vmem:[%s1362_s1 + $0x18] sm:$0xff]  ;;  %v1065_v5 = vld [vmem:[%s1362_s1 + $0x10] sm:$0xff]  ;;  %s1045_s7 = sshll.u32 %s1371_s15, 7  ;;  %s1046_s19 = sshll.u32 %s1371_s15, 8 }
   0xe   : > { %1072 = vmatpush.bf16.msra.mxu2 %v1070_v0  ;;  %1073 = vmatpush.bf16.msra.mxu3 %v1070_v0  ;;  %v1064_v6 = vld [vmem:[%s1362_s1 + $0x8] sm:$0xff]  ;;  %v1063_v7 = vld [vmem:[%s1362_s1] sm:$0xff]  ;;  %s1222_s12 = scalar_lea.vmem %s1361_s0, %s1045_s7  ;;  %s1256_s24 = scalar_lea.vmem %s1365_s4, %s1046_s19 }
   0xf   : > { %v1047_v8 = vld [vmem:[%s1222_s12] sm:$0xff]  ;;  %v1048_v12 = vld [vmem:[%s1222_s12 + $0x8] sm:$0xff]  ;;  %v1049_v16 = vld [vmem:[%s1222_s12 + $0x10] sm:$0xff] }
  0x10   : > { %v1051_v9 = vld [vmem:[%s1222_s12 + $0x20] sm:$0xff]  ;;  %v1052_v13 = vld [vmem:[%s1222_s12 + $0x28] sm:$0xff]  ;;  %v1053_v17 = vld [vmem:[%s1222_s12 + $0x30] sm:$0xff] }
  0x11   : > { %538 = vmatpush.bf16.msra.mxu0 %v1069_v1  ;;  %1074 = vmatpush.bf16.msra.mxu1 %v1069_v1  ;;  %v1055_v10 = vld [vmem:[%s1222_s12 + $0x40] sm:$0xff]  ;;  %v1056_v14 = vld [vmem:[%s1222_s12 + $0x48] sm:$0xff]  ;;  %v1057_v18 = vld [vmem:[%s1222_s12 + $0x50] sm:$0xff] }
  0x12   : > { %1075 = vmatpush.bf16.msra.mxu2 %v1069_v1  ;;  %1076 = vmatpush.bf16.msra.mxu3 %v1069_v1  ;;  %v1059_v11 = vld [vmem:[%s1222_s12 + $0x60] sm:$0xff]  ;;  %v1060_v15 = vld [vmem:[%s1222_s12 + $0x68] sm:$0xff]  ;;  %v1061_v19 = vld [vmem:[%s1222_s12 + $0x70] sm:$0xff] }
  0x13   : > { %v1050_v20 = vld [vmem:[%s1222_s12 + $0x18] sm:$0xff]  ;;  %v1243_v24 = vld [vmem:[%s1363_s2] ss:$0 sm:$0xff] }
  0x14   : > { %v1054_v21 = vld [vmem:[%s1222_s12 + $0x38] sm:$0xff]  ;;  %v1249_v25 = vld [vmem:[%s1364_s3] ss:$0 sm:$0xff] }
  0x15   : > { %539 = vmatpush.bf16.msra.mxu0 %v1068_v2  ;;  %1077 = vmatpush.bf16.msra.mxu1 %v1068_v2  ;;  %v1058_v22 = vld [vmem:[%s1222_s12 + $0x58] sm:$0xff] }
  0x16   : > { %1078 = vmatpush.bf16.msra.mxu2 %v1068_v2  ;;  %1079 = vmatpush.bf16.msra.mxu3 %v1068_v2  ;;  %v1062_v23 = vld [vmem:[%s1222_s12 + $0x78] sm:$0xff] }
  0x19   : > { %540 = vmatpush.bf16.msra.mxu0 %v1067_v3  ;;  %1080 = vmatpush.bf16.msra.mxu1 %v1067_v3 }
  0x1a   : > { %1081 = vmatpush.bf16.msra.mxu2 %v1067_v3  ;;  %1082 = vmatpush.bf16.msra.mxu3 %v1067_v3 }
  0x1d   : > { %541 = vmatpush.bf16.msra.mxu0 %v1066_v4  ;;  %1083 = vmatpush.bf16.msra.mxu1 %v1066_v4 }
  0x1e   : > { %1084 = vmatpush.bf16.msra.mxu2 %v1066_v4  ;;  %1085 = vmatpush.bf16.msra.mxu3 %v1066_v4 }
  0x21   : > { %542 = vmatpush.bf16.msra.mxu0 %v1065_v5  ;;  %1086 = vmatpush.bf16.msra.mxu1 %v1065_v5 }
  0x22   : > { %1087 = vmatpush.bf16.msra.mxu2 %v1065_v5  ;;  %1088 = vmatpush.bf16.msra.mxu3 %v1065_v5 }
  0x25   : > { %543 = vmatpush.bf16.msra.mxu0 %v1064_v6  ;;  %1089 = vmatpush.bf16.msra.mxu1 %v1064_v6 }
  0x26   : > { %1090 = vmatpush.bf16.msra.mxu2 %v1064_v6  ;;  %1091 = vmatpush.bf16.msra.mxu3 %v1064_v6 }
  0x29   : > { %544 = vmatpush.bf16.msra.mxu0 %v1063_v7  ;;  %1092 = vmatpush.bf16.msra.mxu1 %v1063_v7 }
  0x2a   : > { %1093 = vmatpush.bf16.msra.mxu2 %v1063_v7  ;;  %1094 = vmatpush.bf16.msra.mxu3 %v1063_v7 }
  0x2c   : > { %545 = vmatmul.bf16.vlgmr.msra.gmra.mxu0 %v1047_v8  ;;  %565 = vmatmul.bf16.vlgmr.msra.gmra.mxu1 %v1051_v9 }
  0x2d   : > { %585 = vmatmul.bf16.vlgmr.msra.gmra.mxu2 %v1055_v10  ;;  %605 = vmatmul.bf16.vlgmr.msra.gmra.mxu3 %v1059_v11 }
  0x3c   : > { %550 = vmatmul.bf16.gmra.mxu0 %v1048_v12  ;;  %570 = vmatmul.bf16.gmra.mxu1 %v1052_v13 }
  0x3d   : > { %590 = vmatmul.bf16.gmra.mxu2 %v1056_v14  ;;  %610 = vmatmul.bf16.gmra.mxu3 %v1060_v15 }
  0x4c   : > { %555 = vmatmul.bf16.gmra.mxu0 %v1049_v16  ;;  %575 = vmatmul.bf16.gmra.mxu1 %v1053_v17 }
  0x4d   : > { %595 = vmatmul.bf16.gmra.mxu2 %v1057_v18  ;;  %615 = vmatmul.bf16.gmra.mxu3 %v1061_v19 }
  0x5c   : > { %560 = vmatmul.bf16.gmra.mxu0 %v1050_v20  ;;  %580 = vmatmul.bf16.gmra.mxu1 %v1054_v21 }
  0x5d   : > { %600 = vmatmul.bf16.gmra.mxu2 %v1058_v22  ;;  %620 = vmatmul.bf16.gmra.mxu3 %v1062_v23 }
  0xa9   : > { %v546_v26 = vpop.f32.mrf.mxu0  ;;  %v566_v27 = vpop.f32.mrf.mxu1 }
  0xaa   : > { %v729_v28 = vmul.f32 %v1243_v24, %v546_v26  ;;  %v737_v29 = vmul.f32 %v1243_v24, %v566_v27 }
  0xac   : > { %v765_v30 = vadd.f32 %v1249_v25, %v729_v28  ;;  %v773_v31 = vadd.f32 %v1249_v25, %v737_v29 }
  0xae   : > { %797 = vst [vmem:[%s1256_s24] sm:$0xff] %v765_v30 }
  0xaf   : > { %805 = vst [vmem:[%s1256_s24 + $0x40] sm:$0xff] %v773_v31 }
  0xb0   : > { %v586_v32 = vpop.f32.mrf.mxu2  ;;  %v606_v33 = vpop.f32.mrf.mxu3 }
  0xb1   : > { %v745_v34 = vmul.f32 %v1243_v24, %v586_v32  ;;  %v753_v35 = vmul.f32 %v1243_v24, %v606_v33  ;;  %v548_v36 = vpop.f32.mrf.mxu0  ;;  %v568_v37 = vpop.f32.mrf.mxu1 }
  0xb2   : > { %v730_v38 = vmul.f32 %v1243_v24, %v548_v36  ;;  %v738_v39 = vmul.f32 %v1243_v24, %v568_v37 }
  0xb3   : > { %v781_v40 = vadd.f32 %v1249_v25, %v745_v34  ;;  %v789_v41 = vadd.f32 %v1249_v25, %v753_v35 }
  0xb4   : > { %v766_v42 = vadd.f32 %v1249_v25, %v730_v38  ;;  %v774_v43 = vadd.f32 %v1249_v25, %v738_v39 }
  0xb5   : > { %813 = vst [vmem:[%s1256_s24 + $0x80] sm:$0xff] %v781_v40 }
  0xb6   : > { %821 = vst [vmem:[%s1256_s24 + $0xc0] sm:$0xff] %v789_v41 }
  0xb7   : > { %798 = vst [vmem:[%s1256_s24 + $0x8] sm:$0xff] %v766_v42 }
  0xb8   : > { %806 = vst [vmem:[%s1256_s24 + $0x48] sm:$0xff] %v774_v43  ;;  %v588_v44 = vpop.f32.mrf.mxu2  ;;  %v608_v45 = vpop.f32.mrf.mxu3 }
  0xb9   : > { %v746_v46 = vmul.f32 %v1243_v24, %v588_v44  ;;  %v754_v47 = vmul.f32 %v1243_v24, %v608_v45  ;;  %v551_v48 = vpop.f32.mrf.mxu0  ;;  %v571_v49 = vpop.f32.mrf.mxu1 }
  0xba   : > { %v731_v50 = vmul.f32 %v1243_v24, %v551_v48  ;;  %v739_v51 = vmul.f32 %v1243_v24, %v571_v49 }
  0xbb   : > { %v782_v52 = vadd.f32 %v1249_v25, %v746_v46  ;;  %v790_v53 = vadd.f32 %v1249_v25, %v754_v47 }
  0xbc   : > { %v767_v54 = vadd.f32 %v1249_v25, %v731_v50  ;;  %v775_v55 = vadd.f32 %v1249_v25, %v739_v51 }
  0xbd   : > { %814 = vst [vmem:[%s1256_s24 + $0x88] sm:$0xff] %v782_v52 }
  0xbe   : > { %822 = vst [vmem:[%s1256_s24 + $0xc8] sm:$0xff] %v790_v53 }
  0xbf   : > { %799 = vst [vmem:[%s1256_s24 + $0x10] sm:$0xff] %v767_v54 }
  0xc0   : > { %807 = vst [vmem:[%s1256_s24 + $0x50] sm:$0xff] %v775_v55  ;;  %v591_v56 = vpop.f32.mrf.mxu2  ;;  %v611_v57 = vpop.f32.mrf.mxu3 }
  0xc1   : > { %v747_v58 = vmul.f32 %v1243_v24, %v591_v56  ;;  %v755_v59 = vmul.f32 %v1243_v24, %v611_v57  ;;  %v553_v60 = vpop.f32.mrf.mxu0  ;;  %v573_v61 = vpop.f32.mrf.mxu1 }
  0xc2   : > { %v732_v62 = vmul.f32 %v1243_v24, %v553_v60  ;;  %v740_v63 = vmul.f32 %v1243_v24, %v573_v61 }
  0xc3   : > { %v783_v0 = vadd.f32 %v1249_v25, %v747_v58  ;;  %v791_v1 = vadd.f32 %v1249_v25, %v755_v59 }
  0xc4   : > { %v768_v2 = vadd.f32 %v1249_v25, %v732_v62  ;;  %v776_v3 = vadd.f32 %v1249_v25, %v740_v63 }
  0xc5   : > { %815 = vst [vmem:[%s1256_s24 + $0x90] sm:$0xff] %v783_v0 }
  0xc6   : > { %823 = vst [vmem:[%s1256_s24 + $0xd0] sm:$0xff] %v791_v1 }
  0xc7   : > { %800 = vst [vmem:[%s1256_s24 + $0x18] sm:$0xff] %v768_v2 }
  0xc8   : > { %808 = vst [vmem:[%s1256_s24 + $0x58] sm:$0xff] %v776_v3  ;;  %v593_v4 = vpop.f32.mrf.mxu2  ;;  %v613_v5 = vpop.f32.mrf.mxu3 }
  0xc9   : > { %v748_v6 = vmul.f32 %v1243_v24, %v593_v4  ;;  %v756_v7 = vmul.f32 %v1243_v24, %v613_v5  ;;  %v556_v8 = vpop.f32.mrf.mxu0  ;;  %v576_v9 = vpop.f32.mrf.mxu1 }
  0xca   : > { %v733_v10 = vmul.f32 %v1243_v24, %v556_v8  ;;  %v741_v11 = vmul.f32 %v1243_v24, %v576_v9 }
  0xcb   : > { %v784_v12 = vadd.f32 %v1249_v25, %v748_v6  ;;  %v792_v13 = vadd.f32 %v1249_v25, %v756_v7 }
  0xcc   : > { %v769_v14 = vadd.f32 %v1249_v25, %v733_v10  ;;  %v777_v15 = vadd.f32 %v1249_v25, %v741_v11 }
  0xcd   : > { %816 = vst [vmem:[%s1256_s24 + $0x98] sm:$0xff] %v784_v12 }
  0xce   : > { %824 = vst [vmem:[%s1256_s24 + $0xd8] sm:$0xff] %v792_v13 }
  0xcf   : > { %801 = vst [vmem:[%s1256_s24 + $0x20] sm:$0xff] %v769_v14 }
  0xd0   : > { %809 = vst [vmem:[%s1256_s24 + $0x60] sm:$0xff] %v777_v15  ;;  %v596_v16 = vpop.f32.mrf.mxu2  ;;  %v616_v17 = vpop.f32.mrf.mxu3 }
  0xd1   : > { %v749_v18 = vmul.f32 %v1243_v24, %v596_v16  ;;  %v757_v19 = vmul.f32 %v1243_v24, %v616_v17  ;;  %v558_v20 = vpop.f32.mrf.mxu0  ;;  %v578_v21 = vpop.f32.mrf.mxu1 }
  0xd2   : > { %v734_v22 = vmul.f32 %v1243_v24, %v558_v20  ;;  %v742_v23 = vmul.f32 %v1243_v24, %v578_v21 }
  0xd3   : > { %v785_v26 = vadd.f32 %v1249_v25, %v749_v18  ;;  %v793_v27 = vadd.f32 %v1249_v25, %v757_v19 }
  0xd4   : > { %v770_v28 = vadd.f32 %v1249_v25, %v734_v22  ;;  %v778_v29 = vadd.f32 %v1249_v25, %v742_v23 }
  0xd5   : > { %817 = vst [vmem:[%s1256_s24 + $0xa0] sm:$0xff] %v785_v26 }
  0xd6   : > { %825 = vst [vmem:[%s1256_s24 + $0xe0] sm:$0xff] %v793_v27 }
  0xd7   : > { %802 = vst [vmem:[%s1256_s24 + $0x28] sm:$0xff] %v770_v28 }
  0xd8   : > { %810 = vst [vmem:[%s1256_s24 + $0x68] sm:$0xff] %v778_v29  ;;  %v598_v30 = vpop.f32.mrf.mxu2  ;;  %v618_v31 = vpop.f32.mrf.mxu3 }
  0xd9   : > { %v750_v32 = vmul.f32 %v1243_v24, %v598_v30  ;;  %v758_v33 = vmul.f32 %v1243_v24, %v618_v31  ;;  %v561_v34 = vpop.f32.mrf.mxu0  ;;  %v581_v35 = vpop.f32.mrf.mxu1 }
  0xda   : > { %v735_v36 = vmul.f32 %v1243_v24, %v561_v34  ;;  %v743_v37 = vmul.f32 %v1243_v24, %v581_v35 }
  0xdb   : > { %v786_v38 = vadd.f32 %v1249_v25, %v750_v32  ;;  %v794_v39 = vadd.f32 %v1249_v25, %v758_v33 }
  0xdc   : > { %v771_v40 = vadd.f32 %v1249_v25, %v735_v36  ;;  %v779_v41 = vadd.f32 %v1249_v25, %v743_v37 }
  0xdd   : > { %818 = vst [vmem:[%s1256_s24 + $0xa8] sm:$0xff] %v786_v38 }
  0xde   : > { %826 = vst [vmem:[%s1256_s24 + $0xe8] sm:$0xff] %v794_v39 }
  0xdf   : > { %803 = vst [vmem:[%s1256_s24 + $0x30] sm:$0xff] %v771_v40 }
  0xe0   : > { %811 = vst [vmem:[%s1256_s24 + $0x70] sm:$0xff] %v779_v41  ;;  %v601_v42 = vpop.f32.mrf.mxu2  ;;  %v621_v43 = vpop.f32.mrf.mxu3 }
  0xe1   : > { %v751_v44 = vmul.f32 %v1243_v24, %v601_v42  ;;  %v759_v45 = vmul.f32 %v1243_v24, %v621_v43  ;;  %v563_v46 = vpop.f32.mrf.mxu0  ;;  %v583_v47 = vpop.f32.mrf.mxu1 }
  0xe2   : > { %v736_v48 = vmul.f32 %v1243_v24, %v563_v46  ;;  %v744_v49 = vmul.f32 %v1243_v24, %v583_v47 }
  0xe3   : > { %v787_v50 = vadd.f32 %v1249_v25, %v751_v44  ;;  %v795_v51 = vadd.f32 %v1249_v25, %v759_v45 }
  0xe4   : > { %v772_v52 = vadd.f32 %v1249_v25, %v736_v48  ;;  %v780_v53 = vadd.f32 %v1249_v25, %v744_v49 }
  0xe5   : > { %819 = vst [vmem:[%s1256_s24 + $0xb0] sm:$0xff] %v787_v50 }
  0xe6   : > { %827 = vst [vmem:[%s1256_s24 + $0xf0] sm:$0xff] %v795_v51 }
  0xe7   : > { %804 = vst [vmem:[%s1256_s24 + $0x38] sm:$0xff] %v772_v52 }
  0xe8   : > { %812 = vst [vmem:[%s1256_s24 + $0x78] sm:$0xff] %v780_v53  ;;  %v603_v54 = vpop.f32.mrf.mxu2  ;;  %v623_v55 = vpop.f32.mrf.mxu3 }
  0xe9   : > { %v752_v56 = vmul.f32 %v1243_v24, %v603_v54  ;;  %v760_v57 = vmul.f32 %v1243_v24, %v623_v55 }
  0xeb   : > { %v788_v58 = vadd.f32 %v1249_v25, %v752_v56  ;;  %v796_v59 = vadd.f32 %v1249_v25, %v760_v57 }
  0xed   : > { %820 = vst [vmem:[%s1256_s24 + $0xb8] sm:$0xff] %v788_v58 }
  0xee   : > { %828 = vst [vmem:[%s1256_s24 + $0xf8] sm:$0xff] %v796_v59 }
  0xef PF: > { %s14_s17 = sadd.s32 1, %s1143_s17   ;;  %s1366_s15 = smov %s1139_s16 }
  0xf0   : > { %p11_p5 = scmp.ge.s32.totalorder %s14_s17, 4   ;;  %s1367_s16 = smov %s1369_s18 }
  0xf2   :  { %13 = sbr.rel (!%p11_p5) target bundleno = 2 (0x2), region = 77 }

</bundles_post_ra>
